<compile_context>
chip_gen: v7x
topology: tpu7x:2x2x1
jax: 0.10.0
libtpu: 0.0.40
codegen_flags: <defaults>
</compile_context>

<pallas_src>
import functools

import numpy as np

import jax
import jax.numpy as jnp
from jax import lax
from jax.experimental import pallas as pl
from jax.experimental.pallas import tpu as pltpu


# ----------------------------------------------------------------------------
# Fused kernel (one batch element per grid step)
# ----------------------------------------------------------------------------
def _fused_block_kernel(xs_ref, sc_ref, w1_ref, w2_ref, w123_ref, b2_ref,
                        alpha_ref, b3_ref, gmask_ref, *rest,
                        plan1, plan2, n_c, mm, ni, conv_shortcut):
    """Whole bottleneck block for one batch element.

    xs_ref:   (1, nsub, C_in, LL)  BN1-affined x, mod-(2*stride) sub-image
              slabs; each slab is (HS, PP) row-major with a zero gutter lane
              per row and `mm` zero margin lanes on both sides.
    sc_ref:   (1, 4, C_in, NI)     shortcut source in the output chunk layout.
    w1_ref:   (9, C, C_in)         conv1 taps, BN2 scale folded into rows.
    w2_ref:   (9, C, C)            conv2 taps, BN3 scale folded into rows.
    w123_ref: (3C, C)              [W1; W2; gamma*W3] of the SCA module.
    gmask_ref:(1, NI)              1 on pixel lanes, 0 on gutter lanes.
    out_ref:  (1, 4, C, NI)        output, chunk k = output parity (k//2, k%2).
    z1_ref:   (nsub, C, LL) VMEM scratch for the conv1 output slabs.
    """
    if conv_shortcut:
        wsc_ref, bsc_ref, out_ref, z1_ref = rest
    else:
        out_ref, z1_ref = rest
    f32 = jnp.float32
    nsub = len(plan1)

    gmask = gmask_ref[...]
    b2 = b2_ref[...]
    alpha = alpha_ref[...]
    b3 = b3_ref[...]

    # Margins / gutters of the z1 slabs must read as zero for conv2's shifted
    # taps (this is what replaces the old 9 per-tap masks).
    z1_ref[...] = jnp.zeros(z1_ref.shape, f32)

    xs = [xs_ref[0, s] for s in range(nsub)]        # (C_in, LL) each

    # ---- conv1 (3x3, s=1, p=1) + BN2 + PReLU, one output sub-image at a time
    for o in range(nsub):
        acc = None
        for t, (sub, start) in enumerate(plan1[o]):
            d = jnp.dot(w1_ref[t], xs[sub][:, start:start + ni],
                        preferred_element_type=f32)
            acc = d if acc is None else acc + d
        y = acc + b2
        y = jnp.where(y > 0, y, alpha * y)          # PReLU
        z1_ref[o, :, mm:mm + ni] = y * gmask        # keep gutters exactly zero

    z1 = [z1_ref[s] for s in range(nsub)]           # (C, LL) each

    # ---- conv2 (3x3, stride, p=1) + BN3 -> the 4 pooling-phase chunks -------
    z2 = []
    for k in range(4):
        acc = None
        for t, (sub, start) in enumerate(plan2[k]):
            d = jnp.dot(w2_ref[t], z1[sub][:, start:start + ni],
                        preferred_element_type=f32)
            acc = d if acc is None else acc + d
        z2.append((acc + b3) * gmask)               # gutters back to zero

    # ---- SelfChannelAttention + gamma residual + shortcut -------------------
    w123 = w123_ref[...]
    c123 = [jnp.dot(w123, zk, preferred_element_type=f32) for zk in z2]
    c12 = [c[:2 * n_c] for c in c123]
    # MaxPool2d(2,2) + AvgPool2d(2,2): the 4 chunks ARE the 4 window phases.
    pooled = (jnp.maximum(jnp.maximum(c12[0], c12[1]),
                          jnp.maximum(c12[2], c12[3]))
              + (c12[0] + c12[1] + c12[2] + c12[3]) * 0.25)
    pc1 = pooled[:n_c]
    pc2 = pooled[n_c:]
    # matrix[i, j] = sum_p pc1[i, p] * pc2[j, p]; gutter lanes contribute 0.
    matrix = lax.dot_general(pc1, pc2, (((1,), (1,)), ((), ())),
                             preferred_element_type=f32)
    m = matrix - jnp.max(matrix, axis=-1, keepdims=True)
    e = jnp.exp(m)
    attn = e * pl.reciprocal(jnp.sum(e, axis=-1, keepdims=True), approx=True)

    for k in range(4):
        refined = jnp.dot(attn, c123[k][2 * n_c:],   # gamma folded into W3
                          preferred_element_type=f32)
        if conv_shortcut:
            sck = (jnp.dot(wsc_ref[...], sc_ref[0, k].astype(f32),
                           preferred_element_type=f32) + bsc_ref[...])
        else:
            sck = sc_ref[0, k].astype(f32)
        out_ref[0, k] = (refined + z2[k] + sck).astype(out_ref.dtype)


# ----------------------------------------------------------------------------
# Host-side static plans and layout helpers (pure data movement on x only)
# ----------------------------------------------------------------------------
def _tap_plans(stride, pp, mm):
    """Static (sub_image, start_lane) pairs for every 3x3 tap.

    The image grid is decomposed mod F = 2*stride into F*F sub-images of size
    (H/F, W/F); every tap of a stride-1 or stride-`stride` conv then reads one
    sub-image slab shifted by at most one row/column, which the zero gutters
    and margins turn into plain static lane offsets with correct zero padding.
    """
    f = 2 * stride

    def taps_for(p, q, s):
        t = []
        for dy in (-1, 0, 1):
            for dx in (-1, 0, 1):
                ry, a = divmod(s * p + dy, f)
                rx, b = divmod(s * q + dx, f)
                t.append((a * f + b, mm + ry * pp + rx))
        return tuple(t)

    plan1 = tuple(taps_for(p, q, 1) for p in range(f) for q in range(f))
    plan2 = tuple(taps_for(qy, qx, stride) for qy in range(2) for qx in range(2))
    return plan1, plan2


# ----------------------------------------------------------------------------
# Public forward
# ----------------------------------------------------------------------------
@functools.partial(jax.jit, static_argnames=("stride", "dim_match"))
def bottleneck_ir_sca_forward(x, p, *, stride, dim_match):
    """Forward pass of BottleNeck_IR_SCA (inference-mode BatchNorm)."""
    # TODO(synk): training-mode BatchNorm (batch statistics) is not implemented;
    # BN layers are folded to their inference-mode per-channel affine form.
    # TODO(synk): odd output spatial dims (floor pooling in nn.Max/AvgPool2d)
    # are not supported; H and W must be divisible by 2*stride.
    b, c_in, h, w = x.shape
    c = p["conv1_w"].shape[0]
    assert stride in (1, 2)
    if dim_match:
        assert stride == 1 and c_in == c
    f = 2 * stride
    assert h % f == 0 and w % f == 0
    hs, ws = h // f, w // f
    pp = ws + 1                 # row pitch: W/F pixels + 1 zero gutter lane
    mm = pp + 1                 # zero margin (covers the +-(pp+1) tap offsets)
    ni = hs * pp                # interior lanes of one sub-image slab
    ll = ni + 2 * mm
    nsub = f * f
    f32 = jnp.float32
    x = x.astype(f32)

    # ---- host-side packing of x (single fused pass; BN1 folded in) ----------
    subs = (x.reshape(b, c_in, hs, f, ws, f)
              .transpose(0, 3, 5, 1, 2, 4))          # (B, F, F, C_in, HS, WS)
    xbn = (subs * p["bn1_scale"][None, None, None, :, None, None]
           + p["bn1_bias"][None, None, None, :, None, None])
    xbn = jnp.pad(xbn, ((0, 0),) * 5 + ((0, 1),))    # zero gutter column
    xbn = xbn.reshape(b, nsub, c_in, ni)
    xbn = jnp.pad(xbn, ((0, 0), (0, 0), (0, 0), (mm, mm)))   # zero margins

    # Shortcut source in the output chunk layout (raw x, no BN1).
    if dim_match:
        sc_sub = subs                                # the 4 mod-2 sub-images
    else:
        sc_sub = subs[:, ::2, ::2]                   # x[:, :, ::stride, ::stride]
    sc = jnp.pad(sc_sub, ((0, 0),) * 5 + ((0, 1),)).reshape(b, 4, c_in, ni)

    # ---- weights with BN scales folded in ------------------------------------
    w1 = jnp.transpose(p["conv1_w"], (2, 3, 0, 1)).reshape(9, c, c_in)
    w1 = (w1 * p["bn2_scale"][None, :, None]).astype(f32)
    w2 = jnp.transpose(p["conv2_w"], (2, 3, 0, 1)).reshape(9, c, c)
    w2 = (w2 * p["bn3_scale"][None, :, None]).astype(f32)
    w123 = jnp.concatenate(
        [p["sca_w1"], p["sca_w2"], p["gamma"] * p["sca_w3"]], axis=0).astype(f32)
    b2 = p["bn2_bias"].reshape(c, 1).astype(f32)
    alpha = p["prelu_alpha"].reshape(c, 1).astype(f32)
    b3 = p["bn3_bias"].reshape(c, 1).astype(f32)

    gm = np.zeros((hs, pp), np.float32)
    gm[:, :ws] = 1.0
    gmask = jnp.asarray(gm.reshape(1, ni))

    plan1, plan2 = _tap_plans(stride, pp, mm)
    kernel = functools.partial(
        _fused_block_kernel, plan1=plan1, plan2=plan2, n_c=c, mm=mm, ni=ni,
        conv_shortcut=not dim_match)

    in_specs = [
        pl.BlockSpec((1, nsub, c_in, ll), lambda i: (i, 0, 0, 0)),
        pl.BlockSpec((1, 4, c_in, ni), lambda i: (i, 0, 0, 0)),
        pl.BlockSpec((9, c, c_in), lambda i: (0, 0, 0)),
        pl.BlockSpec((9, c, c), lambda i: (0, 0, 0)),
        pl.BlockSpec((3 * c, c), lambda i: (0, 0)),
        pl.BlockSpec((c, 1), lambda i: (0, 0)),
        pl.BlockSpec((c, 1), lambda i: (0, 0)),
        pl.BlockSpec((c, 1), lambda i: (0, 0)),
        pl.BlockSpec((1, ni), lambda i: (0, 0)),
    ]
    args = [xbn, sc, w1, w2, w123, b2, alpha, b3, gmask]
    if not dim_match:
        wsc = (p["sc_bn_scale"][:, None] * p["sc_w"]).astype(f32)
        bsc = p["sc_bn_bias"].reshape(c, 1).astype(f32)
        in_specs += [pl.BlockSpec((c, c_in), lambda i: (0, 0)),
                     pl.BlockSpec((c, 1), lambda i: (0, 0))]
        args += [wsc, bsc]

    out_blk = pl.pallas_call(
        kernel,
        out_shape=jax.ShapeDtypeStruct((b, 4, c, ni), f32),
        grid_spec=pltpu.PrefetchScalarGridSpec(
            num_scalar_prefetch=0,
            grid=(b,),
            in_specs=in_specs,
            out_specs=pl.BlockSpec((1, 4, c, ni), lambda i: (i, 0, 0, 0)),
            scratch_shapes=[pltpu.VMEM((nsub, c, ll), f32)]),
        compiler_params=pltpu.CompilerParams(
            dimension_semantics=("parallel",),       # batch items independent
            vmem_limit_bytes=48 * 1024 * 1024),      # > v5e 16MiB default, < v7x cap
    )(*args)

    # ---- host-side unpack (single pass, drops the zero gutter lanes) --------
    h2, w2o = h // stride, w // stride
    out = (out_blk.reshape(b, 2, 2, c, hs, pp)[..., :ws]
           .transpose(0, 3, 4, 1, 5, 2)
           .reshape(b, c, h2, w2o))
    return out


# ----------------------------------------------------------------------------
# Pure-JAX reference (mirrors the PyTorch forward) and test harness
# ----------------------------------------------------------------------------
def _fold_bn(weight, bias, mean, var, eps=1e-5):
    scale = weight / jnp.sqrt(var + eps)
    return scale, bias - mean * scale


def _reference_forward(x, p, *, stride, dim_match):
    hp = lax.Precision.HIGHEST

    def affine(t, s, bb):
        return t * s[None, :, None, None] + bb[None, :, None, None]

    def conv3x3(t, w, s):
        return lax.conv_general_dilated(t, w, (s, s), ((1, 1), (1, 1)),
                                        dimension_numbers=("NCHW", "OIHW", "NCHW"),
                                        precision=hp)

    def conv1x1(t, w, s=1):
        return lax.conv_general_dilated(t, w[:, :, None, None], (s, s), "VALID",
                                        dimension_numbers=("NCHW", "OIHW", "NCHW"),
                                        precision=hp)

    z = affine(x, p["bn1_scale"], p["bn1_bias"])
    z = conv3x3(z, p["conv1_w"], 1)
    z = affine(z, p["bn2_scale"], p["bn2_bias"])
    z = jnp.where(z > 0, z, p["prelu_alpha"][None, :, None, None] * z)
    z = conv3x3(z, p["conv2_w"], stride)
    z = affine(z, p["bn3_scale"], p["bn3_bias"])

    c1 = conv1x1(z, p["sca_w1"])
    c2 = conv1x1(z, p["sca_w2"])
    c3 = conv1x1(z, p["sca_w3"])
    b, c, h2, w2 = z.shape

    def pool(t):
        tb = t.reshape(b, c, h2 // 2, 2, w2 // 2, 2)
        return tb.max(axis=(3, 5)) + tb.mean(axis=(3, 5))

    p1 = pool(c1).reshape(b, c, -1)
    p2 = pool(c2).reshape(b, c, -1)
    matrix = jnp.einsum("bcp,bdp->bcd", p1, p2, precision=hp)
    attn = jax.nn.softmax(matrix, axis=-1)
    refined = jnp.einsum("bcd,bdn->bcn", attn, c3.reshape(b, c, -1), precision=hp)
    res = p["gamma"] * refined.reshape(z.shape) + z
    if dim_match:
        shortcut = x
    else:
        shortcut = affine(conv1x1(x, p["sc_w"], stride),
                          p["sc_bn_scale"], p["sc_bn_bias"])
    return shortcut + res


def _make_params(key, c_in, c_out, dim_match):
    ks = jax.random.split(key, 12)

    def nrm(k, shape, s):
        return jax.random.normal(k, shape, jnp.float32) * s

    def bn_params(k, c):
        k1, k2, k3, k4 = jax.random.split(k, 4)
        weight = 1.0 + 0.1 * jax.random.normal(k1, (c,), jnp.float32)
        bias = 0.1 * jax.random.normal(k2, (c,), jnp.float32)
        mean = 0.1 * jax.random.normal(k3, (c,), jnp.float32)
        var = 0.5 + jax.random.uniform(k4, (c,), jnp.float32)
        return _fold_bn(weight, bias, mean, var)

    p = {}
    p["bn1_scale"], p["bn1_bias"] = bn_params(ks[0], c_in)
    p["conv1_w"] = nrm(ks[1], (c_out, c_in, 3, 3), 0.2)
    p["bn2_scale"], p["bn2_bias"] = bn_params(ks[2], c_out)
    p["prelu_alpha"] = 0.25 + 0.05 * jax.random.normal(ks[3], (c_out,), jnp.float32)
    p["conv2_w"] = nrm(ks[4], (c_out, c_out, 3, 3), 0.2)
    p["bn3_scale"], p["bn3_bias"] = bn_params(ks[5], c_out)
    p["sca_w1"] = nrm(ks[6], (c_out, c_out), 0.25)
    p["sca_w2"] = nrm(ks[7], (c_out, c_out), 0.25)
    p["sca_w3"] = nrm(ks[8], (c_out, c_out), 0.25)
    # PyTorch initializes gamma to zeros(1); use a nonzero value so the
    # attention branch actually contributes to the output under test.
    p["gamma"] = jnp.float32(0.5)
    if not dim_match:
        p["sc_w"] = nrm(ks[9], (c_out, c_in), 0.3)
        p["sc_bn_scale"], p["sc_bn_bias"] = bn_params(ks[10], c_out)
    return p


if __name__ == "__main__":
    key = jax.random.PRNGKey(0)
    kx1, kp1, kx2, kp2 = jax.random.split(key, 4)

    # Case 1: dim_match=True (stride 1, identity shortcut).
    x1 = jax.random.normal(kx1, (2, 4, 16, 16), jnp.float32)
    params1 = _make_params(kp1, 4, 4, True)
    out1 = jax.block_until_ready(
        bottleneck_ir_sca_forward(x1, params1, stride=1, dim_match=True))
    ref1 = _reference_forward(x1, params1, stride=1, dim_match=True)
    assert out1.shape == ref1.shape == (2, 4, 16, 16)
    err1 = float(jnp.max(jnp.abs(out1 - ref1)))
    assert jnp.allclose(out1, ref1, atol=2e-2, rtol=2e-2), f"case1 max abs err {err1}"

    # Case 2: dim_match=False (stride-2 conv + 1x1-conv/BN shortcut).
    x2 = jax.random.normal(kx2, (2, 4, 16, 16), jnp.float32)
    params2 = _make_params(kp2, 4, 8, False)
    out2 = jax.block_until_ready(
        bottleneck_ir_sca_forward(x2, params2, stride=2, dim_match=False))
    ref2 = _reference_forward(x2, params2, stride=2, dim_match=False)
    assert out2.shape == ref2.shape == (2, 8, 8, 8)
    err2 = float(jnp.max(jnp.abs(out2 - ref2)))
    assert jnp.allclose(out2, ref2, atol=2e-2, rtol=2e-2), f"case2 max abs err {err2}"

    print("KERNEL_OK")
</pallas_src>

<mosaic_0001>
module attributes {stable_mosaic.version = 11 : i64} {
  func.func @_fused_block_kernel(%arg0: i32, %arg1: memref<1x4x4x92xf32, #tpu.memory_space<vmem>>, %arg2: memref<1x4x4x72xf32, #tpu.memory_space<vmem>>, %arg3: memref<9x4x4xf32, #tpu.memory_space<vmem>>, %arg4: memref<9x4x4xf32, #tpu.memory_space<vmem>>, %arg5: memref<12x4xf32, #tpu.memory_space<vmem>>, %arg6: memref<4x1xf32, #tpu.memory_space<vmem>>, %arg7: memref<4x1xf32, #tpu.memory_space<vmem>>, %arg8: memref<4x1xf32, #tpu.memory_space<vmem>>, %arg9: memref<1x72xf32, #tpu.memory_space<vmem>>, %arg10: memref<1x4x4x72xf32, #tpu.memory_space<vmem>>, %arg11: memref<4x4x92xf32, #tpu.memory_space<vmem>>) attributes {dimension_semantics = [#tpu.dimension_semantics<parallel>], iteration_bounds = array<i64: 2>, scalar_prefetch = 0 : i64, scratch_operands = 1 : i64, tpu.core_type = #tpu.core_type<tc>, window_params = [{transform_indices = @transform_0, window_bounds = array<i64: 1, 4, 4, 92>}, {transform_indices = @transform_1, window_bounds = array<i64: 1, 4, 4, 72>}, {pipeline_mode = #tpu.pipeline_mode<synchronous>, transform_indices = @transform_2, window_bounds = array<i64: 9, 4, 4>}, {pipeline_mode = #tpu.pipeline_mode<synchronous>, transform_indices = @transform_3, window_bounds = array<i64: 9, 4, 4>}, {pipeline_mode = #tpu.pipeline_mode<synchronous>, transform_indices = @transform_4, window_bounds = array<i64: 12, 4>}, {pipeline_mode = #tpu.pipeline_mode<synchronous>, transform_indices = @transform_5, window_bounds = array<i64: 4, 1>}, {pipeline_mode = #tpu.pipeline_mode<synchronous>, transform_indices = @transform_6, window_bounds = array<i64: 4, 1>}, {pipeline_mode = #tpu.pipeline_mode<synchronous>, transform_indices = @transform_7, window_bounds = array<i64: 4, 1>}, {pipeline_mode = #tpu.pipeline_mode<synchronous>, transform_indices = @transform_8, window_bounds = array<i64: 1, 72>}, {transform_indices = @transform_9, window_bounds = array<i64: 1, 4, 4, 72>}]} {
    %c0 = arith.constant 0 : index
    %c0_0 = arith.constant 0 : index
    %0 = vector.load %arg9[%c0, %c0_0] : memref<1x72xf32, #tpu.memory_space<vmem>>, vector<1x72xf32>
    %c0_1 = arith.constant 0 : index
    %c0_2 = arith.constant 0 : index
    %1 = vector.load %arg6[%c0_1, %c0_2] : memref<4x1xf32, #tpu.memory_space<vmem>>, vector<4x1xf32>
    %c0_3 = arith.constant 0 : index
    %c0_4 = arith.constant 0 : index
    %2 = vector.load %arg7[%c0_3, %c0_4] : memref<4x1xf32, #tpu.memory_space<vmem>>, vector<4x1xf32>
    %c0_5 = arith.constant 0 : index
    %c0_6 = arith.constant 0 : index
    %3 = vector.load %arg8[%c0_5, %c0_6] : memref<4x1xf32, #tpu.memory_space<vmem>>, vector<4x1xf32>
    %cst = arith.constant 0.000000e+00 : f32
    %4 = vector.broadcast %cst : f32 to vector<4x4x92xf32>
    %c0_7 = arith.constant 0 : index
    %c0_8 = arith.constant 0 : index
    %c0_9 = arith.constant 0 : index
    %5 = vector.load %arg11[%c0_7, %c0_8, %c0_9] : memref<4x4x92xf32, #tpu.memory_space<vmem>>, vector<4x4x92xf32>
    tpu.vector_store %arg11[%c0_7, %c0_8, %c0_9], %4 {strides = array<i32>} : memref<4x4x92xf32, #tpu.memory_space<vmem>>, vector<4x4x92xf32>,
    %c0_10 = arith.constant 0 : index
    %c0_11 = arith.constant 0 : index
    %c0_12 = arith.constant 0 : index
    %c0_13 = arith.constant 0 : index
    %6 = vector.load %arg1[%c0_10, %c0_11, %c0_12, %c0_13] : memref<1x4x4x92xf32, #tpu.memory_space<vmem>>, vector<1x1x4x92xf32>
    %7 = vector.shape_cast %6 : vector<1x1x4x92xf32> to vector<4x92xf32>
    %c0_14 = arith.constant 0 : index
    %c1 = arith.constant 1 : index
    %c0_15 = arith.constant 0 : index
    %c0_16 = arith.constant 0 : index
    %8 = vector.load %arg1[%c0_14, %c1, %c0_15, %c0_16] : memref<1x4x4x92xf32, #tpu.memory_space<vmem>>, vector<1x1x4x92xf32>
    %9 = vector.shape_cast %8 : vector<1x1x4x92xf32> to vector<4x92xf32>
    %c0_17 = arith.constant 0 : index
    %c2 = arith.constant 2 : index
    %c0_18 = arith.constant 0 : index
    %c0_19 = arith.constant 0 : index
    %10 = vector.load %arg1[%c0_17, %c2, %c0_18, %c0_19] : memref<1x4x4x92xf32, #tpu.memory_space<vmem>>, vector<1x1x4x92xf32>
    %11 = vector.shape_cast %10 : vector<1x1x4x92xf32> to vector<4x92xf32>
    %c0_20 = arith.constant 0 : index
    %c3 = arith.constant 3 : index
    %c0_21 = arith.constant 0 : index
    %c0_22 = arith.constant 0 : index
    %12 = vector.load %arg1[%c0_20, %c3, %c0_21, %c0_22] : memref<1x4x4x92xf32, #tpu.memory_space<vmem>>, vector<1x1x4x92xf32>
    %13 = vector.shape_cast %12 : vector<1x1x4x92xf32> to vector<4x92xf32>
    %c0_23 = arith.constant 0 : index
    %c0_24 = arith.constant 0 : index
    %c0_25 = arith.constant 0 : index
    %14 = vector.load %arg3[%c0_23, %c0_24, %c0_25] : memref<9x4x4xf32, #tpu.memory_space<vmem>>, vector<1x4x4xf32>
    %15 = vector.shape_cast %14 : vector<1x4x4xf32> to vector<4x4xf32>
    %16 = vector.extract_strided_slice %13 {offsets = [0, 0], sizes = [4, 72], strides = [1, 1]} : vector<4x92xf32> to vector<4x72xf32>
    %cst_26 = arith.constant dense<0.000000e+00> : vector<4x72xf32>
    %17 = tpu.matmul %15, %16, %cst_26 {dimension_numbers = #tpu.dot_dimension_numbers<[1], [0], [0], [1], [0, 0, 1, 1], [], []>} : vector<4x4xf32>, vector<4x72xf32>, vector<4x72xf32> -> vector<4x72xf32>
    %c1_27 = arith.constant 1 : index
    %c0_28 = arith.constant 0 : index
    %c0_29 = arith.constant 0 : index
    %18 = vector.load %arg3[%c1_27, %c0_28, %c0_29] : memref<9x4x4xf32, #tpu.memory_space<vmem>>, vector<1x4x4xf32>
    %19 = vector.shape_cast %18 : vector<1x4x4xf32> to vector<4x4xf32>
    %20 = vector.extract_strided_slice %11 {offsets = [0, 1], sizes = [4, 72], strides = [1, 1]} : vector<4x92xf32> to vector<4x72xf32>
    %cst_30 = arith.constant dense<0.000000e+00> : vector<4x72xf32>
    %21 = tpu.matmul %19, %20, %cst_30 {dimension_numbers = #tpu.dot_dimension_numbers<[1], [0], [0], [1], [0, 0, 1, 1], [], []>} : vector<4x4xf32>, vector<4x72xf32>, vector<4x72xf32> -> vector<4x72xf32>
    %22 = arith.addf %17, %21 : vector<4x72xf32>
    %c2_31 = arith.constant 2 : index
    %c0_32 = arith.constant 0 : index
    %c0_33 = arith.constant 0 : index
    %23 = vector.load %arg3[%c2_31, %c0_32, %c0_33] : memref<9x4x4xf32, #tpu.memory_space<vmem>>, vector<1x4x4xf32>
    %24 = vector.shape_cast %23 : vector<1x4x4xf32> to vector<4x4xf32>
    %25 = vector.extract_strided_slice %13 {offsets = [0, 1], sizes = [4, 72], strides = [1, 1]} : vector<4x92xf32> to vector<4x72xf32>
    %cst_34 = arith.constant dense<0.000000e+00> : vector<4x72xf32>
    %26 = tpu.matmul %24, %25, %cst_34 {dimension_numbers = #tpu.dot_dimension_numbers<[1], [0], [0], [1], [0, 0, 1, 1], [], []>} : vector<4x4xf32>, vector<4x72xf32>, vector<4x72xf32> -> vector<4x72xf32>
    %27 = arith.addf %22, %26 : vector<4x72xf32>
    %c3_35 = arith.constant 3 : index
    %c0_36 = arith.constant 0 : index
    %c0_37 = arith.constant 0 : index
    %28 = vector.load %arg3[%c3_35, %c0_36, %c0_37] : memref<9x4x4xf32, #tpu.memory_space<vmem>>, vector<1x4x4xf32>
    %29 = vector.shape_cast %28 : vector<1x4x4xf32> to vector<4x4xf32>
    %30 = vector.extract_strided_slice %9 {offsets = [0, 9], sizes = [4, 72], strides = [1, 1]} : vector<4x92xf32> to vector<4x72xf32>
    %cst_38 = arith.constant dense<0.000000e+00> : vector<4x72xf32>
    %31 = tpu.matmul %29, %30, %cst_38 {dimension_numbers = #tpu.dot_dimension_numbers<[1], [0], [0], [1], [0, 0, 1, 1], [], []>} : vector<4x4xf32>, vector<4x72xf32>, vector<4x72xf32> -> vector<4x72xf32>
    %32 = arith.addf %27, %31 : vector<4x72xf32>
    %c4 = arith.constant 4 : index
    %c0_39 = arith.constant 0 : index
    %c0_40 = arith.constant 0 : index
    %33 = vector.load %arg3[%c4, %c0_39, %c0_40] : memref<9x4x4xf32, #tpu.memory_space<vmem>>, vector<1x4x4xf32>
    %34 = vector.shape_cast %33 : vector<1x4x4xf32> to vector<4x4xf32>
    %35 = vector.extract_strided_slice %7 {offsets = [0, 10], sizes = [4, 72], strides = [1, 1]} : vector<4x92xf32> to vector<4x72xf32>
    %cst_41 = arith.constant dense<0.000000e+00> : vector<4x72xf32>
    %36 = tpu.matmul %34, %35, %cst_41 {dimension_numbers = #tpu.dot_dimension_numbers<[1], [0], [0], [1], [0, 0, 1, 1], [], []>} : vector<4x4xf32>, vector<4x72xf32>, vector<4x72xf32> -> vector<4x72xf32>
    %37 = arith.addf %32, %36 : vector<4x72xf32>
    %c5 = arith.constant 5 : index
    %c0_42 = arith.constant 0 : index
    %c0_43 = arith.constant 0 : index
    %38 = vector.load %arg3[%c5, %c0_42, %c0_43] : memref<9x4x4xf32, #tpu.memory_space<vmem>>, vector<1x4x4xf32>
    %39 = vector.shape_cast %38 : vector<1x4x4xf32> to vector<4x4xf32>
    %40 = vector.extract_strided_slice %9 {offsets = [0, 10], sizes = [4, 72], strides = [1, 1]} : vector<4x92xf32> to vector<4x72xf32>
    %cst_44 = arith.constant dense<0.000000e+00> : vector<4x72xf32>
    %41 = tpu.matmul %39, %40, %cst_44 {dimension_numbers = #tpu.dot_dimension_numbers<[1], [0], [0], [1], [0, 0, 1, 1], [], []>} : vector<4x4xf32>, vector<4x72xf32>, vector<4x72xf32> -> vector<4x72xf32>
    %42 = arith.addf %37, %41 : vector<4x72xf32>
    %c6 = arith.constant 6 : index
    %c0_45 = arith.constant 0 : index
    %c0_46 = arith.constant 0 : index
    %43 = vector.load %arg3[%c6, %c0_45, %c0_46] : memref<9x4x4xf32, #tpu.memory_space<vmem>>, vector<1x4x4xf32>
    %44 = vector.shape_cast %43 : vector<1x4x4xf32> to vector<4x4xf32>
    %45 = vector.extract_strided_slice %13 {offsets = [0, 9], sizes = [4, 72], strides = [1, 1]} : vector<4x92xf32> to vector<4x72xf32>
    %cst_47 = arith.constant dense<0.000000e+00> : vector<4x72xf32>
    %46 = tpu.matmul %44, %45, %cst_47 {dimension_numbers = #tpu.dot_dimension_numbers<[1], [0], [0], [1], [0, 0, 1, 1], [], []>} : vector<4x4xf32>, vector<4x72xf32>, vector<4x72xf32> -> vector<4x72xf32>
    %47 = arith.addf %42, %46 : vector<4x72xf32>
    %c7 = arith.constant 7 : index
    %c0_48 = arith.constant 0 : index
    %c0_49 = arith.constant 0 : index
    %48 = vector.load %arg3[%c7, %c0_48, %c0_49] : memref<9x4x4xf32, #tpu.memory_space<vmem>>, vector<1x4x4xf32>
    %49 = vector.shape_cast %48 : vector<1x4x4xf32> to vector<4x4xf32>
    %50 = vector.extract_strided_slice %11 {offsets = [0, 10], sizes = [4, 72], strides = [1, 1]} : vector<4x92xf32> to vector<4x72xf32>
    %cst_50 = arith.constant dense<0.000000e+00> : vector<4x72xf32>
    %51 = tpu.matmul %49, %50, %cst_50 {dimension_numbers = #tpu.dot_dimension_numbers<[1], [0], [0], [1], [0, 0, 1, 1], [], []>} : vector<4x4xf32>, vector<4x72xf32>, vector<4x72xf32> -> vector<4x72xf32>
    %52 = arith.addf %47, %51 : vector<4x72xf32>
    %c8 = arith.constant 8 : index
    %c0_51 = arith.constant 0 : index
    %c0_52 = arith.constant 0 : index
    %53 = vector.load %arg3[%c8, %c0_51, %c0_52] : memref<9x4x4xf32, #tpu.memory_space<vmem>>, vector<1x4x4xf32>
    %54 = vector.shape_cast %53 : vector<1x4x4xf32> to vector<4x4xf32>
    %55 = vector.extract_strided_slice %13 {offsets = [0, 10], sizes = [4, 72], strides = [1, 1]} : vector<4x92xf32> to vector<4x72xf32>
    %cst_53 = arith.constant dense<0.000000e+00> : vector<4x72xf32>
    %56 = tpu.matmul %54, %55, %cst_53 {dimension_numbers = #tpu.dot_dimension_numbers<[1], [0], [0], [1], [0, 0, 1, 1], [], []>} : vector<4x4xf32>, vector<4x72xf32>, vector<4x72xf32> -> vector<4x72xf32>
    %57 = arith.addf %52, %56 : vector<4x72xf32>
    %58 = vector.broadcast %1 : vector<4x1xf32> to vector<4x72xf32>
    %59 = arith.addf %57, %58 : vector<4x72xf32>
    %cst_54 = arith.constant 0.000000e+00 : f32
    %60 = vector.broadcast %cst_54 : f32 to vector<4x72xf32>
    %61 = arith.cmpf ogt, %59, %60 : vector<4x72xf32>
    %62 = vector.broadcast %2 : vector<4x1xf32> to vector<4x72xf32>
    %63 = arith.mulf %62, %59 : vector<4x72xf32>
    %64 = arith.select %61, %59, %63 : vector<4x72xi1>, vector<4x72xf32>
    %65 = vector.broadcast %0 : vector<1x72xf32> to vector<4x72xf32>
    %66 = arith.mulf %64, %65 : vector<4x72xf32>
    %c0_55 = arith.constant 0 : index
    %c0_56 = arith.constant 0 : index
    %c10 = arith.constant 10 : index
    %67 = vector.load %arg11[%c0_55, %c0_56, %c10] : memref<4x4x92xf32, #tpu.memory_space<vmem>>, vector<1x4x72xf32>
    %68 = vector.shape_cast %67 : vector<1x4x72xf32> to vector<4x72xf32>
    %69 = vector.shape_cast %66 : vector<4x72xf32> to vector<1x4x72xf32>
    tpu.vector_store %arg11[%c0_55, %c0_56, %c10], %69 {strides = array<i32>} : memref<4x4x92xf32, #tpu.memory_space<vmem>>, vector<1x4x72xf32>,
    %c0_57 = arith.constant 0 : index
    %c0_58 = arith.constant 0 : index
    %c0_59 = arith.constant 0 : index
    %70 = vector.load %arg3[%c0_57, %c0_58, %c0_59] : memref<9x4x4xf32, #tpu.memory_space<vmem>>, vector<1x4x4xf32>
    %71 = vector.shape_cast %70 : vector<1x4x4xf32> to vector<4x4xf32>
    %72 = vector.extract_strided_slice %11 {offsets = [0, 1], sizes = [4, 72], strides = [1, 1]} : vector<4x92xf32> to vector<4x72xf32>
    %cst_60 = arith.constant dense<0.000000e+00> : vector<4x72xf32>
    %73 = tpu.matmul %71, %72, %cst_60 {dimension_numbers = #tpu.dot_dimension_numbers<[1], [0], [0], [1], [0, 0, 1, 1], [], []>} : vector<4x4xf32>, vector<4x72xf32>, vector<4x72xf32> -> vector<4x72xf32>
    %c1_61 = arith.constant 1 : index
    %c0_62 = arith.constant 0 : index
    %c0_63 = arith.constant 0 : index
    %74 = vector.load %arg3[%c1_61, %c0_62, %c0_63] : memref<9x4x4xf32, #tpu.memory_space<vmem>>, vector<1x4x4xf32>
    %75 = vector.shape_cast %74 : vector<1x4x4xf32> to vector<4x4xf32>
    %76 = vector.extract_strided_slice %13 {offsets = [0, 1], sizes = [4, 72], strides = [1, 1]} : vector<4x92xf32> to vector<4x72xf32>
    %cst_64 = arith.constant dense<0.000000e+00> : vector<4x72xf32>
    %77 = tpu.matmul %75, %76, %cst_64 {dimension_numbers = #tpu.dot_dimension_numbers<[1], [0], [0], [1], [0, 0, 1, 1], [], []>} : vector<4x4xf32>, vector<4x72xf32>, vector<4x72xf32> -> vector<4x72xf32>
    %78 = arith.addf %73, %77 : vector<4x72xf32>
    %c2_65 = arith.constant 2 : index
    %c0_66 = arith.constant 0 : index
    %c0_67 = arith.constant 0 : index
    %79 = vector.load %arg3[%c2_65, %c0_66, %c0_67] : memref<9x4x4xf32, #tpu.memory_space<vmem>>, vector<1x4x4xf32>
    %80 = vector.shape_cast %79 : vector<1x4x4xf32> to vector<4x4xf32>
    %81 = vector.extract_strided_slice %11 {offsets = [0, 2], sizes = [4, 72], strides = [1, 1]} : vector<4x92xf32> to vector<4x72xf32>
    %cst_68 = arith.constant dense<0.000000e+00> : vector<4x72xf32>
    %82 = tpu.matmul %80, %81, %cst_68 {dimension_numbers = #tpu.dot_dimension_numbers<[1], [0], [0], [1], [0, 0, 1, 1], [], []>} : vector<4x4xf32>, vector<4x72xf32>, vector<4x72xf32> -> vector<4x72xf32>
    %83 = arith.addf %78, %82 : vector<4x72xf32>
    %c3_69 = arith.constant 3 : index
    %c0_70 = arith.constant 0 : index
    %c0_71 = arith.constant 0 : index
    %84 = vector.load %arg3[%c3_69, %c0_70, %c0_71] : memref<9x4x4xf32, #tpu.memory_space<vmem>>, vector<1x4x4xf32>
    %85 = vector.shape_cast %84 : vector<1x4x4xf32> to vector<4x4xf32>
    %86 = vector.extract_strided_slice %7 {offsets = [0, 10], sizes = [4, 72], strides = [1, 1]} : vector<4x92xf32> to vector<4x72xf32>
    %cst_72 = arith.constant dense<0.000000e+00> : vector<4x72xf32>
    %87 = tpu.matmul %85, %86, %cst_72 {dimension_numbers = #tpu.dot_dimension_numbers<[1], [0], [0], [1], [0, 0, 1, 1], [], []>} : vector<4x4xf32>, vector<4x72xf32>, vector<4x72xf32> -> vector<4x72xf32>
    %88 = arith.addf %83, %87 : vector<4x72xf32>
    %c4_73 = arith.constant 4 : index
    %c0_74 = arith.constant 0 : index
    %c0_75 = arith.constant 0 : index
    %89 = vector.load %arg3[%c4_73, %c0_74, %c0_75] : memref<9x4x4xf32, #tpu.memory_space<vmem>>, vector<1x4x4xf32>
    %90 = vector.shape_cast %89 : vector<1x4x4xf32> to vector<4x4xf32>
    %91 = vector.extract_strided_slice %9 {offsets = [0, 10], sizes = [4, 72], strides = [1, 1]} : vector<4x92xf32> to vector<4x72xf32>
    %cst_76 = arith.constant dense<0.000000e+00> : vector<4x72xf32>
    %92 = tpu.matmul %90, %91, %cst_76 {dimension_numbers = #tpu.dot_dimension_numbers<[1], [0], [0], [1], [0, 0, 1, 1], [], []>} : vector<4x4xf32>, vector<4x72xf32>, vector<4x72xf32> -> vector<4x72xf32>
    %93 = arith.addf %88, %92 : vector<4x72xf32>
    %c5_77 = arith.constant 5 : index
    %c0_78 = arith.constant 0 : index
    %c0_79 = arith.constant 0 : index
    %94 = vector.load %arg3[%c5_77, %c0_78, %c0_79] : memref<9x4x4xf32, #tpu.memory_space<vmem>>, vector<1x4x4xf32>
    %95 = vector.shape_cast %94 : vector<1x4x4xf32> to vector<4x4xf32>
    %96 = vector.extract_strided_slice %7 {offsets = [0, 11], sizes = [4, 72], strides = [1, 1]} : vector<4x92xf32> to vector<4x72xf32>
    %cst_80 = arith.constant dense<0.000000e+00> : vector<4x72xf32>
    %97 = tpu.matmul %95, %96, %cst_80 {dimension_numbers = #tpu.dot_dimension_numbers<[1], [0], [0], [1], [0, 0, 1, 1], [], []>} : vector<4x4xf32>, vector<4x72xf32>, vector<4x72xf32> -> vector<4x72xf32>
    %98 = arith.addf %93, %97 : vector<4x72xf32>
    %c6_81 = arith.constant 6 : index
    %c0_82 = arith.constant 0 : index
    %c0_83 = arith.constant 0 : index
    %99 = vector.load %arg3[%c6_81, %c0_82, %c0_83] : memref<9x4x4xf32, #tpu.memory_space<vmem>>, vector<1x4x4xf32>
    %100 = vector.shape_cast %99 : vector<1x4x4xf32> to vector<4x4xf32>
    %101 = vector.extract_strided_slice %11 {offsets = [0, 10], sizes = [4, 72], strides = [1, 1]} : vector<4x92xf32> to vector<4x72xf32>
    %cst_84 = arith.constant dense<0.000000e+00> : vector<4x72xf32>
    %102 = tpu.matmul %100, %101, %cst_84 {dimension_numbers = #tpu.dot_dimension_numbers<[1], [0], [0], [1], [0, 0, 1, 1], [], []>} : vector<4x4xf32>, vector<4x72xf32>, vector<4x72xf32> -> vector<4x72xf32>
    %103 = arith.addf %98, %102 : vector<4x72xf32>
    %c7_85 = arith.constant 7 : index
    %c0_86 = arith.constant 0 : index
    %c0_87 = arith.constant 0 : index
    %104 = vector.load %arg3[%c7_85, %c0_86, %c0_87] : memref<9x4x4xf32, #tpu.memory_space<vmem>>, vector<1x4x4xf32>
    %105 = vector.shape_cast %104 : vector<1x4x4xf32> to vector<4x4xf32>
    %106 = vector.extract_strided_slice %13 {offsets = [0, 10], sizes = [4, 72], strides = [1, 1]} : vector<4x92xf32> to vector<4x72xf32>
    %cst_88 = arith.constant dense<0.000000e+00> : vector<4x72xf32>
    %107 = tpu.matmul %105, %106, %cst_88 {dimension_numbers = #tpu.dot_dimension_numbers<[1], [0], [0], [1], [0, 0, 1, 1], [], []>} : vector<4x4xf32>, vector<4x72xf32>, vector<4x72xf32> -> vector<4x72xf32>
    %108 = arith.addf %103, %107 : vector<4x72xf32>
    %c8_89 = arith.constant 8 : index
    %c0_90 = arith.constant 0 : index
    %c0_91 = arith.constant 0 : index
    %109 = vector.load %arg3[%c8_89, %c0_90, %c0_91] : memref<9x4x4xf32, #tpu.memory_space<vmem>>, vector<1x4x4xf32>
    %110 = vector.shape_cast %109 : vector<1x4x4xf32> to vector<4x4xf32>
    %111 = vector.extract_strided_slice %11 {offsets = [0, 11], sizes = [4, 72], strides = [1, 1]} : vector<4x92xf32> to vector<4x72xf32>
    %cst_92 = arith.constant dense<0.000000e+00> : vector<4x72xf32>
    %112 = tpu.matmul %110, %111, %cst_92 {dimension_numbers = #tpu.dot_dimension_numbers<[1], [0], [0], [1], [0, 0, 1, 1], [], []>} : vector<4x4xf32>, vector<4x72xf32>, vector<4x72xf32> -> vector<4x72xf32>
    %113 = arith.addf %108, %112 : vector<4x72xf32>
    %114 = vector.broadcast %1 : vector<4x1xf32> to vector<4x72xf32>
    %115 = arith.addf %113, %114 : vector<4x72xf32>
    %cst_93 = arith.constant 0.000000e+00 : f32
    %116 = vector.broadcast %cst_93 : f32 to vector<4x72xf32>
    %117 = arith.cmpf ogt, %115, %116 : vector<4x72xf32>
    %118 = vector.broadcast %2 : vector<4x1xf32> to vector<4x72xf32>
    %119 = arith.mulf %118, %115 : vector<4x72xf32>
    %120 = arith.select %117, %115, %119 : vector<4x72xi1>, vector<4x72xf32>
    %121 = vector.broadcast %0 : vector<1x72xf32> to vector<4x72xf32>
    %122 = arith.mulf %120, %121 : vector<4x72xf32>
    %c1_94 = arith.constant 1 : index
    %c0_95 = arith.constant 0 : index
    %c10_96 = arith.constant 10 : index
    %123 = vector.load %arg11[%c1_94, %c0_95, %c10_96] : memref<4x4x92xf32, #tpu.memory_space<vmem>>, vector<1x4x72xf32>
    %124 = vector.shape_cast %123 : vector<1x4x72xf32> to vector<4x72xf32>
    %125 = vector.shape_cast %122 : vector<4x72xf32> to vector<1x4x72xf32>
    tpu.vector_store %arg11[%c1_94, %c0_95, %c10_96], %125 {strides = array<i32>} : memref<4x4x92xf32, #tpu.memory_space<vmem>>, vector<1x4x72xf32>,
    %c0_97 = arith.constant 0 : index
    %c0_98 = arith.constant 0 : index
    %c0_99 = arith.constant 0 : index
    %126 = vector.load %arg3[%c0_97, %c0_98, %c0_99] : memref<9x4x4xf32, #tpu.memory_space<vmem>>, vector<1x4x4xf32>
    %127 = vector.shape_cast %126 : vector<1x4x4xf32> to vector<4x4xf32>
    %128 = vector.extract_strided_slice %9 {offsets = [0, 9], sizes = [4, 72], strides = [1, 1]} : vector<4x92xf32> to vector<4x72xf32>
    %cst_100 = arith.constant dense<0.000000e+00> : vector<4x72xf32>
    %129 = tpu.matmul %127, %128, %cst_100 {dimension_numbers = #tpu.dot_dimension_numbers<[1], [0], [0], [1], [0, 0, 1, 1], [], []>} : vector<4x4xf32>, vector<4x72xf32>, vector<4x72xf32> -> vector<4x72xf32>
    %c1_101 = arith.constant 1 : index
    %c0_102 = arith.constant 0 : index
    %c0_103 = arith.constant 0 : index
    %130 = vector.load %arg3[%c1_101, %c0_102, %c0_103] : memref<9x4x4xf32, #tpu.memory_space<vmem>>, vector<1x4x4xf32>
    %131 = vector.shape_cast %130 : vector<1x4x4xf32> to vector<4x4xf32>
    %132 = vector.extract_strided_slice %7 {offsets = [0, 10], sizes = [4, 72], strides = [1, 1]} : vector<4x92xf32> to vector<4x72xf32>
    %cst_104 = arith.constant dense<0.000000e+00> : vector<4x72xf32>
    %133 = tpu.matmul %131, %132, %cst_104 {dimension_numbers = #tpu.dot_dimension_numbers<[1], [0], [0], [1], [0, 0, 1, 1], [], []>} : vector<4x4xf32>, vector<4x72xf32>, vector<4x72xf32> -> vector<4x72xf32>
    %134 = arith.addf %129, %133 : vector<4x72xf32>
    %c2_105 = arith.constant 2 : index
    %c0_106 = arith.constant 0 : index
    %c0_107 = arith.constant 0 : index
    %135 = vector.load %arg3[%c2_105, %c0_106, %c0_107] : memref<9x4x4xf32, #tpu.memory_space<vmem>>, vector<1x4x4xf32>
    %136 = vector.shape_cast %135 : vector<1x4x4xf32> to vector<4x4xf32>
    %137 = vector.extract_strided_slice %9 {offsets = [0, 10], sizes = [4, 72], strides = [1, 1]} : vector<4x92xf32> to vector<4x72xf32>
    %cst_108 = arith.constant dense<0.000000e+00> : vector<4x72xf32>
    %138 = tpu.matmul %136, %137, %cst_108 {dimension_numbers = #tpu.dot_dimension_numbers<[1], [0], [0], [1], [0, 0, 1, 1], [], []>} : vector<4x4xf32>, vector<4x72xf32>, vector<4x72xf32> -> vector<4x72xf32>
    %139 = arith.addf %134, %138 : vector<4x72xf32>
    %c3_109 = arith.constant 3 : index
    %c0_110 = arith.constant 0 : index
    %c0_111 = arith.constant 0 : index
    %140 = vector.load %arg3[%c3_109, %c0_110, %c0_111] : memref<9x4x4xf32, #tpu.memory_space<vmem>>, vector<1x4x4xf32>
    %141 = vector.shape_cast %140 : vector<1x4x4xf32> to vector<4x4xf32>
    %142 = vector.extract_strided_slice %13 {offsets = [0, 9], sizes = [4, 72], strides = [1, 1]} : vector<4x92xf32> to vector<4x72xf32>
    %cst_112 = arith.constant dense<0.000000e+00> : vector<4x72xf32>
    %143 = tpu.matmul %141, %142, %cst_112 {dimension_numbers = #tpu.dot_dimension_numbers<[1], [0], [0], [1], [0, 0, 1, 1], [], []>} : vector<4x4xf32>, vector<4x72xf32>, vector<4x72xf32> -> vector<4x72xf32>
    %144 = arith.addf %139, %143 : vector<4x72xf32>
    %c4_113 = arith.constant 4 : index
    %c0_114 = arith.constant 0 : index
    %c0_115 = arith.constant 0 : index
    %145 = vector.load %arg3[%c4_113, %c0_114, %c0_115] : memref<9x4x4xf32, #tpu.memory_space<vmem>>, vector<1x4x4xf32>
    %146 = vector.shape_cast %145 : vector<1x4x4xf32> to vector<4x4xf32>
    %147 = vector.extract_strided_slice %11 {offsets = [0, 10], sizes = [4, 72], strides = [1, 1]} : vector<4x92xf32> to vector<4x72xf32>
    %cst_116 = arith.constant dense<0.000000e+00> : vector<4x72xf32>
    %148 = tpu.matmul %146, %147, %cst_116 {dimension_numbers = #tpu.dot_dimension_numbers<[1], [0], [0], [1], [0, 0, 1, 1], [], []>} : vector<4x4xf32>, vector<4x72xf32>, vector<4x72xf32> -> vector<4x72xf32>
    %149 = arith.addf %144, %148 : vector<4x72xf32>
    %c5_117 = arith.constant 5 : index
    %c0_118 = arith.constant 0 : index
    %c0_119 = arith.constant 0 : index
    %150 = vector.load %arg3[%c5_117, %c0_118, %c0_119] : memref<9x4x4xf32, #tpu.memory_space<vmem>>, vector<1x4x4xf32>
    %151 = vector.shape_cast %150 : vector<1x4x4xf32> to vector<4x4xf32>
    %152 = vector.extract_strided_slice %13 {offsets = [0, 10], sizes = [4, 72], strides = [1, 1]} : vector<4x92xf32> to vector<4x72xf32>
    %cst_120 = arith.constant dense<0.000000e+00> : vector<4x72xf32>
    %153 = tpu.matmul %151, %152, %cst_120 {dimension_numbers = #tpu.dot_dimension_numbers<[1], [0], [0], [1], [0, 0, 1, 1], [], []>} : vector<4x4xf32>, vector<4x72xf32>, vector<4x72xf32> -> vector<4x72xf32>
    %154 = arith.addf %149, %153 : vector<4x72xf32>
    %c6_121 = arith.constant 6 : index
    %c0_122 = arith.constant 0 : index
    %c0_123 = arith.constant 0 : index
    %155 = vector.load %arg3[%c6_121, %c0_122, %c0_123] : memref<9x4x4xf32, #tpu.memory_space<vmem>>, vector<1x4x4xf32>
    %156 = vector.shape_cast %155 : vector<1x4x4xf32> to vector<4x4xf32>
    %157 = vector.extract_strided_slice %9 {offsets = [0, 18], sizes = [4, 72], strides = [1, 1]} : vector<4x92xf32> to vector<4x72xf32>
    %cst_124 = arith.constant dense<0.000000e+00> : vector<4x72xf32>
    %158 = tpu.matmul %156, %157, %cst_124 {dimension_numbers = #tpu.dot_dimension_numbers<[1], [0], [0], [1], [0, 0, 1, 1], [], []>} : vector<4x4xf32>, vector<4x72xf32>, vector<4x72xf32> -> vector<4x72xf32>
    %159 = arith.addf %154, %158 : vector<4x72xf32>
    %c7_125 = arith.constant 7 : index
    %c0_126 = arith.constant 0 : index
    %c0_127 = arith.constant 0 : index
    %160 = vector.load %arg3[%c7_125, %c0_126, %c0_127] : memref<9x4x4xf32, #tpu.memory_space<vmem>>, vector<1x4x4xf32>
    %161 = vector.shape_cast %160 : vector<1x4x4xf32> to vector<4x4xf32>
    %162 = vector.extract_strided_slice %7 {offsets = [0, 19], sizes = [4, 72], strides = [1, 1]} : vector<4x92xf32> to vector<4x72xf32>
    %cst_128 = arith.constant dense<0.000000e+00> : vector<4x72xf32>
    %163 = tpu.matmul %161, %162, %cst_128 {dimension_numbers = #tpu.dot_dimension_numbers<[1], [0], [0], [1], [0, 0, 1, 1], [], []>} : vector<4x4xf32>, vector<4x72xf32>, vector<4x72xf32> -> vector<4x72xf32>
    %164 = arith.addf %159, %163 : vector<4x72xf32>
    %c8_129 = arith.constant 8 : index
    %c0_130 = arith.constant 0 : index
    %c0_131 = arith.constant 0 : index
    %165 = vector.load %arg3[%c8_129, %c0_130, %c0_131] : memref<9x4x4xf32, #tpu.memory_space<vmem>>, vector<1x4x4xf32>
    %166 = vector.shape_cast %165 : vector<1x4x4xf32> to vector<4x4xf32>
    %167 = vector.extract_strided_slice %9 {offsets = [0, 19], sizes = [4, 72], strides = [1, 1]} : vector<4x92xf32> to vector<4x72xf32>
    %cst_132 = arith.constant dense<0.000000e+00> : vector<4x72xf32>
    %168 = tpu.matmul %166, %167, %cst_132 {dimension_numbers = #tpu.dot_dimension_numbers<[1], [0], [0], [1], [0, 0, 1, 1], [], []>} : vector<4x4xf32>, vector<4x72xf32>, vector<4x72xf32> -> vector<4x72xf32>
    %169 = arith.addf %164, %168 : vector<4x72xf32>
    %170 = vector.broadcast %1 : vector<4x1xf32> to vector<4x72xf32>
    %171 = arith.addf %169, %170 : vector<4x72xf32>
    %cst_133 = arith.constant 0.000000e+00 : f32
    %172 = vector.broadcast %cst_133 : f32 to vector<4x72xf32>
    %173 = arith.cmpf ogt, %171, %172 : vector<4x72xf32>
    %174 = vector.broadcast %2 : vector<4x1xf32> to vector<4x72xf32>
    %175 = arith.mulf %174, %171 : vector<4x72xf32>
    %176 = arith.select %173, %171, %175 : vector<4x72xi1>, vector<4x72xf32>
    %177 = vector.broadcast %0 : vector<1x72xf32> to vector<4x72xf32>
    %178 = arith.mulf %176, %177 : vector<4x72xf32>
    %c2_134 = arith.constant 2 : index
    %c0_135 = arith.constant 0 : index
    %c10_136 = arith.constant 10 : index
    %179 = vector.load %arg11[%c2_134, %c0_135, %c10_136] : memref<4x4x92xf32, #tpu.memory_space<vmem>>, vector<1x4x72xf32>
    %180 = vector.shape_cast %179 : vector<1x4x72xf32> to vector<4x72xf32>
    %181 = vector.shape_cast %178 : vector<4x72xf32> to vector<1x4x72xf32>
    tpu.vector_store %arg11[%c2_134, %c0_135, %c10_136], %181 {strides = array<i32>} : memref<4x4x92xf32, #tpu.memory_space<vmem>>, vector<1x4x72xf32>,
    %c0_137 = arith.constant 0 : index
    %c0_138 = arith.constant 0 : index
    %c0_139 = arith.constant 0 : index
    %182 = vector.load %arg3[%c0_137, %c0_138, %c0_139] : memref<9x4x4xf32, #tpu.memory_space<vmem>>, vector<1x4x4xf32>
    %183 = vector.shape_cast %182 : vector<1x4x4xf32> to vector<4x4xf32>
    %184 = vector.extract_strided_slice %7 {offsets = [0, 10], sizes = [4, 72], strides = [1, 1]} : vector<4x92xf32> to vector<4x72xf32>
    %cst_140 = arith.constant dense<0.000000e+00> : vector<4x72xf32>
    %185 = tpu.matmul %183, %184, %cst_140 {dimension_numbers = #tpu.dot_dimension_numbers<[1], [0], [0], [1], [0, 0, 1, 1], [], []>} : vector<4x4xf32>, vector<4x72xf32>, vector<4x72xf32> -> vector<4x72xf32>
    %c1_141 = arith.constant 1 : index
    %c0_142 = arith.constant 0 : index
    %c0_143 = arith.constant 0 : index
    %186 = vector.load %arg3[%c1_141, %c0_142, %c0_143] : memref<9x4x4xf32, #tpu.memory_space<vmem>>, vector<1x4x4xf32>
    %187 = vector.shape_cast %186 : vector<1x4x4xf32> to vector<4x4xf32>
    %188 = vector.extract_strided_slice %9 {offsets = [0, 10], sizes = [4, 72], strides = [1, 1]} : vector<4x92xf32> to vector<4x72xf32>
    %cst_144 = arith.constant dense<0.000000e+00> : vector<4x72xf32>
    %189 = tpu.matmul %187, %188, %cst_144 {dimension_numbers = #tpu.dot_dimension_numbers<[1], [0], [0], [1], [0, 0, 1, 1], [], []>} : vector<4x4xf32>, vector<4x72xf32>, vector<4x72xf32> -> vector<4x72xf32>
    %190 = arith.addf %185, %189 : vector<4x72xf32>
    %c2_145 = arith.constant 2 : index
    %c0_146 = arith.constant 0 : index
    %c0_147 = arith.constant 0 : index
    %191 = vector.load %arg3[%c2_145, %c0_146, %c0_147] : memref<9x4x4xf32, #tpu.memory_space<vmem>>, vector<1x4x4xf32>
    %192 = vector.shape_cast %191 : vector<1x4x4xf32> to vector<4x4xf32>
    %193 = vector.extract_strided_slice %7 {offsets = [0, 11], sizes = [4, 72], strides = [1, 1]} : vector<4x92xf32> to vector<4x72xf32>
    %cst_148 = arith.constant dense<0.000000e+00> : vector<4x72xf32>
    %194 = tpu.matmul %192, %193, %cst_148 {dimension_numbers = #tpu.dot_dimension_numbers<[1], [0], [0], [1], [0, 0, 1, 1], [], []>} : vector<4x4xf32>, vector<4x72xf32>, vector<4x72xf32> -> vector<4x72xf32>
    %195 = arith.addf %190, %194 : vector<4x72xf32>
    %c3_149 = arith.constant 3 : index
    %c0_150 = arith.constant 0 : index
    %c0_151 = arith.constant 0 : index
    %196 = vector.load %arg3[%c3_149, %c0_150, %c0_151] : memref<9x4x4xf32, #tpu.memory_space<vmem>>, vector<1x4x4xf32>
    %197 = vector.shape_cast %196 : vector<1x4x4xf32> to vector<4x4xf32>
    %198 = vector.extract_strided_slice %11 {offsets = [0, 10], sizes = [4, 72], strides = [1, 1]} : vector<4x92xf32> to vector<4x72xf32>
    %cst_152 = arith.constant dense<0.000000e+00> : vector<4x72xf32>
    %199 = tpu.matmul %197, %198, %cst_152 {dimension_numbers = #tpu.dot_dimension_numbers<[1], [0], [0], [1], [0, 0, 1, 1], [], []>} : vector<4x4xf32>, vector<4x72xf32>, vector<4x72xf32> -> vector<4x72xf32>
    %200 = arith.addf %195, %199 : vector<4x72xf32>
    %c4_153 = arith.constant 4 : index
    %c0_154 = arith.constant 0 : index
    %c0_155 = arith.constant 0 : index
    %201 = vector.load %arg3[%c4_153, %c0_154, %c0_155] : memref<9x4x4xf32, #tpu.memory_space<vmem>>, vector<1x4x4xf32>
    %202 = vector.shape_cast %201 : vector<1x4x4xf32> to vector<4x4xf32>
    %203 = vector.extract_strided_slice %13 {offsets = [0, 10], sizes = [4, 72], strides = [1, 1]} : vector<4x92xf32> to vector<4x72xf32>
    %cst_156 = arith.constant dense<0.000000e+00> : vector<4x72xf32>
    %204 = tpu.matmul %202, %203, %cst_156 {dimension_numbers = #tpu.dot_dimension_numbers<[1], [0], [0], [1], [0, 0, 1, 1], [], []>} : vector<4x4xf32>, vector<4x72xf32>, vector<4x72xf32> -> vector<4x72xf32>
    %205 = arith.addf %200, %204 : vector<4x72xf32>
    %c5_157 = arith.constant 5 : index
    %c0_158 = arith.constant 0 : index
    %c0_159 = arith.constant 0 : index
    %206 = vector.load %arg3[%c5_157, %c0_158, %c0_159] : memref<9x4x4xf32, #tpu.memory_space<vmem>>, vector<1x4x4xf32>
    %207 = vector.shape_cast %206 : vector<1x4x4xf32> to vector<4x4xf32>
    %208 = vector.extract_strided_slice %11 {offsets = [0, 11], sizes = [4, 72], strides = [1, 1]} : vector<4x92xf32> to vector<4x72xf32>
    %cst_160 = arith.constant dense<0.000000e+00> : vector<4x72xf32>
    %209 = tpu.matmul %207, %208, %cst_160 {dimension_numbers = #tpu.dot_dimension_numbers<[1], [0], [0], [1], [0, 0, 1, 1], [], []>} : vector<4x4xf32>, vector<4x72xf32>, vector<4x72xf32> -> vector<4x72xf32>
    %210 = arith.addf %205, %209 : vector<4x72xf32>
    %c6_161 = arith.constant 6 : index
    %c0_162 = arith.constant 0 : index
    %c0_163 = arith.constant 0 : index
    %211 = vector.load %arg3[%c6_161, %c0_162, %c0_163] : memref<9x4x4xf32, #tpu.memory_space<vmem>>, vector<1x4x4xf32>
    %212 = vector.shape_cast %211 : vector<1x4x4xf32> to vector<4x4xf32>
    %213 = vector.extract_strided_slice %7 {offsets = [0, 19], sizes = [4, 72], strides = [1, 1]} : vector<4x92xf32> to vector<4x72xf32>
    %cst_164 = arith.constant dense<0.000000e+00> : vector<4x72xf32>
    %214 = tpu.matmul %212, %213, %cst_164 {dimension_numbers = #tpu.dot_dimension_numbers<[1], [0], [0], [1], [0, 0, 1, 1], [], []>} : vector<4x4xf32>, vector<4x72xf32>, vector<4x72xf32> -> vector<4x72xf32>
    %215 = arith.addf %210, %214 : vector<4x72xf32>
    %c7_165 = arith.constant 7 : index
    %c0_166 = arith.constant 0 : index
    %c0_167 = arith.constant 0 : index
    %216 = vector.load %arg3[%c7_165, %c0_166, %c0_167] : memref<9x4x4xf32, #tpu.memory_space<vmem>>, vector<1x4x4xf32>
    %217 = vector.shape_cast %216 : vector<1x4x4xf32> to vector<4x4xf32>
    %218 = vector.extract_strided_slice %9 {offsets = [0, 19], sizes = [4, 72], strides = [1, 1]} : vector<4x92xf32> to vector<4x72xf32>
    %cst_168 = arith.constant dense<0.000000e+00> : vector<4x72xf32>
    %219 = tpu.matmul %217, %218, %cst_168 {dimension_numbers = #tpu.dot_dimension_numbers<[1], [0], [0], [1], [0, 0, 1, 1], [], []>} : vector<4x4xf32>, vector<4x72xf32>, vector<4x72xf32> -> vector<4x72xf32>
    %220 = arith.addf %215, %219 : vector<4x72xf32>
    %c8_169 = arith.constant 8 : index
    %c0_170 = arith.constant 0 : index
    %c0_171 = arith.constant 0 : index
    %221 = vector.load %arg3[%c8_169, %c0_170, %c0_171] : memref<9x4x4xf32, #tpu.memory_space<vmem>>, vector<1x4x4xf32>
    %222 = vector.shape_cast %221 : vector<1x4x4xf32> to vector<4x4xf32>
    %223 = vector.extract_strided_slice %7 {offsets = [0, 20], sizes = [4, 72], strides = [1, 1]} : vector<4x92xf32> to vector<4x72xf32>
    %cst_172 = arith.constant dense<0.000000e+00> : vector<4x72xf32>
    %224 = tpu.matmul %222, %223, %cst_172 {dimension_numbers = #tpu.dot_dimension_numbers<[1], [0], [0], [1], [0, 0, 1, 1], [], []>} : vector<4x4xf32>, vector<4x72xf32>, vector<4x72xf32> -> vector<4x72xf32>
    %225 = arith.addf %220, %224 : vector<4x72xf32>
    %226 = vector.broadcast %1 : vector<4x1xf32> to vector<4x72xf32>
    %227 = arith.addf %225, %226 : vector<4x72xf32>
    %cst_173 = arith.constant 0.000000e+00 : f32
    %228 = vector.broadcast %cst_173 : f32 to vector<4x72xf32>
    %229 = arith.cmpf ogt, %227, %228 : vector<4x72xf32>
    %230 = vector.broadcast %2 : vector<4x1xf32> to vector<4x72xf32>
    %231 = arith.mulf %230, %227 : vector<4x72xf32>
    %232 = arith.select %229, %227, %231 : vector<4x72xi1>, vector<4x72xf32>
    %233 = vector.broadcast %0 : vector<1x72xf32> to vector<4x72xf32>
    %234 = arith.mulf %232, %233 : vector<4x72xf32>
    %c3_174 = arith.constant 3 : index
    %c0_175 = arith.constant 0 : index
    %c10_176 = arith.constant 10 : index
    %235 = vector.load %arg11[%c3_174, %c0_175, %c10_176] : memref<4x4x92xf32, #tpu.memory_space<vmem>>, vector<1x4x72xf32>
    %236 = vector.shape_cast %235 : vector<1x4x72xf32> to vector<4x72xf32>
    %237 = vector.shape_cast %234 : vector<4x72xf32> to vector<1x4x72xf32>
    tpu.vector_store %arg11[%c3_174, %c0_175, %c10_176], %237 {strides = array<i32>} : memref<4x4x92xf32, #tpu.memory_space<vmem>>, vector<1x4x72xf32>,
    %c0_177 = arith.constant 0 : index
    %c0_178 = arith.constant 0 : index
    %c0_179 = arith.constant 0 : index
    %238 = vector.load %arg11[%c0_177, %c0_178, %c0_179] : memref<4x4x92xf32, #tpu.memory_space<vmem>>, vector<1x4x92xf32>
    %239 = vector.shape_cast %238 : vector<1x4x92xf32> to vector<4x92xf32>
    %c1_180 = arith.constant 1 : index
    %c0_181 = arith.constant 0 : index
    %c0_182 = arith.constant 0 : index
    %240 = vector.load %arg11[%c1_180, %c0_181, %c0_182] : memref<4x4x92xf32, #tpu.memory_space<vmem>>, vector<1x4x92xf32>
    %241 = vector.shape_cast %240 : vector<1x4x92xf32> to vector<4x92xf32>
    %c2_183 = arith.constant 2 : index
    %c0_184 = arith.constant 0 : index
    %c0_185 = arith.constant 0 : index
    %242 = vector.load %arg11[%c2_183, %c0_184, %c0_185] : memref<4x4x92xf32, #tpu.memory_space<vmem>>, vector<1x4x92xf32>
    %243 = vector.shape_cast %242 : vector<1x4x92xf32> to vector<4x92xf32>
    %c3_186 = arith.constant 3 : index
    %c0_187 = arith.constant 0 : index
    %c0_188 = arith.constant 0 : index
    %244 = vector.load %arg11[%c3_186, %c0_187, %c0_188] : memref<4x4x92xf32, #tpu.memory_space<vmem>>, vector<1x4x92xf32>
    %245 = vector.shape_cast %244 : vector<1x4x92xf32> to vector<4x92xf32>
    %c0_189 = arith.constant 0 : index
    %c0_190 = arith.constant 0 : index
    %c0_191 = arith.constant 0 : index
    %246 = vector.load %arg4[%c0_189, %c0_190, %c0_191] : memref<9x4x4xf32, #tpu.memory_space<vmem>>, vector<1x4x4xf32>
    %247 = vector.shape_cast %246 : vector<1x4x4xf32> to vector<4x4xf32>
    %248 = vector.extract_strided_slice %245 {offsets = [0, 0], sizes = [4, 72], strides = [1, 1]} : vector<4x92xf32> to vector<4x72xf32>
    %cst_192 = arith.constant dense<0.000000e+00> : vector<4x72xf32>
    %249 = tpu.matmul %247, %248, %cst_192 {dimension_numbers = #tpu.dot_dimension_numbers<[1], [0], [0], [1], [0, 0, 1, 1], [], []>} : vector<4x4xf32>, vector<4x72xf32>, vector<4x72xf32> -> vector<4x72xf32>
    %c1_193 = arith.constant 1 : index
    %c0_194 = arith.constant 0 : index
    %c0_195 = arith.constant 0 : index
    %250 = vector.load %arg4[%c1_193, %c0_194, %c0_195] : memref<9x4x4xf32, #tpu.memory_space<vmem>>, vector<1x4x4xf32>
    %251 = vector.shape_cast %250 : vector<1x4x4xf32> to vector<4x4xf32>
    %252 = vector.extract_strided_slice %243 {offsets = [0, 1], sizes = [4, 72], strides = [1, 1]} : vector<4x92xf32> to vector<4x72xf32>
    %cst_196 = arith.constant dense<0.000000e+00> : vector<4x72xf32>
    %253 = tpu.matmul %251, %252, %cst_196 {dimension_numbers = #tpu.dot_dimension_numbers<[1], [0], [0], [1], [0, 0, 1, 1], [], []>} : vector<4x4xf32>, vector<4x72xf32>, vector<4x72xf32> -> vector<4x72xf32>
    %254 = arith.addf %249, %253 : vector<4x72xf32>
    %c2_197 = arith.constant 2 : index
    %c0_198 = arith.constant 0 : index
    %c0_199 = arith.constant 0 : index
    %255 = vector.load %arg4[%c2_197, %c0_198, %c0_199] : memref<9x4x4xf32, #tpu.memory_space<vmem>>, vector<1x4x4xf32>
    %256 = vector.shape_cast %255 : vector<1x4x4xf32> to vector<4x4xf32>
    %257 = vector.extract_strided_slice %245 {offsets = [0, 1], sizes = [4, 72], strides = [1, 1]} : vector<4x92xf32> to vector<4x72xf32>
    %cst_200 = arith.constant dense<0.000000e+00> : vector<4x72xf32>
    %258 = tpu.matmul %256, %257, %cst_200 {dimension_numbers = #tpu.dot_dimension_numbers<[1], [0], [0], [1], [0, 0, 1, 1], [], []>} : vector<4x4xf32>, vector<4x72xf32>, vector<4x72xf32> -> vector<4x72xf32>
    %259 = arith.addf %254, %258 : vector<4x72xf32>
    %c3_201 = arith.constant 3 : index
    %c0_202 = arith.constant 0 : index
    %c0_203 = arith.constant 0 : index
    %260 = vector.load %arg4[%c3_201, %c0_202, %c0_203] : memref<9x4x4xf32, #tpu.memory_space<vmem>>, vector<1x4x4xf32>
    %261 = vector.shape_cast %260 : vector<1x4x4xf32> to vector<4x4xf32>
    %262 = vector.extract_strided_slice %241 {offsets = [0, 9], sizes = [4, 72], strides = [1, 1]} : vector<4x92xf32> to vector<4x72xf32>
    %cst_204 = arith.constant dense<0.000000e+00> : vector<4x72xf32>
    %263 = tpu.matmul %261, %262, %cst_204 {dimension_numbers = #tpu.dot_dimension_numbers<[1], [0], [0], [1], [0, 0, 1, 1], [], []>} : vector<4x4xf32>, vector<4x72xf32>, vector<4x72xf32> -> vector<4x72xf32>
    %264 = arith.addf %259, %263 : vector<4x72xf32>
    %c4_205 = arith.constant 4 : index
    %c0_206 = arith.constant 0 : index
    %c0_207 = arith.constant 0 : index
    %265 = vector.load %arg4[%c4_205, %c0_206, %c0_207] : memref<9x4x4xf32, #tpu.memory_space<vmem>>, vector<1x4x4xf32>
    %266 = vector.shape_cast %265 : vector<1x4x4xf32> to vector<4x4xf32>
    %267 = vector.extract_strided_slice %239 {offsets = [0, 10], sizes = [4, 72], strides = [1, 1]} : vector<4x92xf32> to vector<4x72xf32>
    %cst_208 = arith.constant dense<0.000000e+00> : vector<4x72xf32>
    %268 = tpu.matmul %266, %267, %cst_208 {dimension_numbers = #tpu.dot_dimension_numbers<[1], [0], [0], [1], [0, 0, 1, 1], [], []>} : vector<4x4xf32>, vector<4x72xf32>, vector<4x72xf32> -> vector<4x72xf32>
    %269 = arith.addf %264, %268 : vector<4x72xf32>
    %c5_209 = arith.constant 5 : index
    %c0_210 = arith.constant 0 : index
    %c0_211 = arith.constant 0 : index
    %270 = vector.load %arg4[%c5_209, %c0_210, %c0_211] : memref<9x4x4xf32, #tpu.memory_space<vmem>>, vector<1x4x4xf32>
    %271 = vector.shape_cast %270 : vector<1x4x4xf32> to vector<4x4xf32>
    %272 = vector.extract_strided_slice %241 {offsets = [0, 10], sizes = [4, 72], strides = [1, 1]} : vector<4x92xf32> to vector<4x72xf32>
    %cst_212 = arith.constant dense<0.000000e+00> : vector<4x72xf32>
    %273 = tpu.matmul %271, %272, %cst_212 {dimension_numbers = #tpu.dot_dimension_numbers<[1], [0], [0], [1], [0, 0, 1, 1], [], []>} : vector<4x4xf32>, vector<4x72xf32>, vector<4x72xf32> -> vector<4x72xf32>
    %274 = arith.addf %269, %273 : vector<4x72xf32>
    %c6_213 = arith.constant 6 : index
    %c0_214 = arith.constant 0 : index
    %c0_215 = arith.constant 0 : index
    %275 = vector.load %arg4[%c6_213, %c0_214, %c0_215] : memref<9x4x4xf32, #tpu.memory_space<vmem>>, vector<1x4x4xf32>
    %276 = vector.shape_cast %275 : vector<1x4x4xf32> to vector<4x4xf32>
    %277 = vector.extract_strided_slice %245 {offsets = [0, 9], sizes = [4, 72], strides = [1, 1]} : vector<4x92xf32> to vector<4x72xf32>
    %cst_216 = arith.constant dense<0.000000e+00> : vector<4x72xf32>
    %278 = tpu.matmul %276, %277, %cst_216 {dimension_numbers = #tpu.dot_dimension_numbers<[1], [0], [0], [1], [0, 0, 1, 1], [], []>} : vector<4x4xf32>, vector<4x72xf32>, vector<4x72xf32> -> vector<4x72xf32>
    %279 = arith.addf %274, %278 : vector<4x72xf32>
    %c7_217 = arith.constant 7 : index
    %c0_218 = arith.constant 0 : index
    %c0_219 = arith.constant 0 : index
    %280 = vector.load %arg4[%c7_217, %c0_218, %c0_219] : memref<9x4x4xf32, #tpu.memory_space<vmem>>, vector<1x4x4xf32>
    %281 = vector.shape_cast %280 : vector<1x4x4xf32> to vector<4x4xf32>
    %282 = vector.extract_strided_slice %243 {offsets = [0, 10], sizes = [4, 72], strides = [1, 1]} : vector<4x92xf32> to vector<4x72xf32>
    %cst_220 = arith.constant dense<0.000000e+00> : vector<4x72xf32>
    %283 = tpu.matmul %281, %282, %cst_220 {dimension_numbers = #tpu.dot_dimension_numbers<[1], [0], [0], [1], [0, 0, 1, 1], [], []>} : vector<4x4xf32>, vector<4x72xf32>, vector<4x72xf32> -> vector<4x72xf32>
    %284 = arith.addf %279, %283 : vector<4x72xf32>
    %c8_221 = arith.constant 8 : index
    %c0_222 = arith.constant 0 : index
    %c0_223 = arith.constant 0 : index
    %285 = vector.load %arg4[%c8_221, %c0_222, %c0_223] : memref<9x4x4xf32, #tpu.memory_space<vmem>>, vector<1x4x4xf32>
    %286 = vector.shape_cast %285 : vector<1x4x4xf32> to vector<4x4xf32>
    %287 = vector.extract_strided_slice %245 {offsets = [0, 10], sizes = [4, 72], strides = [1, 1]} : vector<4x92xf32> to vector<4x72xf32>
    %cst_224 = arith.constant dense<0.000000e+00> : vector<4x72xf32>
    %288 = tpu.matmul %286, %287, %cst_224 {dimension_numbers = #tpu.dot_dimension_numbers<[1], [0], [0], [1], [0, 0, 1, 1], [], []>} : vector<4x4xf32>, vector<4x72xf32>, vector<4x72xf32> -> vector<4x72xf32>
    %289 = arith.addf %284, %288 : vector<4x72xf32>
    %290 = vector.broadcast %3 : vector<4x1xf32> to vector<4x72xf32>
    %291 = arith.addf %289, %290 : vector<4x72xf32>
    %292 = vector.broadcast %0 : vector<1x72xf32> to vector<4x72xf32>
    %293 = arith.mulf %291, %292 : vector<4x72xf32>
    %c0_225 = arith.constant 0 : index
    %c0_226 = arith.constant 0 : index
    %c0_227 = arith.constant 0 : index
    %294 = vector.load %arg4[%c0_225, %c0_226, %c0_227] : memref<9x4x4xf32, #tpu.memory_space<vmem>>, vector<1x4x4xf32>
    %295 = vector.shape_cast %294 : vector<1x4x4xf32> to vector<4x4xf32>
    %296 = vector.extract_strided_slice %243 {offsets = [0, 1], sizes = [4, 72], strides = [1, 1]} : vector<4x92xf32> to vector<4x72xf32>
    %cst_228 = arith.constant dense<0.000000e+00> : vector<4x72xf32>
    %297 = tpu.matmul %295, %296, %cst_228 {dimension_numbers = #tpu.dot_dimension_numbers<[1], [0], [0], [1], [0, 0, 1, 1], [], []>} : vector<4x4xf32>, vector<4x72xf32>, vector<4x72xf32> -> vector<4x72xf32>
    %c1_229 = arith.constant 1 : index
    %c0_230 = arith.constant 0 : index
    %c0_231 = arith.constant 0 : index
    %298 = vector.load %arg4[%c1_229, %c0_230, %c0_231] : memref<9x4x4xf32, #tpu.memory_space<vmem>>, vector<1x4x4xf32>
    %299 = vector.shape_cast %298 : vector<1x4x4xf32> to vector<4x4xf32>
    %300 = vector.extract_strided_slice %245 {offsets = [0, 1], sizes = [4, 72], strides = [1, 1]} : vector<4x92xf32> to vector<4x72xf32>
    %cst_232 = arith.constant dense<0.000000e+00> : vector<4x72xf32>
    %301 = tpu.matmul %299, %300, %cst_232 {dimension_numbers = #tpu.dot_dimension_numbers<[1], [0], [0], [1], [0, 0, 1, 1], [], []>} : vector<4x4xf32>, vector<4x72xf32>, vector<4x72xf32> -> vector<4x72xf32>
    %302 = arith.addf %297, %301 : vector<4x72xf32>
    %c2_233 = arith.constant 2 : index
    %c0_234 = arith.constant 0 : index
    %c0_235 = arith.constant 0 : index
    %303 = vector.load %arg4[%c2_233, %c0_234, %c0_235] : memref<9x4x4xf32, #tpu.memory_space<vmem>>, vector<1x4x4xf32>
    %304 = vector.shape_cast %303 : vector<1x4x4xf32> to vector<4x4xf32>
    %305 = vector.extract_strided_slice %243 {offsets = [0, 2], sizes = [4, 72], strides = [1, 1]} : vector<4x92xf32> to vector<4x72xf32>
    %cst_236 = arith.constant dense<0.000000e+00> : vector<4x72xf32>
    %306 = tpu.matmul %304, %305, %cst_236 {dimension_numbers = #tpu.dot_dimension_numbers<[1], [0], [0], [1], [0, 0, 1, 1], [], []>} : vector<4x4xf32>, vector<4x72xf32>, vector<4x72xf32> -> vector<4x72xf32>
    %307 = arith.addf %302, %306 : vector<4x72xf32>
    %c3_237 = arith.constant 3 : index
    %c0_238 = arith.constant 0 : index
    %c0_239 = arith.constant 0 : index
    %308 = vector.load %arg4[%c3_237, %c0_238, %c0_239] : memref<9x4x4xf32, #tpu.memory_space<vmem>>, vector<1x4x4xf32>
    %309 = vector.shape_cast %308 : vector<1x4x4xf32> to vector<4x4xf32>
    %310 = vector.extract_strided_slice %239 {offsets = [0, 10], sizes = [4, 72], strides = [1, 1]} : vector<4x92xf32> to vector<4x72xf32>
    %cst_240 = arith.constant dense<0.000000e+00> : vector<4x72xf32>
    %311 = tpu.matmul %309, %310, %cst_240 {dimension_numbers = #tpu.dot_dimension_numbers<[1], [0], [0], [1], [0, 0, 1, 1], [], []>} : vector<4x4xf32>, vector<4x72xf32>, vector<4x72xf32> -> vector<4x72xf32>
    %312 = arith.addf %307, %311 : vector<4x72xf32>
    %c4_241 = arith.constant 4 : index
    %c0_242 = arith.constant 0 : index
    %c0_243 = arith.constant 0 : index
    %313 = vector.load %arg4[%c4_241, %c0_242, %c0_243] : memref<9x4x4xf32, #tpu.memory_space<vmem>>, vector<1x4x4xf32>
    %314 = vector.shape_cast %313 : vector<1x4x4xf32> to vector<4x4xf32>
    %315 = vector.extract_strided_slice %241 {offsets = [0, 10], sizes = [4, 72], strides = [1, 1]} : vector<4x92xf32> to vector<4x72xf32>
    %cst_244 = arith.constant dense<0.000000e+00> : vector<4x72xf32>
    %316 = tpu.matmul %314, %315, %cst_244 {dimension_numbers = #tpu.dot_dimension_numbers<[1], [0], [0], [1], [0, 0, 1, 1], [], []>} : vector<4x4xf32>, vector<4x72xf32>, vector<4x72xf32> -> vector<4x72xf32>
    %317 = arith.addf %312, %316 : vector<4x72xf32>
    %c5_245 = arith.constant 5 : index
    %c0_246 = arith.constant 0 : index
    %c0_247 = arith.constant 0 : index
    %318 = vector.load %arg4[%c5_245, %c0_246, %c0_247] : memref<9x4x4xf32, #tpu.memory_space<vmem>>, vector<1x4x4xf32>
    %319 = vector.shape_cast %318 : vector<1x4x4xf32> to vector<4x4xf32>
    %320 = vector.extract_strided_slice %239 {offsets = [0, 11], sizes = [4, 72], strides = [1, 1]} : vector<4x92xf32> to vector<4x72xf32>
    %cst_248 = arith.constant dense<0.000000e+00> : vector<4x72xf32>
    %321 = tpu.matmul %319, %320, %cst_248 {dimension_numbers = #tpu.dot_dimension_numbers<[1], [0], [0], [1], [0, 0, 1, 1], [], []>} : vector<4x4xf32>, vector<4x72xf32>, vector<4x72xf32> -> vector<4x72xf32>
    %322 = arith.addf %317, %321 : vector<4x72xf32>
    %c6_249 = arith.constant 6 : index
    %c0_250 = arith.constant 0 : index
    %c0_251 = arith.constant 0 : index
    %323 = vector.load %arg4[%c6_249, %c0_250, %c0_251] : memref<9x4x4xf32, #tpu.memory_space<vmem>>, vector<1x4x4xf32>
    %324 = vector.shape_cast %323 : vector<1x4x4xf32> to vector<4x4xf32>
    %325 = vector.extract_strided_slice %243 {offsets = [0, 10], sizes = [4, 72], strides = [1, 1]} : vector<4x92xf32> to vector<4x72xf32>
    %cst_252 = arith.constant dense<0.000000e+00> : vector<4x72xf32>
    %326 = tpu.matmul %324, %325, %cst_252 {dimension_numbers = #tpu.dot_dimension_numbers<[1], [0], [0], [1], [0, 0, 1, 1], [], []>} : vector<4x4xf32>, vector<4x72xf32>, vector<4x72xf32> -> vector<4x72xf32>
    %327 = arith.addf %322, %326 : vector<4x72xf32>
    %c7_253 = arith.constant 7 : index
    %c0_254 = arith.constant 0 : index
    %c0_255 = arith.constant 0 : index
    %328 = vector.load %arg4[%c7_253, %c0_254, %c0_255] : memref<9x4x4xf32, #tpu.memory_space<vmem>>, vector<1x4x4xf32>
    %329 = vector.shape_cast %328 : vector<1x4x4xf32> to vector<4x4xf32>
    %330 = vector.extract_strided_slice %245 {offsets = [0, 10], sizes = [4, 72], strides = [1, 1]} : vector<4x92xf32> to vector<4x72xf32>
    %cst_256 = arith.constant dense<0.000000e+00> : vector<4x72xf32>
    %331 = tpu.matmul %329, %330, %cst_256 {dimension_numbers = #tpu.dot_dimension_numbers<[1], [0], [0], [1], [0, 0, 1, 1], [], []>} : vector<4x4xf32>, vector<4x72xf32>, vector<4x72xf32> -> vector<4x72xf32>
    %332 = arith.addf %327, %331 : vector<4x72xf32>
    %c8_257 = arith.constant 8 : index
    %c0_258 = arith.constant 0 : index
    %c0_259 = arith.constant 0 : index
    %333 = vector.load %arg4[%c8_257, %c0_258, %c0_259] : memref<9x4x4xf32, #tpu.memory_space<vmem>>, vector<1x4x4xf32>
    %334 = vector.shape_cast %333 : vector<1x4x4xf32> to vector<4x4xf32>
    %335 = vector.extract_strided_slice %243 {offsets = [0, 11], sizes = [4, 72], strides = [1, 1]} : vector<4x92xf32> to vector<4x72xf32>
    %cst_260 = arith.constant dense<0.000000e+00> : vector<4x72xf32>
    %336 = tpu.matmul %334, %335, %cst_260 {dimension_numbers = #tpu.dot_dimension_numbers<[1], [0], [0], [1], [0, 0, 1, 1], [], []>} : vector<4x4xf32>, vector<4x72xf32>, vector<4x72xf32> -> vector<4x72xf32>
    %337 = arith.addf %332, %336 : vector<4x72xf32>
    %338 = vector.broadcast %3 : vector<4x1xf32> to vector<4x72xf32>
    %339 = arith.addf %337, %338 : vector<4x72xf32>
    %340 = vector.broadcast %0 : vector<1x72xf32> to vector<4x72xf32>
    %341 = arith.mulf %339, %340 : vector<4x72xf32>
    %c0_261 = arith.constant 0 : index
    %c0_262 = arith.constant 0 : index
    %c0_263 = arith.constant 0 : index
    %342 = vector.load %arg4[%c0_261, %c0_262, %c0_263] : memref<9x4x4xf32, #tpu.memory_space<vmem>>, vector<1x4x4xf32>
    %343 = vector.shape_cast %342 : vector<1x4x4xf32> to vector<4x4xf32>
    %344 = vector.extract_strided_slice %241 {offsets = [0, 9], sizes = [4, 72], strides = [1, 1]} : vector<4x92xf32> to vector<4x72xf32>
    %cst_264 = arith.constant dense<0.000000e+00> : vector<4x72xf32>
    %345 = tpu.matmul %343, %344, %cst_264 {dimension_numbers = #tpu.dot_dimension_numbers<[1], [0], [0], [1], [0, 0, 1, 1], [], []>} : vector<4x4xf32>, vector<4x72xf32>, vector<4x72xf32> -> vector<4x72xf32>
    %c1_265 = arith.constant 1 : index
    %c0_266 = arith.constant 0 : index
    %c0_267 = arith.constant 0 : index
    %346 = vector.load %arg4[%c1_265, %c0_266, %c0_267] : memref<9x4x4xf32, #tpu.memory_space<vmem>>, vector<1x4x4xf32>
    %347 = vector.shape_cast %346 : vector<1x4x4xf32> to vector<4x4xf32>
    %348 = vector.extract_strided_slice %239 {offsets = [0, 10], sizes = [4, 72], strides = [1, 1]} : vector<4x92xf32> to vector<4x72xf32>
    %cst_268 = arith.constant dense<0.000000e+00> : vector<4x72xf32>
    %349 = tpu.matmul %347, %348, %cst_268 {dimension_numbers = #tpu.dot_dimension_numbers<[1], [0], [0], [1], [0, 0, 1, 1], [], []>} : vector<4x4xf32>, vector<4x72xf32>, vector<4x72xf32> -> vector<4x72xf32>
    %350 = arith.addf %345, %349 : vector<4x72xf32>
    %c2_269 = arith.constant 2 : index
    %c0_270 = arith.constant 0 : index
    %c0_271 = arith.constant 0 : index
    %351 = vector.load %arg4[%c2_269, %c0_270, %c0_271] : memref<9x4x4xf32, #tpu.memory_space<vmem>>, vector<1x4x4xf32>
    %352 = vector.shape_cast %351 : vector<1x4x4xf32> to vector<4x4xf32>
    %353 = vector.extract_strided_slice %241 {offsets = [0, 10], sizes = [4, 72], strides = [1, 1]} : vector<4x92xf32> to vector<4x72xf32>
    %cst_272 = arith.constant dense<0.000000e+00> : vector<4x72xf32>
    %354 = tpu.matmul %352, %353, %cst_272 {dimension_numbers = #tpu.dot_dimension_numbers<[1], [0], [0], [1], [0, 0, 1, 1], [], []>} : vector<4x4xf32>, vector<4x72xf32>, vector<4x72xf32> -> vector<4x72xf32>
    %355 = arith.addf %350, %354 : vector<4x72xf32>
    %c3_273 = arith.constant 3 : index
    %c0_274 = arith.constant 0 : index
    %c0_275 = arith.constant 0 : index
    %356 = vector.load %arg4[%c3_273, %c0_274, %c0_275] : memref<9x4x4xf32, #tpu.memory_space<vmem>>, vector<1x4x4xf32>
    %357 = vector.shape_cast %356 : vector<1x4x4xf32> to vector<4x4xf32>
    %358 = vector.extract_strided_slice %245 {offsets = [0, 9], sizes = [4, 72], strides = [1, 1]} : vector<4x92xf32> to vector<4x72xf32>
    %cst_276 = arith.constant dense<0.000000e+00> : vector<4x72xf32>
    %359 = tpu.matmul %357, %358, %cst_276 {dimension_numbers = #tpu.dot_dimension_numbers<[1], [0], [0], [1], [0, 0, 1, 1], [], []>} : vector<4x4xf32>, vector<4x72xf32>, vector<4x72xf32> -> vector<4x72xf32>
    %360 = arith.addf %355, %359 : vector<4x72xf32>
    %c4_277 = arith.constant 4 : index
    %c0_278 = arith.constant 0 : index
    %c0_279 = arith.constant 0 : index
    %361 = vector.load %arg4[%c4_277, %c0_278, %c0_279] : memref<9x4x4xf32, #tpu.memory_space<vmem>>, vector<1x4x4xf32>
    %362 = vector.shape_cast %361 : vector<1x4x4xf32> to vector<4x4xf32>
    %363 = vector.extract_strided_slice %243 {offsets = [0, 10], sizes = [4, 72], strides = [1, 1]} : vector<4x92xf32> to vector<4x72xf32>
    %cst_280 = arith.constant dense<0.000000e+00> : vector<4x72xf32>
    %364 = tpu.matmul %362, %363, %cst_280 {dimension_numbers = #tpu.dot_dimension_numbers<[1], [0], [0], [1], [0, 0, 1, 1], [], []>} : vector<4x4xf32>, vector<4x72xf32>, vector<4x72xf32> -> vector<4x72xf32>
    %365 = arith.addf %360, %364 : vector<4x72xf32>
    %c5_281 = arith.constant 5 : index
    %c0_282 = arith.constant 0 : index
    %c0_283 = arith.constant 0 : index
    %366 = vector.load %arg4[%c5_281, %c0_282, %c0_283] : memref<9x4x4xf32, #tpu.memory_space<vmem>>, vector<1x4x4xf32>
    %367 = vector.shape_cast %366 : vector<1x4x4xf32> to vector<4x4xf32>
    %368 = vector.extract_strided_slice %245 {offsets = [0, 10], sizes = [4, 72], strides = [1, 1]} : vector<4x92xf32> to vector<4x72xf32>
    %cst_284 = arith.constant dense<0.000000e+00> : vector<4x72xf32>
    %369 = tpu.matmul %367, %368, %cst_284 {dimension_numbers = #tpu.dot_dimension_numbers<[1], [0], [0], [1], [0, 0, 1, 1], [], []>} : vector<4x4xf32>, vector<4x72xf32>, vector<4x72xf32> -> vector<4x72xf32>
    %370 = arith.addf %365, %369 : vector<4x72xf32>
    %c6_285 = arith.constant 6 : index
    %c0_286 = arith.constant 0 : index
    %c0_287 = arith.constant 0 : index
    %371 = vector.load %arg4[%c6_285, %c0_286, %c0_287] : memref<9x4x4xf32, #tpu.memory_space<vmem>>, vector<1x4x4xf32>
    %372 = vector.shape_cast %371 : vector<1x4x4xf32> to vector<4x4xf32>
    %373 = vector.extract_strided_slice %241 {offsets = [0, 18], sizes = [4, 72], strides = [1, 1]} : vector<4x92xf32> to vector<4x72xf32>
    %cst_288 = arith.constant dense<0.000000e+00> : vector<4x72xf32>
    %374 = tpu.matmul %372, %373, %cst_288 {dimension_numbers = #tpu.dot_dimension_numbers<[1], [0], [0], [1], [0, 0, 1, 1], [], []>} : vector<4x4xf32>, vector<4x72xf32>, vector<4x72xf32> -> vector<4x72xf32>
    %375 = arith.addf %370, %374 : vector<4x72xf32>
    %c7_289 = arith.constant 7 : index
    %c0_290 = arith.constant 0 : index
    %c0_291 = arith.constant 0 : index
    %376 = vector.load %arg4[%c7_289, %c0_290, %c0_291] : memref<9x4x4xf32, #tpu.memory_space<vmem>>, vector<1x4x4xf32>
    %377 = vector.shape_cast %376 : vector<1x4x4xf32> to vector<4x4xf32>
    %378 = vector.extract_strided_slice %239 {offsets = [0, 19], sizes = [4, 72], strides = [1, 1]} : vector<4x92xf32> to vector<4x72xf32>
    %cst_292 = arith.constant dense<0.000000e+00> : vector<4x72xf32>
    %379 = tpu.matmul %377, %378, %cst_292 {dimension_numbers = #tpu.dot_dimension_numbers<[1], [0], [0], [1], [0, 0, 1, 1], [], []>} : vector<4x4xf32>, vector<4x72xf32>, vector<4x72xf32> -> vector<4x72xf32>
    %380 = arith.addf %375, %379 : vector<4x72xf32>
    %c8_293 = arith.constant 8 : index
    %c0_294 = arith.constant 0 : index
    %c0_295 = arith.constant 0 : index
    %381 = vector.load %arg4[%c8_293, %c0_294, %c0_295] : memref<9x4x4xf32, #tpu.memory_space<vmem>>, vector<1x4x4xf32>
    %382 = vector.shape_cast %381 : vector<1x4x4xf32> to vector<4x4xf32>
    %383 = vector.extract_strided_slice %241 {offsets = [0, 19], sizes = [4, 72], strides = [1, 1]} : vector<4x92xf32> to vector<4x72xf32>
    %cst_296 = arith.constant dense<0.000000e+00> : vector<4x72xf32>
    %384 = tpu.matmul %382, %383, %cst_296 {dimension_numbers = #tpu.dot_dimension_numbers<[1], [0], [0], [1], [0, 0, 1, 1], [], []>} : vector<4x4xf32>, vector<4x72xf32>, vector<4x72xf32> -> vector<4x72xf32>
    %385 = arith.addf %380, %384 : vector<4x72xf32>
    %386 = vector.broadcast %3 : vector<4x1xf32> to vector<4x72xf32>
    %387 = arith.addf %385, %386 : vector<4x72xf32>
    %388 = vector.broadcast %0 : vector<1x72xf32> to vector<4x72xf32>
    %389 = arith.mulf %387, %388 : vector<4x72xf32>
    %c0_297 = arith.constant 0 : index
    %c0_298 = arith.constant 0 : index
    %c0_299 = arith.constant 0 : index
    %390 = vector.load %arg4[%c0_297, %c0_298, %c0_299] : memref<9x4x4xf32, #tpu.memory_space<vmem>>, vector<1x4x4xf32>
    %391 = vector.shape_cast %390 : vector<1x4x4xf32> to vector<4x4xf32>
    %392 = vector.extract_strided_slice %239 {offsets = [0, 10], sizes = [4, 72], strides = [1, 1]} : vector<4x92xf32> to vector<4x72xf32>
    %cst_300 = arith.constant dense<0.000000e+00> : vector<4x72xf32>
    %393 = tpu.matmul %391, %392, %cst_300 {dimension_numbers = #tpu.dot_dimension_numbers<[1], [0], [0], [1], [0, 0, 1, 1], [], []>} : vector<4x4xf32>, vector<4x72xf32>, vector<4x72xf32> -> vector<4x72xf32>
    %c1_301 = arith.constant 1 : index
    %c0_302 = arith.constant 0 : index
    %c0_303 = arith.constant 0 : index
    %394 = vector.load %arg4[%c1_301, %c0_302, %c0_303] : memref<9x4x4xf32, #tpu.memory_space<vmem>>, vector<1x4x4xf32>
    %395 = vector.shape_cast %394 : vector<1x4x4xf32> to vector<4x4xf32>
    %396 = vector.extract_strided_slice %241 {offsets = [0, 10], sizes = [4, 72], strides = [1, 1]} : vector<4x92xf32> to vector<4x72xf32>
    %cst_304 = arith.constant dense<0.000000e+00> : vector<4x72xf32>
    %397 = tpu.matmul %395, %396, %cst_304 {dimension_numbers = #tpu.dot_dimension_numbers<[1], [0], [0], [1], [0, 0, 1, 1], [], []>} : vector<4x4xf32>, vector<4x72xf32>, vector<4x72xf32> -> vector<4x72xf32>
    %398 = arith.addf %393, %397 : vector<4x72xf32>
    %c2_305 = arith.constant 2 : index
    %c0_306 = arith.constant 0 : index
    %c0_307 = arith.constant 0 : index
    %399 = vector.load %arg4[%c2_305, %c0_306, %c0_307] : memref<9x4x4xf32, #tpu.memory_space<vmem>>, vector<1x4x4xf32>
    %400 = vector.shape_cast %399 : vector<1x4x4xf32> to vector<4x4xf32>
    %401 = vector.extract_strided_slice %239 {offsets = [0, 11], sizes = [4, 72], strides = [1, 1]} : vector<4x92xf32> to vector<4x72xf32>
    %cst_308 = arith.constant dense<0.000000e+00> : vector<4x72xf32>
    %402 = tpu.matmul %400, %401, %cst_308 {dimension_numbers = #tpu.dot_dimension_numbers<[1], [0], [0], [1], [0, 0, 1, 1], [], []>} : vector<4x4xf32>, vector<4x72xf32>, vector<4x72xf32> -> vector<4x72xf32>
    %403 = arith.addf %398, %402 : vector<4x72xf32>
    %c3_309 = arith.constant 3 : index
    %c0_310 = arith.constant 0 : index
    %c0_311 = arith.constant 0 : index
    %404 = vector.load %arg4[%c3_309, %c0_310, %c0_311] : memref<9x4x4xf32, #tpu.memory_space<vmem>>, vector<1x4x4xf32>
    %405 = vector.shape_cast %404 : vector<1x4x4xf32> to vector<4x4xf32>
    %406 = vector.extract_strided_slice %243 {offsets = [0, 10], sizes = [4, 72], strides = [1, 1]} : vector<4x92xf32> to vector<4x72xf32>
    %cst_312 = arith.constant dense<0.000000e+00> : vector<4x72xf32>
    %407 = tpu.matmul %405, %406, %cst_312 {dimension_numbers = #tpu.dot_dimension_numbers<[1], [0], [0], [1], [0, 0, 1, 1], [], []>} : vector<4x4xf32>, vector<4x72xf32>, vector<4x72xf32> -> vector<4x72xf32>
    %408 = arith.addf %403, %407 : vector<4x72xf32>
    %c4_313 = arith.constant 4 : index
    %c0_314 = arith.constant 0 : index
    %c0_315 = arith.constant 0 : index
    %409 = vector.load %arg4[%c4_313, %c0_314, %c0_315] : memref<9x4x4xf32, #tpu.memory_space<vmem>>, vector<1x4x4xf32>
    %410 = vector.shape_cast %409 : vector<1x4x4xf32> to vector<4x4xf32>
    %411 = vector.extract_strided_slice %245 {offsets = [0, 10], sizes = [4, 72], strides = [1, 1]} : vector<4x92xf32> to vector<4x72xf32>
    %cst_316 = arith.constant dense<0.000000e+00> : vector<4x72xf32>
    %412 = tpu.matmul %410, %411, %cst_316 {dimension_numbers = #tpu.dot_dimension_numbers<[1], [0], [0], [1], [0, 0, 1, 1], [], []>} : vector<4x4xf32>, vector<4x72xf32>, vector<4x72xf32> -> vector<4x72xf32>
    %413 = arith.addf %408, %412 : vector<4x72xf32>
    %c5_317 = arith.constant 5 : index
    %c0_318 = arith.constant 0 : index
    %c0_319 = arith.constant 0 : index
    %414 = vector.load %arg4[%c5_317, %c0_318, %c0_319] : memref<9x4x4xf32, #tpu.memory_space<vmem>>, vector<1x4x4xf32>
    %415 = vector.shape_cast %414 : vector<1x4x4xf32> to vector<4x4xf32>
    %416 = vector.extract_strided_slice %243 {offsets = [0, 11], sizes = [4, 72], strides = [1, 1]} : vector<4x92xf32> to vector<4x72xf32>
    %cst_320 = arith.constant dense<0.000000e+00> : vector<4x72xf32>
    %417 = tpu.matmul %415, %416, %cst_320 {dimension_numbers = #tpu.dot_dimension_numbers<[1], [0], [0], [1], [0, 0, 1, 1], [], []>} : vector<4x4xf32>, vector<4x72xf32>, vector<4x72xf32> -> vector<4x72xf32>
    %418 = arith.addf %413, %417 : vector<4x72xf32>
    %c6_321 = arith.constant 6 : index
    %c0_322 = arith.constant 0 : index
    %c0_323 = arith.constant 0 : index
    %419 = vector.load %arg4[%c6_321, %c0_322, %c0_323] : memref<9x4x4xf32, #tpu.memory_space<vmem>>, vector<1x4x4xf32>
    %420 = vector.shape_cast %419 : vector<1x4x4xf32> to vector<4x4xf32>
    %421 = vector.extract_strided_slice %239 {offsets = [0, 19], sizes = [4, 72], strides = [1, 1]} : vector<4x92xf32> to vector<4x72xf32>
    %cst_324 = arith.constant dense<0.000000e+00> : vector<4x72xf32>
    %422 = tpu.matmul %420, %421, %cst_324 {dimension_numbers = #tpu.dot_dimension_numbers<[1], [0], [0], [1], [0, 0, 1, 1], [], []>} : vector<4x4xf32>, vector<4x72xf32>, vector<4x72xf32> -> vector<4x72xf32>
    %423 = arith.addf %418, %422 : vector<4x72xf32>
    %c7_325 = arith.constant 7 : index
    %c0_326 = arith.constant 0 : index
    %c0_327 = arith.constant 0 : index
    %424 = vector.load %arg4[%c7_325, %c0_326, %c0_327] : memref<9x4x4xf32, #tpu.memory_space<vmem>>, vector<1x4x4xf32>
    %425 = vector.shape_cast %424 : vector<1x4x4xf32> to vector<4x4xf32>
    %426 = vector.extract_strided_slice %241 {offsets = [0, 19], sizes = [4, 72], strides = [1, 1]} : vector<4x92xf32> to vector<4x72xf32>
    %cst_328 = arith.constant dense<0.000000e+00> : vector<4x72xf32>
    %427 = tpu.matmul %425, %426, %cst_328 {dimension_numbers = #tpu.dot_dimension_numbers<[1], [0], [0], [1], [0, 0, 1, 1], [], []>} : vector<4x4xf32>, vector<4x72xf32>, vector<4x72xf32> -> vector<4x72xf32>
    %428 = arith.addf %423, %427 : vector<4x72xf32>
    %c8_329 = arith.constant 8 : index
    %c0_330 = arith.constant 0 : index
    %c0_331 = arith.constant 0 : index
    %429 = vector.load %arg4[%c8_329, %c0_330, %c0_331] : memref<9x4x4xf32, #tpu.memory_space<vmem>>, vector<1x4x4xf32>
    %430 = vector.shape_cast %429 : vector<1x4x4xf32> to vector<4x4xf32>
    %431 = vector.extract_strided_slice %239 {offsets = [0, 20], sizes = [4, 72], strides = [1, 1]} : vector<4x92xf32> to vector<4x72xf32>
    %cst_332 = arith.constant dense<0.000000e+00> : vector<4x72xf32>
    %432 = tpu.matmul %430, %431, %cst_332 {dimension_numbers = #tpu.dot_dimension_numbers<[1], [0], [0], [1], [0, 0, 1, 1], [], []>} : vector<4x4xf32>, vector<4x72xf32>, vector<4x72xf32> -> vector<4x72xf32>
    %433 = arith.addf %428, %432 : vector<4x72xf32>
    %434 = vector.broadcast %3 : vector<4x1xf32> to vector<4x72xf32>
    %435 = arith.addf %433, %434 : vector<4x72xf32>
    %436 = vector.broadcast %0 : vector<1x72xf32> to vector<4x72xf32>
    %437 = arith.mulf %435, %436 : vector<4x72xf32>
    %c0_333 = arith.constant 0 : index
    %c0_334 = arith.constant 0 : index
    %438 = vector.load %arg5[%c0_333, %c0_334] : memref<12x4xf32, #tpu.memory_space<vmem>>, vector<12x4xf32>
    %cst_335 = arith.constant dense<0.000000e+00> : vector<12x72xf32>
    %439 = tpu.matmul %438, %293, %cst_335 {dimension_numbers = #tpu.dot_dimension_numbers<[1], [0], [0], [1], [0, 0, 1, 1], [], []>} : vector<12x4xf32>, vector<4x72xf32>, vector<12x72xf32> -> vector<12x72xf32>
    %cst_336 = arith.constant dense<0.000000e+00> : vector<12x72xf32>
    %440 = tpu.matmul %438, %341, %cst_336 {dimension_numbers = #tpu.dot_dimension_numbers<[1], [0], [0], [1], [0, 0, 1, 1], [], []>} : vector<12x4xf32>, vector<4x72xf32>, vector<12x72xf32> -> vector<12x72xf32>
    %cst_337 = arith.constant dense<0.000000e+00> : vector<12x72xf32>
    %441 = tpu.matmul %438, %389, %cst_337 {dimension_numbers = #tpu.dot_dimension_numbers<[1], [0], [0], [1], [0, 0, 1, 1], [], []>} : vector<12x4xf32>, vector<4x72xf32>, vector<12x72xf32> -> vector<12x72xf32>
    %cst_338 = arith.constant dense<0.000000e+00> : vector<12x72xf32>
    %442 = tpu.matmul %438, %437, %cst_338 {dimension_numbers = #tpu.dot_dimension_numbers<[1], [0], [0], [1], [0, 0, 1, 1], [], []>} : vector<12x4xf32>, vector<4x72xf32>, vector<12x72xf32> -> vector<12x72xf32>
    %443 = vector.extract_strided_slice %439 {offsets = [0, 0], sizes = [8, 72], strides = [1, 1]} : vector<12x72xf32> to vector<8x72xf32>
    %444 = vector.extract_strided_slice %440 {offsets = [0, 0], sizes = [8, 72], strides = [1, 1]} : vector<12x72xf32> to vector<8x72xf32>
    %445 = vector.extract_strided_slice %441 {offsets = [0, 0], sizes = [8, 72], strides = [1, 1]} : vector<12x72xf32> to vector<8x72xf32>
    %446 = vector.extract_strided_slice %442 {offsets = [0, 0], sizes = [8, 72], strides = [1, 1]} : vector<12x72xf32> to vector<8x72xf32>
    %447 = arith.maximumf %443, %444 : vector<8x72xf32>
    %448 = arith.maximumf %445, %446 : vector<8x72xf32>
    %449 = arith.maximumf %447, %448 : vector<8x72xf32>
    %450 = arith.addf %443, %444 : vector<8x72xf32>
    %451 = arith.addf %450, %445 : vector<8x72xf32>
    %452 = arith.addf %451, %446 : vector<8x72xf32>
    %cst_339 = arith.constant 2.500000e-01 : f32
    %453 = vector.broadcast %cst_339 : f32 to vector<8x72xf32>
    %454 = arith.mulf %452, %453 : vector<8x72xf32>
    %455 = arith.addf %449, %454 : vector<8x72xf32>
    %456 = vector.extract_strided_slice %455 {offsets = [0, 0], sizes = [4, 72], strides = [1, 1]} : vector<8x72xf32> to vector<4x72xf32>
    %457 = vector.extract_strided_slice %455 {offsets = [4, 0], sizes = [4, 72], strides = [1, 1]} : vector<8x72xf32> to vector<4x72xf32>
    %cst_340 = arith.constant dense<0.000000e+00> : vector<4x4xf32>
    %458 = tpu.matmul %456, %457, %cst_340 {dimension_numbers = #tpu.dot_dimension_numbers<[1], [1], [0], [0], [0, 0, 1, 0], [], []>} : vector<4x72xf32>, vector<4x72xf32>, vector<4x4xf32> -> vector<4x4xf32>
    %cst_341 = arith.constant dense<0xFF800000> : vector<4xf32>
    %459 = vector.multi_reduction <maximumf>, %458, %cst_341 [1] : vector<4x4xf32> to vector<4xf32>
    %460 = vector.shape_cast %459 : vector<4xf32> to vector<4x1xf32>
    %461 = vector.broadcast %460 : vector<4x1xf32> to vector<4x4xf32>
    %462 = arith.subf %458, %461 : vector<4x4xf32>
    %463 = math.exp %462 : vector<4x4xf32>
    %cst_342 = arith.constant dense<0.000000e+00> : vector<4xf32>
    %464 = vector.multi_reduction <add>, %463, %cst_342 [1] : vector<4x4xf32> to vector<4xf32>
    %465 = vector.shape_cast %464 : vector<4xf32> to vector<4x1xf32>
    %466 = tpu.reciprocal %465 {approx = true} : vector<4x1xf32> -> vector<4x1xf32>
    %467 = vector.broadcast %466 : vector<4x1xf32> to vector<4x4xf32>
    %468 = arith.mulf %463, %467 : vector<4x4xf32>
    %469 = vector.extract_strided_slice %439 {offsets = [8, 0], sizes = [4, 72], strides = [1, 1]} : vector<12x72xf32> to vector<4x72xf32>
    %cst_343 = arith.constant dense<0.000000e+00> : vector<4x72xf32>
    %470 = tpu.matmul %468, %469, %cst_343 {dimension_numbers = #tpu.dot_dimension_numbers<[1], [0], [0], [1], [0, 0, 1, 1], [], []>} : vector<4x4xf32>, vector<4x72xf32>, vector<4x72xf32> -> vector<4x72xf32>
    %c0_344 = arith.constant 0 : index
    %c0_345 = arith.constant 0 : index
    %c0_346 = arith.constant 0 : index
    %c0_347 = arith.constant 0 : index
    %471 = vector.load %arg2[%c0_344, %c0_345, %c0_346, %c0_347] : memref<1x4x4x72xf32, #tpu.memory_space<vmem>>, vector<1x1x4x72xf32>
    %472 = vector.shape_cast %471 : vector<1x1x4x72xf32> to vector<4x72xf32>
    %473 = arith.addf %470, %293 : vector<4x72xf32>
    %474 = arith.addf %473, %472 : vector<4x72xf32>
    %c0_348 = arith.constant 0 : index
    %c0_349 = arith.constant 0 : index
    %c0_350 = arith.constant 0 : index
    %c0_351 = arith.constant 0 : index
    %475 = vector.load %arg10[%c0_348, %c0_349, %c0_350, %c0_351] : memref<1x4x4x72xf32, #tpu.memory_space<vmem>>, vector<1x1x4x72xf32>
    %476 = vector.shape_cast %475 : vector<1x1x4x72xf32> to vector<4x72xf32>
    %477 = vector.shape_cast %474 : vector<4x72xf32> to vector<1x1x4x72xf32>
    tpu.vector_store %arg10[%c0_348, %c0_349, %c0_350, %c0_351], %477 {strides = array<i32>} : memref<1x4x4x72xf32, #tpu.memory_space<vmem>>, vector<1x1x4x72xf32>,
    %478 = vector.extract_strided_slice %440 {offsets = [8, 0], sizes = [4, 72], strides = [1, 1]} : vector<12x72xf32> to vector<4x72xf32>
    %cst_352 = arith.constant dense<0.000000e+00> : vector<4x72xf32>
    %479 = tpu.matmul %468, %478, %cst_352 {dimension_numbers = #tpu.dot_dimension_numbers<[1], [0], [0], [1], [0, 0, 1, 1], [], []>} : vector<4x4xf32>, vector<4x72xf32>, vector<4x72xf32> -> vector<4x72xf32>
    %c0_353 = arith.constant 0 : index
    %c1_354 = arith.constant 1 : index
    %c0_355 = arith.constant 0 : index
    %c0_356 = arith.constant 0 : index
    %480 = vector.load %arg2[%c0_353, %c1_354, %c0_355, %c0_356] : memref<1x4x4x72xf32, #tpu.memory_space<vmem>>, vector<1x1x4x72xf32>
    %481 = vector.shape_cast %480 : vector<1x1x4x72xf32> to vector<4x72xf32>
    %482 = arith.addf %479, %341 : vector<4x72xf32>
    %483 = arith.addf %482, %481 : vector<4x72xf32>
    %c0_357 = arith.constant 0 : index
    %c1_358 = arith.constant 1 : index
    %c0_359 = arith.constant 0 : index
    %c0_360 = arith.constant 0 : index
    %484 = vector.load %arg10[%c0_357, %c1_358, %c0_359, %c0_360] : memref<1x4x4x72xf32, #tpu.memory_space<vmem>>, vector<1x1x4x72xf32>
    %485 = vector.shape_cast %484 : vector<1x1x4x72xf32> to vector<4x72xf32>
    %486 = vector.shape_cast %483 : vector<4x72xf32> to vector<1x1x4x72xf32>
    tpu.vector_store %arg10[%c0_357, %c1_358, %c0_359, %c0_360], %486 {strides = array<i32>} : memref<1x4x4x72xf32, #tpu.memory_space<vmem>>, vector<1x1x4x72xf32>,
    %487 = vector.extract_strided_slice %441 {offsets = [8, 0], sizes = [4, 72], strides = [1, 1]} : vector<12x72xf32> to vector<4x72xf32>
    %cst_361 = arith.constant dense<0.000000e+00> : vector<4x72xf32>
    %488 = tpu.matmul %468, %487, %cst_361 {dimension_numbers = #tpu.dot_dimension_numbers<[1], [0], [0], [1], [0, 0, 1, 1], [], []>} : vector<4x4xf32>, vector<4x72xf32>, vector<4x72xf32> -> vector<4x72xf32>
    %c0_362 = arith.constant 0 : index
    %c2_363 = arith.constant 2 : index
    %c0_364 = arith.constant 0 : index
    %c0_365 = arith.constant 0 : index
    %489 = vector.load %arg2[%c0_362, %c2_363, %c0_364, %c0_365] : memref<1x4x4x72xf32, #tpu.memory_space<vmem>>, vector<1x1x4x72xf32>
    %490 = vector.shape_cast %489 : vector<1x1x4x72xf32> to vector<4x72xf32>
    %491 = arith.addf %488, %389 : vector<4x72xf32>
    %492 = arith.addf %491, %490 : vector<4x72xf32>
    %c0_366 = arith.constant 0 : index
    %c2_367 = arith.constant 2 : index
    %c0_368 = arith.constant 0 : index
    %c0_369 = arith.constant 0 : index
    %493 = vector.load %arg10[%c0_366, %c2_367, %c0_368, %c0_369] : memref<1x4x4x72xf32, #tpu.memory_space<vmem>>, vector<1x1x4x72xf32>
    %494 = vector.shape_cast %493 : vector<1x1x4x72xf32> to vector<4x72xf32>
    %495 = vector.shape_cast %492 : vector<4x72xf32> to vector<1x1x4x72xf32>
    tpu.vector_store %arg10[%c0_366, %c2_367, %c0_368, %c0_369], %495 {strides = array<i32>} : memref<1x4x4x72xf32, #tpu.memory_space<vmem>>, vector<1x1x4x72xf32>,
    %496 = vector.extract_strided_slice %442 {offsets = [8, 0], sizes = [4, 72], strides = [1, 1]} : vector<12x72xf32> to vector<4x72xf32>
    %cst_370 = arith.constant dense<0.000000e+00> : vector<4x72xf32>
    %497 = tpu.matmul %468, %496, %cst_370 {dimension_numbers = #tpu.dot_dimension_numbers<[1], [0], [0], [1], [0, 0, 1, 1], [], []>} : vector<4x4xf32>, vector<4x72xf32>, vector<4x72xf32> -> vector<4x72xf32>
    %c0_371 = arith.constant 0 : index
    %c3_372 = arith.constant 3 : index
    %c0_373 = arith.constant 0 : index
    %c0_374 = arith.constant 0 : index
    %498 = vector.load %arg2[%c0_371, %c3_372, %c0_373, %c0_374] : memref<1x4x4x72xf32, #tpu.memory_space<vmem>>, vector<1x1x4x72xf32>
    %499 = vector.shape_cast %498 : vector<1x1x4x72xf32> to vector<4x72xf32>
    %500 = arith.addf %497, %437 : vector<4x72xf32>
    %501 = arith.addf %500, %499 : vector<4x72xf32>
    %c0_375 = arith.constant 0 : index
    %c3_376 = arith.constant 3 : index
    %c0_377 = arith.constant 0 : index
    %c0_378 = arith.constant 0 : index
    %502 = vector.load %arg10[%c0_375, %c3_376, %c0_377, %c0_378] : memref<1x4x4x72xf32, #tpu.memory_space<vmem>>, vector<1x1x4x72xf32>
    %503 = vector.shape_cast %502 : vector<1x1x4x72xf32> to vector<4x72xf32>
    %504 = vector.shape_cast %501 : vector<4x72xf32> to vector<1x1x4x72xf32>
    tpu.vector_store %arg10[%c0_375, %c3_376, %c0_377, %c0_378], %504 {strides = array<i32>} : memref<1x4x4x72xf32, #tpu.memory_space<vmem>>, vector<1x1x4x72xf32>,
    return
  }
  func.func @transform_0(%arg0: i32) -> (i32, i32, i32, i32) {
    %c0_i32 = arith.constant 0 : i32
    %c0_i32_0 = arith.constant 0 : i32
    %c0_i32_1 = arith.constant 0 : i32
    %c0_i32_2 = arith.constant 0 : i32
    return %arg0, %c0_i32, %c0_i32_0, %c0_i32_1 : i32, i32, i32, i32
  }
  func.func @transform_1(%arg0: i32) -> (i32, i32, i32, i32) {
    %c0_i32 = arith.constant 0 : i32
    %c0_i32_0 = arith.constant 0 : i32
    %c0_i32_1 = arith.constant 0 : i32
    %c0_i32_2 = arith.constant 0 : i32
    return %arg0, %c0_i32, %c0_i32_0, %c0_i32_1 : i32, i32, i32, i32
  }
  func.func @transform_2(%arg0: i32) -> (i32, i32, i32) {
    %c0_i32 = arith.constant 0 : i32
    %c0_i32_0 = arith.constant 0 : i32
    %c0_i32_1 = arith.constant 0 : i32
    %c0_i32_2 = arith.constant 0 : i32
    return %c0_i32, %c0_i32_0, %c0_i32_1 : i32, i32, i32
  }
  func.func @transform_3(%arg0: i32) -> (i32, i32, i32) {
    %c0_i32 = arith.constant 0 : i32
    %c0_i32_0 = arith.constant 0 : i32
    %c0_i32_1 = arith.constant 0 : i32
    %c0_i32_2 = arith.constant 0 : i32
    return %c0_i32, %c0_i32_0, %c0_i32_1 : i32, i32, i32
  }
  func.func @transform_4(%arg0: i32) -> (i32, i32) {
    %c0_i32 = arith.constant 0 : i32
    %c0_i32_0 = arith.constant 0 : i32
    %c0_i32_1 = arith.constant 0 : i32
    return %c0_i32, %c0_i32_0 : i32, i32
  }
  func.func @transform_5(%arg0: i32) -> (i32, i32) {
    %c0_i32 = arith.constant 0 : i32
    %c0_i32_0 = arith.constant 0 : i32
    %c0_i32_1 = arith.constant 0 : i32
    return %c0_i32, %c0_i32_0 : i32, i32
  }
  func.func @transform_6(%arg0: i32) -> (i32, i32) {
    %c0_i32 = arith.constant 0 : i32
    %c0_i32_0 = arith.constant 0 : i32
    %c0_i32_1 = arith.constant 0 : i32
    return %c0_i32, %c0_i32_0 : i32, i32
  }
  func.func @transform_7(%arg0: i32) -> (i32, i32) {
    %c0_i32 = arith.constant 0 : i32
    %c0_i32_0 = arith.constant 0 : i32
    %c0_i32_1 = arith.constant 0 : i32
    return %c0_i32, %c0_i32_0 : i32, i32
  }
  func.func @transform_8(%arg0: i32) -> (i32, i32) {
    %c0_i32 = arith.constant 0 : i32
    %c0_i32_0 = arith.constant 0 : i32
    %c0_i32_1 = arith.constant 0 : i32
    return %c0_i32, %c0_i32_0 : i32, i32
  }
  func.func @transform_9(%arg0: i32) -> (i32, i32, i32, i32) {
    %c0_i32 = arith.constant 0 : i32
    %c0_i32_0 = arith.constant 0 : i32
    %c0_i32_1 = arith.constant 0 : i32
    %c0_i32_2 = arith.constant 0 : i32
    return %arg0, %c0_i32, %c0_i32_0, %c0_i32_1 : i32, i32, i32, i32
  }
}

</mosaic_0001>

<bundles_post_ra>
// kernel: bottleneck_ir_sca_forward.1
= control target key start
LH: loop header
LB: loop body
LE: loop exit
PB: predicated region body
PF: predicated region fallthrough
CT: control target
= control target key end

     0   :  { %s7569_s30 = smov 0   ;;  %s8381_s0 = inlined_call_operand.vmem [shape: f32[2,4,4,92], index: 0, kind: input, shape index: {}]   ;;  %s8382_s1 = inlined_call_operand.vmem [shape: f32[2,4,4,72], index: 1, kind: input, shape index: {}]   ;;  %s8383_s2 = inlined_call_operand.vmem [shape: f32[9,4,4], index: 2, kind: input, shape index: {}]   ;;  %s8384_s3 = inlined_call_operand.vmem [shape: f32[9,4,4], index: 3, kind: input, shape index: {}]   ;;  %s8385_s4 = inlined_call_operand.vmem [shape: f32[12,4], index: 4, kind: input, shape index: {}]   ;;  %s8386_s5 = inlined_call_operand.vmem [shape: f32[4,1], index: 5, kind: input, shape index: {}]   ;;  %s8387_s6 = inlined_call_operand.vmem [shape: f32[4,1], index: 6, kind: input, shape index: {}]   ;;  %s8388_s7 = inlined_call_operand.vmem [shape: f32[4,1], index: 7, kind: input, shape index: {}]   ;;  %s8389_s8 = inlined_call_operand.vmem [shape: f32[1,72], index: 8, kind: input, shape index: {}]   ;;  %s8390_s9 = inlined_call_operand.vmem [shape: f32[2,4,4,72], index: 9, kind: output, shape index: {}]  }
   0x1 LB: > { %s6670_s10 = sadd.s32 4294967295, %s7505_s30   ;;  %p6674_p0 = scmp.ge.s32.totalorder %s7505_s30, 1  ;;  %s7505_s30 = sphi %s7569_s30, %s19_s30  }
   0x2   : > { %p297_p1 = scmp.lt.s32.totalorder %s7505_s30, 3 }
   0x4   : > { %p298_p2 = pnand %p6674_p0, %p297_p1 }
   0x5   : > { %p338_p3 = scmp.lt.s32.totalorder (!%p298_p2), %s6670_s10, 1  ;;  %v7507_v0 = vmov (!%p298_p2), 0.0   ;;  %vm7508_vm0 = vmmov (!%p298_p2), 0   ;;  %vm379_vm1 = vcmask (!%p298_p2), 1043456   ;;  %vm375_vm2 = vcmask (!%p298_p2), 31744   ;;  %s7509_s17 = smov (!%p298_p2), 127  }
   0x6   : > { %301 = sbr.rel (%p298_p2) target bundleno = 1921 (0x781), region = 56  ;;  %7068 = vmatprep.subr.mxu0 (!%p298_p2), %v7507_v0  ;;  %7073 = vmatprep.subr.mxu1 (!%p298_p2), %v7507_v0  ;;  %v369_v3 = vld [vmem:[%s8383_s2] sm:$0xf] (!%p298_p2)  ;;  %s7510_s18 = smov (!%p298_p2), 119   ;;  %v7517_v8 = vmov (!%p298_p2), 0   ;;  %vm357_vm3 = vcmask (!%p298_p2), 748544  }
   0x7   : > { %7070 = vmatprep.mubr.msk.f32.mxu0 (!%p298_p2), %vm7508_vm0, %v7507_v0  ;;  %7075 = vmatprep.mubr.msk.f32.mxu1 (!%p298_p2), %vm7508_vm0, %v7507_v0  ;;  %s7511_s19 = smov (!%p298_p2), 118   ;;  %s7512_s20 = smov (!%p298_p2), 126   ;;  %v354_v6 = vld [vmem:[%s8386_s5] sm:$0xf] (!%p298_p2)  ;;  %v6684_v9 = vld [vmem:[%s8383_s2 + $0x4] sm:$0xf] (!%p298_p2) }
   0x8   : > { %s7513_s21 = smov (!%p298_p2), 117   ;;  %s7514_s22 = smov (!%p298_p2), 110   ;;  %v355_v7 = vld [vmem:[%s8387_s6] sm:$0xf] (!%p298_p2)  ;;  %7493 = vset.pattern.permute.xlu1 (!%p298_p2), %v7517_v8  ;;  %7494 = vset.pattern.permute.xlu0 (!%p298_p2), %v7517_v8  ;;  %v6692_v12 = vld [vmem:[%s8383_s2 + $0xc] sm:$0xf] (!%p298_p2) }
   0x9   : > { %s7515_s23 = smov (!%p298_p2), 109   ;;  %s7516_s24 = smov (!%p298_p2), 108   ;;  %v6689_v13 = vld [vmem:[%s8383_s2 + $0x8] sm:$0xf] (!%p298_p2)  ;;  %v6695_v16 = vld [vmem:[%s8383_s2 + $0x10] sm:$0xf] (!%p298_p2) }
   0xa   : > { %v6698_v17 = vld [vmem:[%s8383_s2 + $0x14] sm:$0xf] (!%p298_p2)  ;;  %v6701_v20 = vld [vmem:[%s8383_s2 + $0x18] sm:$0xf] (!%p298_p2)  ;;  %v6704_v21 = vld [vmem:[%s8383_s2 + $0x1c] sm:$0xf] (!%p298_p2) }
   0xb   : > { %v6707_v24 = vld [vmem:[%s8383_s2 + $0x20] sm:$0xf] (!%p298_p2)  ;;  %v6711_v25 = vld [vmem:[%s8383_s2 + $0x4] sm:$0xf] (!%p298_p2)  ;;  %v6716_v28 = vld [vmem:[%s8383_s2 + $0x8] sm:$0xf] (!%p298_p2) }
   0xc   : > { %v1117_v27 = vld [vmem:[%s8383_s2] sm:$0xf] (!%p298_p2)  ;;  %v6719_v29 = vld [vmem:[%s8383_s2 + $0xc] sm:$0xf] (!%p298_p2)  ;;  %v6722_v30 = vld [vmem:[%s8383_s2 + $0x10] sm:$0xf] (!%p298_p2) }
   0xd   : > { %s8392_s10 = smov (!%p338_p3, %s6670_s10), 1  ;;  %v6725_v32 = vld [vmem:[%s8383_s2 + $0x14] sm:$0xf]  ;;  %v6728_v33 = vld [vmem:[%s8383_s2 + $0x18] sm:$0xf]  ;;  %s7518_s16 = smov 10  }
   0xe   : > { %s7583_s11 = sshll.u32 %s8392_s10, 4  ;;  %v6731_v35 = vld [vmem:[%s8383_s2 + $0x1c] sm:$0xf]  ;;  %v6734_v36 = vld [vmem:[%s8383_s2 + $0x20] sm:$0xf]  ;;  %vm1115_vm8 = vcmask 666704  }
   0xf   : > { %s342_s14 = scalar_lea.vmem %s8381_s0, %s7583_s11  ;;  %v6737_v37 = vld [vmem:[%s8383_s2 + $0x4] sm:$0xf]  ;;  %v1813_v38 = vld [vmem:[%s8383_s2] sm:$0xf]  ;;  %v6742_v39 = vld [vmem:[%s8383_s2 + $0x8] sm:$0xf] }
  0x10   : > { %v6682_v1 = vld [vmem:[%s342_s14 + $0x8] sm:$0xf]  ;;  %v6681_v2 = vld [vmem:[%s342_s14 + $0x4] sm:$0xf]  ;;  %v6683_v4 = vld [vmem:[%s342_s14 + $0xc] sm:$0xf] }
  0x11   : > { %373 = vrot.lane.b32.xlu0 %v6682_v1, %s7509_s17  ;;  %611 = vrot.lane.b32.xlu1 %v6681_v2, %s7510_s18  ;;  %v362_v5 = vld [vmem:[%s342_s14] sm:$0xf]  ;;  %v6745_v40 = vld [vmem:[%s8383_s2 + $0xc] sm:$0xf]  ;;  %359 = vst.msk [vmem:[#allocation2 + $0x4] sm:$0xf] %vm357_vm3, %v7507_v0 }
  0x12   : > { %7074 = vmatpush3.msk.msra.mxu1 %vm379_vm1, %v6683_v4  ;;  %v6748_v42 = vld [vmem:[%s8383_s2 + $0x10] sm:$0xf]  ;;  %v6751_v43 = vld [vmem:[%s8383_s2 + $0x14] sm:$0xf]  ;;  %v6754_v45 = vld [vmem:[%s8383_s2 + $0x18] sm:$0xf] }
  0x13   : > { %7076 = vmatmul.mubr.msk.f32.vlgmr.msra.gmra.mrb[0].mxu1 %vm375_vm2, %v369_v3  ;;  %7083 = vmatprep.subr.mxu1 %v7507_v0  ;;  %v6757_v46 = vld [vmem:[%s8383_s2 + $0x1c] sm:$0xf]  ;;  %v6760_v48 = vld [vmem:[%s8383_s2 + $0x20] sm:$0xf]  ;;  %v6763_v49 = vld [vmem:[%s8383_s2 + $0x4] sm:$0xf] }
  0x14   : > { %7085 = vmatprep.mubr.msk.f32.mxu1 %vm7508_vm0, %v7507_v0  ;;  %v2509_v50 = vld [vmem:[%s8383_s2] sm:$0xf]  ;;  %v6768_v51 = vld [vmem:[%s8383_s2 + $0x8] sm:$0xf]  ;;  %v6771_v52 = vld [vmem:[%s8383_s2 + $0xc] sm:$0xf] }
  0x15   : > { %530 = vrot.lane.b32.xlu0 %v6683_v4, %s7509_s17  ;;  %692 = vrot.lane.b32.xlu1 %v362_v5, %s7511_s19  ;;  %v6774_v53 = vld [vmem:[%s8383_s2 + $0x10] sm:$0xf]  ;;  %v6777_v54 = vld [vmem:[%s8383_s2 + $0x14] sm:$0xf]  ;;  %358 = vst.msk [vmem:[#allocation2] sm:$0xf] %vm357_vm3, %v7507_v0 }
  0x16   : > { %v6780_v55 = vld [vmem:[%s8383_s2 + $0x18] sm:$0xf]  ;;  %v6783_v57 = vld [vmem:[%s8383_s2 + $0x1c] sm:$0xf]  ;;  %v6786_v58 = vld [vmem:[%s8383_s2 + $0x20] sm:$0xf] }
  0x17   : > { %360 = vst.msk [vmem:[#allocation2 + $0x8] sm:$0xf] %vm357_vm3, %v7507_v0  ;;  %361 = vst.msk [vmem:[#allocation2 + $0xc] sm:$0xf] %vm357_vm3, %v7507_v0  ;;  %vm6202_vm9 = vcmask 588800   ;;  %vm6277_vm10 = vcmask 27648  }
  0x18   : > { %vm6367_vm11 = vcmask 584704  }
  0x19   : > { %772 = vrot.lane.b32.xlu0 %v6681_v2, %s7511_s19  ;;  %852 = vrot.lane.b32.xlu1 %v6683_v4, %s7510_s18 }
  0x1d   : > { %932 = vrot.lane.b32.xlu0 %v6682_v1, %s7511_s19  ;;  %1012 = vrot.lane.b32.xlu1 %v6683_v4, %s7511_s19 }
  0x21   : > { %1266 = vrot.lane.b32.xlu0 %v6682_v1, %s7512_s20  ;;  %1495 = vrot.lane.b32.xlu1 %v362_v5, %s7513_s21 }
  0x25   : > { %1724 = vrot.lane.b32.xlu0 %v6682_v1, %s7513_s21  ;;  %2262 = vrot.lane.b32.xlu1 %v6681_v2, %s7514_s22 }
  0x29   : > { %2341 = vrot.lane.b32.xlu0 %v362_v5, %s7515_s23  ;;  %2420 = vrot.lane.b32.xlu1 %v6681_v2, %s7515_s23 }
  0x2d   : > { %3108 = vrot.lane.b32.xlu0 %v362_v5, %s7516_s24  ;;  %1092 = vperm.xlu1 %7493, %v354_v6  }
  0x31   : > { %1099 = vperm.xlu0 %7494, %v355_v7  }
  0x83   : > { %v374_v10 = vpop.permute.xlu0 %373  ;;  %v7621_v11 = vpop.permute.xlu1 %611 }
  0x84   : > { %7069 = vmatpush3.msk.msra.mxu0 %vm379_vm1, %v374_v10  ;;  %7084 = vmatpush3.msk.msra.mxu1 %vm379_vm1, %v7621_v11 }
  0x85   : > { %7071 = vmatmul.mubr.msk.f32.vlgmr.msra.gmra.mrb[0].mxu0 %vm375_vm2, %v6684_v9  ;;  %7078 = vmatprep.subr.mxu0 %v7507_v0 }
  0x86   : > { %7080 = vmatprep.mubr.msk.f32.mxu0 %vm7508_vm0, %v7507_v0  ;;  %7086 = vmatmul.mubr.msk.f32.vlgmr.msra.gmra.mrb[2].mxu1 %vm375_vm2, %v6692_v12 }
  0x87   : > { %v531_v14 = vpop.permute.xlu0 %530  ;;  %v7637_v15 = vpop.permute.xlu1 %692  ;;  %7093 = vmatprep.subr.mxu1 %v7507_v0  ;;  %7095 = vmatprep.mubr.msk.f32.mxu1 %vm7508_vm0, %v7507_v0 }
  0x88   : > { %7079 = vmatpush3.msk.msra.mxu0 %vm379_vm1, %v531_v14 }
  0x89   : > { %7081 = vmatmul.mubr.msk.f32.vlgmr.msra.gmra.mrb[2].mxu0 %vm375_vm2, %v6689_v13  ;;  %7088 = vmatprep.subr.mxu0 %v7507_v0 }
  0x8a   : > { %7089 = vmatpush3.msk.msra.mxu0 %vm379_vm1, %v7637_v15  ;;  %7090 = vmatprep.mubr.msk.f32.mxu0 %vm7508_vm0, %v7507_v0 }
  0x8b   : > { %v7655_v18 = vpop.permute.xlu0 %772  ;;  %v7657_v19 = vpop.permute.xlu1 %852  ;;  %7098 = vmatprep.subr.mxu0 %v7507_v0 }
  0x8c   : > { %7094 = vmatpush3.msk.msra.mxu1 %vm379_vm1, %v7655_v18 }
  0x8d   : > { %7091 = vmatmul.mubr.msk.f32.vlgmr.msra.gmra.mrb[4].mxu0 %vm375_vm2, %v6695_v16  ;;  %7096 = vmatmul.mubr.msk.f32.vlgmr.msra.gmra.mrb[4].mxu1 %vm375_vm2, %v6698_v17 }
  0x8e   : > { %7103 = vmatprep.subr.mxu1 %v7507_v0  ;;  %7099 = vmatpush3.msk.msra.mxu0 %vm379_vm1, %v7657_v19 }
  0x8f   : > { %v7673_v22 = vpop.permute.xlu0 %932  ;;  %7100 = vmatprep.mubr.msk.f32.mxu0 %vm7508_vm0, %v7507_v0  ;;  %7105 = vmatprep.mubr.msk.f32.mxu1 %vm7508_vm0, %v7507_v0  ;;  %v7679_v23 = vpop.permute.xlu1 %1012 }
  0x90   : > { %7104 = vmatpush3.msk.msra.mxu1 %vm379_vm1, %v7673_v22  ;;  %7108 = vmatprep.subr.mxu0 %v7507_v0 }
  0x91   : > { %7101 = vmatmul.mubr.msk.f32.vlgmr.msra.gmra.mrb[6].mxu0 %vm375_vm2, %v6701_v20  ;;  %7106 = vmatmul.mubr.msk.f32.vlgmr.msra.gmra.mrb[6].mxu1 %vm375_vm2, %v6704_v21 }
  0x92   : > { %7113 = vmatprep.subr.mxu1 %v7507_v0  ;;  %7109 = vmatpush3.msk.msra.mxu0 %vm379_vm1, %v7679_v23 }
  0x93   : > { %7114 = vmatpush3.msk.msra.mxu1 %vm379_vm1, %v531_v14  ;;  %7110 = vmatprep.mubr.msk.f32.mxu0 %vm7508_vm0, %v7507_v0  ;;  %v1267_v26 = vpop.permute.xlu0 %1266  ;;  %v7732_v31 = vpop.permute.xlu1 %1495 }
  0x94   : > { %7115 = vmatprep.mubr.msk.f32.mxu1 %vm7508_vm0, %v7507_v0  ;;  %7118 = vmatprep.subr.mxu0 %v7507_v0 }
  0x95   : > { %7111 = vmatmul.mubr.msk.f32.vlgmr.msra.gmra.mrb[8].mxu0 %vm375_vm2, %v6707_v24  ;;  %7116 = vmatmul.mubr.msk.f32.vlgmr.msra.gmra.mrb[8].mxu1 %vm375_vm2, %v6711_v25 }
  0x96   : > { %7119 = vmatpush3.msk.msra.mxu0 %vm379_vm1, %v374_v10  ;;  %7123 = vmatprep.subr.mxu1 %v7507_v0 }
  0x97   : > { %7124 = vmatpush3.msk.msra.mxu1 %vm379_vm1, %v1267_v26  ;;  %7120 = vmatprep.mubr.msk.f32.mxu0 %vm7508_vm0, %v7507_v0  ;;  %v7755_v34 = vpop.permute.xlu0 %1724  ;;  %v2263_v41 = vpop.permute.xlu1 %2262 }
  0x98   : > { %7125 = vmatprep.mubr.msk.f32.mxu1 %vm7508_vm0, %v7507_v0  ;;  %7128 = vmatprep.subr.mxu0 %v7507_v0 }
  0x99   : > { %7133 = vmatprep.subr.mxu1 %v7507_v0  ;;  %7121 = vmatmul.mubr.msk.f32.vlgmr.msra.gmra.mrb[10].mxu0 %vm375_vm2, %v1117_v27 }
  0x9a   : > { %7126 = vmatmul.mubr.msk.f32.vlgmr.msra.gmra.mrb[10].mxu1 %vm375_vm2, %v6716_v28  ;;  %7129 = vmatpush3.msk.msra.mxu0 %vm379_vm1, %v7637_v15 }
  0x9b   : > { %7134 = vmatpush3.msk.msra.mxu1 %vm379_vm1, %v7655_v18  ;;  %7130 = vmatprep.mubr.msk.f32.mxu0 %vm7508_vm0, %v7507_v0  ;;  %v2342_v44 = vpop.permute.xlu0 %2341  ;;  %v2421_v47 = vpop.permute.xlu1 %2420 }
  0x9c   : > { %7135 = vmatprep.mubr.msk.f32.mxu1 %vm7508_vm0, %v7507_v0  ;;  %7143 = vmatprep.subr.mxu1 %v7507_v0 }
  0x9d   : > { %7131 = vmatmul.mubr.msk.f32.vlgmr.msra.gmra.mrb[12].mxu0 %vm375_vm2, %v6719_v29  ;;  %7138 = vmatprep.subr.mxu0 %v7507_v0 }
  0x9e   : > { %7136 = vmatmul.mubr.msk.f32.vlgmr.msra.gmra.mrb[12].mxu1 %vm375_vm2, %v6722_v30  ;;  %7139 = vmatpush3.msk.msra.mxu0 %vm379_vm1, %v7732_v31 }
  0x9f   : > { %7144 = vmatpush3.msk.msra.mxu1 %vm379_vm1, %v7673_v22  ;;  %7140 = vmatprep.mubr.msk.f32.mxu0 %vm7508_vm0, %v7507_v0  ;;  %v3109_v56 = vpop.permute.xlu0 %3108 }
  0xa0   : > { %7145 = vmatprep.mubr.msk.f32.mxu1 %vm7508_vm0, %v7507_v0  ;;  %7148 = vmatprep.subr.mxu0 %v7507_v0 }
  0xa1   : > { %7141 = vmatmul.mubr.msk.f32.vlgmr.msra.gmra.mrb[14].mxu0 %vm375_vm2, %v6725_v32  ;;  %7153 = vmatprep.subr.mxu1 %v7507_v0 }
  0xa2   : > { %7146 = vmatmul.mubr.msk.f32.vlgmr.msra.gmra.mrb[14].mxu1 %vm375_vm2, %v6728_v33  ;;  %7149 = vmatpush3.msk.msra.mxu0 %vm379_vm1, %v7679_v23 }
  0xa3   : > { %7154 = vmatpush3.msk.msra.mxu1 %vm379_vm1, %v7755_v34  ;;  %7150 = vmatprep.mubr.msk.f32.mxu0 %vm7508_vm0, %v7507_v0 }
  0xa4   : > { %7155 = vmatprep.mubr.msk.f32.mxu1 %vm7508_vm0, %v7507_v0  ;;  %7158 = vmatprep.subr.mxu0 %v7507_v0 }
  0xa5   : > { %7163 = vmatprep.subr.mxu1 %v7507_v0  ;;  %7151 = vmatmul.mubr.msk.f32.vlgmr.msra.gmra.mrb[16].mxu0 %vm375_vm2, %v6731_v35 }
  0xa6   : > { %7156 = vmatmul.mubr.msk.f32.vlgmr.msra.gmra.mrb[16].mxu1 %vm375_vm2, %v6734_v36  ;;  %7159 = vmatpush3.msk.msra.mxu0 %vm379_vm1, %v7637_v15 }
  0xa7   : > { %7164 = vmatpush3.msk.msra.mxu1 %vm379_vm1, %v7621_v11  ;;  %7160 = vmatprep.mubr.msk.f32.mxu0 %vm7508_vm0, %v7507_v0 }
  0xa8   : > { %7165 = vmatprep.mubr.msk.f32.mxu1 %vm7508_vm0, %v7507_v0  ;;  %7168 = vmatprep.subr.mxu0 %v7507_v0 }
  0xa9   : > { %7173 = vmatprep.subr.mxu1 %v7507_v0  ;;  %7161 = vmatmul.mubr.msk.f32.vlgmr.msra.gmra.mrb[18].mxu0 %vm375_vm2, %v6737_v37 }
  0xaa   : > { %7166 = vmatmul.mubr.msk.f32.vlgmr.msra.gmra.mrb[18].mxu1 %vm375_vm2, %v1813_v38  ;;  %7169 = vmatpush3.msk.msra.mxu0 %vm379_vm1, %v7655_v18 }
  0xab   : > { %7174 = vmatpush3.msk.msra.mxu1 %vm379_vm1, %v7657_v19  ;;  %7170 = vmatprep.mubr.msk.f32.mxu0 %vm7508_vm0, %v7507_v0 }
  0xac   : > { %7175 = vmatprep.mubr.msk.f32.mxu1 %vm7508_vm0, %v7507_v0  ;;  %7178 = vmatprep.subr.mxu0 %v7507_v0 }
  0xad   : > { %7183 = vmatprep.subr.mxu1 %v7507_v0  ;;  %7171 = vmatmul.mubr.msk.f32.vlgmr.msra.gmra.mrb[20].mxu0 %vm375_vm2, %v6742_v39 }
  0xae   : > { %7176 = vmatmul.mubr.msk.f32.vlgmr.msra.gmra.mrb[20].mxu1 %vm375_vm2, %v6745_v40  ;;  %7179 = vmatpush3.msk.msra.mxu0 %vm379_vm1, %v7673_v22 }
  0xaf   : > { %7184 = vmatpush3.msk.msra.mxu1 %vm379_vm1, %v7679_v23  ;;  %7180 = vmatprep.mubr.msk.f32.mxu0 %vm7508_vm0, %v7507_v0 }
  0xb0   : > { %7185 = vmatprep.mubr.msk.f32.mxu1 %vm7508_vm0, %v7507_v0  ;;  %7193 = vmatprep.subr.mxu1 %v7507_v0 }
  0xb1   : > { %7181 = vmatmul.mubr.msk.f32.vlgmr.msra.gmra.mrb[22].mxu0 %vm375_vm2, %v6748_v42  ;;  %7188 = vmatprep.subr.mxu0 %v7507_v0 }
  0xb2   : > { %7186 = vmatmul.mubr.msk.f32.vlgmr.msra.gmra.mrb[22].mxu1 %vm375_vm2, %v6751_v43  ;;  %7189 = vmatpush3.msk.msra.mxu0 %vm379_vm1, %v2263_v41 }
  0xb3   : > { %7194 = vmatpush3.msk.msra.mxu1 %vm379_vm1, %v2342_v44  ;;  %7190 = vmatprep.mubr.msk.f32.mxu0 %vm7508_vm0, %v7507_v0 }
  0xb4   : > { %7195 = vmatprep.mubr.msk.f32.mxu1 %vm7508_vm0, %v7507_v0  ;;  %7203 = vmatprep.subr.mxu1 %v7507_v0 }
  0xb5   : > { %7191 = vmatmul.mubr.msk.f32.vlgmr.msra.gmra.mrb[24].mxu0 %vm375_vm2, %v6754_v45  ;;  %7198 = vmatprep.subr.mxu0 %v7507_v0 }
  0xb6   : > { %7196 = vmatmul.mubr.msk.f32.vlgmr.msra.gmra.mrb[24].mxu1 %vm375_vm2, %v6757_v46  ;;  %7199 = vmatpush3.msk.msra.mxu0 %vm379_vm1, %v2421_v47 }
  0xb7   : > { %7204 = vmatpush3.msk.msra.mxu1 %vm379_vm1, %v7655_v18  ;;  %7200 = vmatprep.mubr.msk.f32.mxu0 %vm7508_vm0, %v7507_v0 }
  0xb8   : > { %7205 = vmatprep.mubr.msk.f32.mxu1 %vm7508_vm0, %v7507_v0  ;;  %7208 = vmatprep.subr.mxu0 %v7507_v0 }
  0xb9   : > { %7213 = vmatprep.subr.mxu1 %v7507_v0  ;;  %7201 = vmatmul.mubr.msk.f32.vlgmr.msra.gmra.mrb[26].mxu0 %vm375_vm2, %v6760_v48  ;;  %v7944_v48 = vpop.permute.xlu1 %1092 }
  0xba   : > { %7206 = vmatmul.mubr.msk.f32.vlgmr.msra.gmra.mrb[26].mxu1 %vm375_vm2, %v6763_v49  ;;  %7209 = vmatpush3.msk.msra.mxu0 %vm379_vm1, %v7637_v15 }
  0xbb   : > { %7214 = vmatpush3.msk.msra.mxu1 %vm379_vm1, %v7732_v31  ;;  %7210 = vmatprep.mubr.msk.f32.mxu0 %vm7508_vm0, %v7507_v0 }
  0xbc   : > { %7215 = vmatprep.mubr.msk.f32.mxu1 %vm7508_vm0, %v7507_v0  ;;  %7218 = vmatprep.subr.mxu0 %v7507_v0 }
  0xbd   : > { %7223 = vmatprep.subr.mxu1 %v7507_v0  ;;  %7211 = vmatmul.mubr.msk.f32.vlgmr.msra.gmra.mrb[28].mxu0 %vm375_vm2, %v2509_v50 }
  0xbe   : > { %7216 = vmatmul.mubr.msk.f32.vlgmr.msra.gmra.mrb[28].mxu1 %vm375_vm2, %v6768_v51  ;;  %7219 = vmatpush3.msk.msra.mxu0 %vm379_vm1, %v7673_v22 }
  0xbf   : > { %7224 = vmatpush3.msk.msra.mxu1 %vm379_vm1, %v7679_v23  ;;  %7220 = vmatprep.mubr.msk.f32.mxu0 %vm7508_vm0, %v7507_v0 }
  0xc0   : > { %7225 = vmatprep.mubr.msk.f32.mxu1 %vm7508_vm0, %v7507_v0  ;;  %7228 = vmatprep.subr.mxu0 %v7507_v0 }
  0xc1   : > { %7233 = vmatprep.subr.mxu1 %v7507_v0  ;;  %7221 = vmatmul.mubr.msk.f32.vlgmr.msra.gmra.mrb[30].mxu0 %vm375_vm2, %v6771_v52 }
  0xc2   : > { %7226 = vmatmul.mubr.msk.f32.vlgmr.msra.gmra.mrb[30].mxu1 %vm375_vm2, %v6774_v53  ;;  %7229 = vmatpush3.msk.msra.mxu0 %vm379_vm1, %v7755_v34  ;;  %v7947_v53 = vpop.permute.xlu0 %1099 }
  0xc3   : > { %7234 = vmatpush3.msk.msra.mxu1 %vm379_vm1, %v2342_v44  ;;  %7230 = vmatprep.mubr.msk.f32.mxu0 %vm7508_vm0, %v7507_v0 }
  0xc4   : > { %7238 = vmatprep.subr.mxu0 %v7507_v0  ;;  %7235 = vmatprep.mubr.msk.f32.mxu1 %vm7508_vm0, %v7507_v0 }
  0xc5   : > { %7231 = vmatmul.mubr.msk.f32.vlgmr.msra.gmra.mrb[32].mxu0 %vm375_vm2, %v6777_v54  ;;  %7243 = vmatprep.subr.mxu1 %v7507_v0 }
  0xc6   : > { %7239 = vmatpush3.msk.msra.mxu0 %vm379_vm1, %v2421_v47  ;;  %7236 = vmatmul.mubr.msk.f32.vlgmr.msra.gmra.mrb[32].mxu1 %vm375_vm2, %v6780_v55 }
  0xc7   : > { %7240 = vmatprep.mubr.msk.f32.mxu0 %vm7508_vm0, %v7507_v0  ;;  %7244 = vmatpush3.msk.msra.mxu1 %vm379_vm1, %v3109_v56 }
  0xc8   : > { %7245 = vmatprep.mubr.msk.f32.mxu1 %vm7508_vm0, %v7507_v0  ;;  %7253 = vmatprep.subr.mxu1 %v7507_v0 }
  0xc9   : > { %7241 = vmatmul.mubr.msk.f32.vlgmr.msra.gmra.mrb[34].mxu0 %vm375_vm2, %v6783_v57  ;;  %7248 = vmatprep.subr.mxu0 %v7507_v0 }
  0xca   : > { %7246 = vmatmul.mubr.msk.f32.vlgmr.msra.gmra.mrb[34].mxu1 %vm375_vm2, %v6786_v58  ;;  %7250 = vmatprep.mubr.msk.f32.mxu0 %vm7508_vm0, %v7507_v0 }
  0xcb   : > { %7255 = vmatprep.mubr.msk.f32.mxu1 %vm7508_vm0, %v7507_v0 }
  0xe6   : > { %v524_v59 = vpop.f32.mrb[0].mxu1 }
  0xe7   : > { %v7077_v60 = vpop.f32.mrb[1].mxu1 }
 0x158   : > { %v448_v61 = vpop.f32.mrb[0].mxu0 }
 0x159   : > { %v525_v62 = vadd.f32 %v524_v59, %v448_v61  ;;  %v7072_v63 = vpop.f32.mrb[1].mxu0  ;;  %v684_v1 = vpop.f32.mrb[2].mxu1  ;;  %v7953_v61 = vld [vmem:[%s8389_s8] ss:$0 sm:$0xff] }
 0x15a   : > { %v7087_v2 = vpop.f32.mrb[3].mxu1 }
 0x15c   : > { %v603_v3 = vpop.f32.mrb[2].mxu0 }
 0x15d   : > { %v607_v4 = vadd.f32 %v603_v3, %v525_v62  ;;  %v7082_v5 = vpop.f32.mrb[3].mxu0 }
 0x15f   : > { %v688_v6 = vadd.f32 %v684_v1, %v607_v4 }
 0x160   : > { %v765_v7 = vpop.f32.mrb[4].mxu0  ;;  %v845_v8 = vpop.f32.mrb[4].mxu1 }
 0x161   : > { %v769_v9 = vadd.f32 %v765_v7, %v688_v6  ;;  %v7092_v10 = vpop.f32.mrb[5].mxu0  ;;  %v7097_v11 = vpop.f32.mrb[5].mxu1 }
 0x163   : > { %v849_v12 = vadd.f32 %v845_v8, %v769_v9 }
 0x164   : > { %v925_v13 = vpop.f32.mrb[6].mxu0  ;;  %v1005_v14 = vpop.f32.mrb[6].mxu1 }
 0x165   : > { %v929_v15 = vadd.f32 %v925_v13, %v849_v12  ;;  %v7102_v16 = vpop.f32.mrb[7].mxu0  ;;  %v7107_v17 = vpop.f32.mrb[7].mxu1 }
 0x167   : > { %v1009_v18 = vadd.f32 %v1005_v14, %v929_v15 }
 0x168   : > { %v1085_v19 = vpop.f32.mrb[8].mxu0  ;;  %v1188_v20 = vpop.f32.mrb[8].mxu1 }
 0x169   : > { %v7942_v21 = vadd.f32 %v1085_v19, %v1009_v18  ;;  %v7112_v22 = vpop.f32.mrb[9].mxu0  ;;  %v7117_v23 = vpop.f32.mrb[9].mxu1 }
 0x16c   : > { %v1261_v24 = vpop.f32.mrb[10].mxu0 }
 0x16d   : > { %v1262_v25 = vadd.f32 %v1261_v24, %v1188_v20  ;;  %v7122_v26 = vpop.f32.mrb[11].mxu0  ;;  %v1339_v27 = vpop.f32.mrb[10].mxu1 }
 0x16e   : > { %v7127_v28 = vpop.f32.mrb[11].mxu1 }
 0x16f   : > { %v1343_v29 = vadd.f32 %v1339_v27, %v1262_v25 }
 0x170   : > { %v1414_v30 = vpop.f32.mrb[12].mxu0 }
 0x171   : > { %v1418_v31 = vadd.f32 %v1414_v30, %v1343_v29  ;;  %v7132_v32 = vpop.f32.mrb[13].mxu0  ;;  %v1489_v33 = vpop.f32.mrb[12].mxu1 }
 0x172   : > { %v7137_v34 = vpop.f32.mrb[13].mxu1 }
 0x173   : > { %v1493_v35 = vadd.f32 %v1489_v33, %v1418_v31 }
 0x174   : > { %v1568_v36 = vpop.f32.mrb[14].mxu0 }
 0x175   : > { %v1572_v37 = vadd.f32 %v1568_v36, %v1493_v35  ;;  %v7142_v38 = vpop.f32.mrb[15].mxu0  ;;  %v1643_v39 = vpop.f32.mrb[14].mxu1 }
 0x176   : > { %v7147_v40 = vpop.f32.mrb[15].mxu1 }
 0x177   : > { %v1647_v41 = vadd.f32 %v1643_v39, %v1572_v37 }
 0x178   : > { %v1718_v42 = vpop.f32.mrb[16].mxu0 }
 0x179   : > { %v1722_v43 = vadd.f32 %v1718_v42, %v1647_v41  ;;  %v7152_v44 = vpop.f32.mrb[17].mxu0  ;;  %v1797_v45 = vpop.f32.mrb[16].mxu1 }
 0x17a   : > { %v7157_v46 = vpop.f32.mrb[17].mxu1 }
 0x17b   : > { %v1801_v47 = vadd.f32 %v1797_v45, %v1722_v43 }
 0x17c   : > { %v1884_v49 = vpop.f32.mrb[18].mxu0 }
 0x17d   : > { %v1802_v50 = vadd.f32 %v1801_v47, %v7944_v48  ;;  %v1957_v51 = vpop.f32.mrb[18].mxu1  ;;  %v7162_v52 = vpop.f32.mrb[19].mxu0 }
 0x17e   : > { %v1958_v54 = vadd.f32 %v1957_v51, %v1884_v49  ;;  %v7167_v55 = vpop.f32.mrb[19].mxu1  ;;  %v1095_v49 = vadd.f32 %v7944_v48, %v7942_v21 }
 0x17f   : > { %vm1803_vm4 = vcmp.gt.f32.partialorder %v1802_v50, 0.0  ;;  %v1804_v56 = vmul.f32 %v1802_v50, %v7947_v53 }
 0x180   : > { %v2031_v57 = vpop.f32.mrb[20].mxu0  ;;  %v1102_v52 = vmul.f32 %v7947_v53, %v1095_v49  ;;  %vm1096_vm7 = vcmp.gt.f32.partialorder %v1095_v49, 0.0 }
 0x181   : > { %v2035_v58 = vadd.f32 %v2031_v57, %v1958_v54  ;;  %v7172_v59 = vpop.f32.mrb[21].mxu0  ;;  %v2106_v60 = vpop.f32.mrb[20].mxu1  ;;  %v1805_v62 = vsel %vm1803_vm4, %v1802_v50, %v1804_v56 }
 0x182   : > { %v7177_v63 = vpop.f32.mrb[21].mxu1  ;;  %v1806_v1 = vmul.f32 %v7953_v61, %v1805_v62  ;;  %v1103_v57 = vsel %vm1096_vm7, %v1095_v49, %v1102_v52 }
 0x183   : > { %v2110_v2 = vadd.f32 %v2106_v60, %v2035_v58  ;;  %v1110_v58 = vmul.f32 %v7953_v61, %v1103_v57  ;;  %v7978_v63 = vld [vmem:[%s8384_s3] sm:$0xf] }
 0x184   : > { %v2181_v3 = vpop.f32.mrb[22].mxu0  ;;  %1808 = vrot.lane.b32.xlu0 %v1806_v1, %s7518_s16 }
 0x185   : > { %v2185_v4 = vadd.f32 %v2181_v3, %v2110_v2  ;;  %v7182_v5 = vpop.f32.mrb[23].mxu0  ;;  %v2256_v6 = vpop.f32.mrb[22].mxu1  ;;  %v356_v3 = vld [vmem:[%s8388_s7] sm:$0xf] }
 0x186   : > { %v7187_v7 = vpop.f32.mrb[23].mxu1 }
 0x187   : > { %v2260_v8 = vadd.f32 %v2256_v6, %v2185_v4  ;;  %v8002_v4 = vld [vmem:[%s8384_s3 + $0x4] sm:$0xf]  ;;  %v8014_v6 = vld [vmem:[%s8384_s3 + $0xc] sm:$0xf] }
 0x188   : > { %v2335_v9 = vpop.f32.mrb[24].mxu0 }
 0x189   : > { %v2339_v10 = vadd.f32 %v2335_v9, %v2260_v8  ;;  %v7192_v11 = vpop.f32.mrb[25].mxu0  ;;  %v2414_v12 = vpop.f32.mrb[24].mxu1  ;;  %v8030_v8 = vld [vmem:[%s8384_s3 + $0x14] sm:$0xf] }
 0x18a   : > { %v7197_v13 = vpop.f32.mrb[25].mxu1 }
 0x18b   : > { %v2418_v14 = vadd.f32 %v2414_v12, %v2339_v10  ;;  %v8044_v10 = vld [vmem:[%s8384_s3 + $0x1c] sm:$0xf]  ;;  %v8058_v12 = vld [vmem:[%s8384_s3 + $0x8] sm:$0xf] }
 0x18c   : > { %v2493_v15 = vpop.f32.mrb[26].mxu0 }
 0x18d   : > { %v2497_v16 = vadd.f32 %v2493_v15, %v2418_v14  ;;  %v7202_v17 = vpop.f32.mrb[27].mxu0  ;;  %v2580_v18 = vpop.f32.mrb[26].mxu1  ;;  %v8071_v15 = vld [vmem:[%s8384_s3 + $0x10] sm:$0xf] }
 0x18e   : > { %v7207_v19 = vpop.f32.mrb[27].mxu1  ;;  %v8091_v17 = vld [vmem:[%s8384_s3 + $0x18] sm:$0xf] }
 0x18f   : > { %v2498_v20 = vadd.f32 %v2497_v16, %v7944_v48  ;;  %v8109_v19 = vld [vmem:[%s8384_s3 + $0x20] sm:$0xf] }
 0x190   : > { %v2653_v22 = vpop.f32.mrb[28].mxu0 }
 0x191   : > { %vm2499_vm5 = vcmp.gt.f32.partialorder %v2498_v20, 0.0  ;;  %v2500_v23 = vmul.f32 %v2498_v20, %v7947_v53  ;;  %v2654_v24 = vadd.f32 %v2653_v22, %v2580_v18  ;;  %v7212_v25 = vpop.f32.mrb[29].mxu0  ;;  %v2727_v26 = vpop.f32.mrb[28].mxu1 }
 0x192   : > { %v7217_v27 = vpop.f32.mrb[29].mxu1 }
 0x193   : > { %v2731_v28 = vadd.f32 %v2727_v26, %v2654_v24  ;;  %v2501_v29 = vsel %vm2499_vm5, %v2498_v20, %v2500_v23 }
 0x194   : > { %v2802_v30 = vpop.f32.mrb[30].mxu0  ;;  %v2502_v31 = vmul.f32 %v7953_v61, %v2501_v29 }
 0x195   : > { %v2806_v32 = vadd.f32 %v2802_v30, %v2731_v28  ;;  %v7222_v33 = vpop.f32.mrb[31].mxu0  ;;  %v2877_v34 = vpop.f32.mrb[30].mxu1  ;;  %v8282_v30 = vld [vmem:[%s8385_s4] sm:$0xff] }
 0x196   : > { %v7227_v35 = vpop.f32.mrb[31].mxu1  ;;  %2504 = vrot.lane.b32.xlu1 %v2502_v31, %s7518_s16 }
 0x197   : > { %v2881_v36 = vadd.f32 %v2877_v34, %v2806_v32 }
 0x198   : > { %v2952_v37 = vpop.f32.mrb[32].mxu0 }
 0x199   : > { %v2956_v38 = vadd.f32 %v2952_v37, %v2881_v36  ;;  %v7232_v39 = vpop.f32.mrb[33].mxu0  ;;  %v3027_v40 = vpop.f32.mrb[32].mxu1 }
 0x19a   : > { %v7237_v41 = vpop.f32.mrb[33].mxu1 }
 0x19b   : > { %v3031_v42 = vadd.f32 %v3027_v40, %v2956_v38 }
 0x19c   : > { %v3102_v43 = vpop.f32.mrb[34].mxu0 }
 0x19d   : > { %v3106_v44 = vadd.f32 %v3102_v43, %v3031_v42  ;;  %v7242_v45 = vpop.f32.mrb[35].mxu0  ;;  %v3181_v46 = vpop.f32.mrb[34].mxu1 }
 0x19e   : > { %v7247_v47 = vpop.f32.mrb[35].mxu1 }
 0x19f   : > { %v3185_v50 = vadd.f32 %v3181_v46, %v3106_v44 }
 0x1a1   : > { %v3186_v51 = vadd.f32 %v3185_v50, %v7944_v48 }
 0x1a3   : > { %vm3187_vm6 = vcmp.gt.f32.partialorder %v3186_v51, 0.0  ;;  %v3188_v54 = vmul.f32 %v3186_v51, %v7947_v53 }
 0x1a5   : > { %v3189_v55 = vsel %vm3187_vm6, %v3186_v51, %v3188_v54 }
 0x1a6   : > { %v3190_v56 = vmul.f32 %v7953_v61, %v3189_v55 }
 0x1a8   : > { %3192 = vrot.lane.b32.xlu1 %v3190_v56, %s7518_s16 }
 0x1ac   : > { %1112 = vrot.lane.b32.xlu1 %v1110_v58, %s7518_s16 }
 0x1f6   : > { %v1809_v21 = vpop.permute.xlu0 %1808 }
 0x1f7   : > { %1812 = vst.msk [vmem:[#allocation2 + $0x4] sm:$0xf] %vm1115_vm8, %v1809_v21 }
 0x1fe   : > { %v3198_v53 = vld [vmem:[#allocation2 + $0x4] sm:$0xf] }
 0x208   : > { %v2505_v48 = vpop.permute.xlu1 %2504 }
 0x209   : > { %2508 = vst.msk [vmem:[#allocation2 + $0x8] sm:$0xf] %vm1115_vm8, %v2505_v48 }
 0x210   : > { %v3199_v59 = vld [vmem:[#allocation2 + $0x8] sm:$0xf] }
 0x211   : > { %3205 = vrot.lane.b32.xlu0 %v3199_v59, %s7509_s17 }
 0x215   : > { %3441 = vrot.lane.b32.xlu0 %v3198_v53, %s7510_s18 }
 0x219   : > { %3602 = vrot.lane.b32.xlu0 %v3198_v53, %s7511_s19 }
 0x21a   : > { %v3193_v60 = vpop.permute.xlu1 %3192 }
 0x21b   : > { %3196 = vst.msk [vmem:[#allocation2 + $0xc] sm:$0xf] %vm1115_vm8, %v3193_v60 }
 0x21d   : > { %3762 = vrot.lane.b32.xlu0 %v3199_v59, %s7511_s19 }
 0x21e   : > { %v1113_v62 = vpop.permute.xlu1 %1112 }
 0x21f   : > { %1116 = vst.msk [vmem:[#allocation2] sm:$0xf] %vm1115_vm8, %v1113_v62 }
 0x221   : > { %4067 = vrot.lane.b32.xlu0 %v3199_v59, %s7512_s20 }
 0x222   : > { %v3200_v1 = vld [vmem:[#allocation2 + $0xc] sm:$0xf] }
 0x223   : > { %3360 = vrot.lane.b32.xlu1 %v3200_v1, %s7509_s17  ;;  %7254 = vmatpush3.msk.msra.mxu1 %vm379_vm1, %v3200_v1 }
 0x224   : > { %7256 = vmatmul.mubr.msk.f32.vlgmr.msra.gmra.mrb[36].mxu1 %vm375_vm2, %v7978_v63  ;;  %7263 = vmatprep.subr.mxu1 %v7507_v0 }
 0x225   : > { %4501 = vrot.lane.b32.xlu0 %v3199_v59, %s7513_s21  ;;  %7265 = vmatprep.mubr.msk.f32.mxu1 %vm7508_vm0, %v7507_v0 }
 0x226   : > { %v3197_v2 = vld [vmem:[#allocation2] sm:$0xf] }
 0x227   : > { %3522 = vrot.lane.b32.xlu1 %v3197_v2, %s7511_s19 }
 0x229   : > { %5077 = vrot.lane.b32.xlu0 %v3197_v2, %s7515_s23 }
 0x22b   : > { %3682 = vrot.lane.b32.xlu1 %v3200_v1, %s7510_s18 }
 0x22d   : > { %5795 = vrot.lane.b32.xlu0 %v3197_v2, %s7516_s24 }
 0x22f   : > { %3842 = vrot.lane.b32.xlu1 %v3200_v1, %s7511_s19  ;;  %s347_s19 = scalar_lea.vmem %s8382_s1, %s7583_s11 }
 0x233   : > { %4284 = vrot.lane.b32.xlu1 %v3197_v2, %s7513_s21 }
 0x237   : > { %5002 = vrot.lane.b32.xlu1 %v3198_v53, %s7514_s22 }
 0x23b   : > { %5152 = vrot.lane.b32.xlu1 %v3198_v53, %s7515_s23  ;;  %s352_s23 = scalar_lea.vmem %s8390_s9, %s7583_s11 }
 0x23f   : > { %3922 = vperm.xlu1 %7493, %v356_v3  }
 0x283   : > { %v8004_v5 = vpop.permute.xlu0 %3205 }
 0x284   : > { %7249 = vmatpush3.msk.msra.mxu0 %vm379_vm1, %v8004_v5 }
 0x285   : > { %7251 = vmatmul.mubr.msk.f32.vlgmr.msra.gmra.mrb[36].mxu0 %vm375_vm2, %v8002_v4  ;;  %7258 = vmatprep.subr.mxu0 %v7507_v0 }
 0x286   : > { %7260 = vmatprep.mubr.msk.f32.mxu0 %vm7508_vm0, %v7507_v0 }
 0x287   : > { %v8018_v7 = vpop.permute.xlu0 %3441 }
 0x288   : > { %7264 = vmatpush3.msk.msra.mxu1 %vm379_vm1, %v8018_v7 }
 0x289   : > { %7266 = vmatmul.mubr.msk.f32.vlgmr.msra.gmra.mrb[38].mxu1 %vm375_vm2, %v8014_v6  ;;  %7273 = vmatprep.subr.mxu1 %v7507_v0 }
 0x28a   : > { %7275 = vmatprep.mubr.msk.f32.mxu1 %vm7508_vm0, %v7507_v0 }
 0x28b   : > { %v8032_v9 = vpop.permute.xlu0 %3602 }
 0x28c   : > { %7274 = vmatpush3.msk.msra.mxu1 %vm379_vm1, %v8032_v9 }
 0x28d   : > { %7276 = vmatmul.mubr.msk.f32.vlgmr.msra.gmra.mrb[40].mxu1 %vm375_vm2, %v8030_v8  ;;  %7283 = vmatprep.subr.mxu1 %v7507_v0 }
 0x28e   : > { %7285 = vmatprep.mubr.msk.f32.mxu1 %vm7508_vm0, %v7507_v0 }
 0x28f   : > { %v8046_v11 = vpop.permute.xlu0 %3762 }
 0x290   : > { %7284 = vmatpush3.msk.msra.mxu1 %vm379_vm1, %v8046_v11 }
 0x291   : > { %7286 = vmatmul.mubr.msk.f32.vlgmr.msra.gmra.mrb[42].mxu1 %vm375_vm2, %v8044_v10  ;;  %7293 = vmatprep.subr.mxu1 %v7507_v0 }
 0x292   : > { %7295 = vmatprep.mubr.msk.f32.mxu1 %vm7508_vm0, %v7507_v0 }
 0x293   : > { %v4068_v14 = vpop.permute.xlu0 %4067 }
 0x295   : > { %v3361_v13 = vpop.permute.xlu1 %3360 }
 0x296   : > { %7259 = vmatpush3.msk.msra.mxu0 %vm379_vm1, %v3361_v13  ;;  %7294 = vmatpush3.msk.msra.mxu1 %vm379_vm1, %v3361_v13 }
 0x297   : > { %7261 = vmatmul.mubr.msk.f32.vlgmr.msra.gmra.mrb[38].mxu0 %vm375_vm2, %v8058_v12  ;;  %7296 = vmatmul.mubr.msk.f32.vlgmr.msra.gmra.mrb[44].mxu1 %vm375_vm2, %v8002_v4  ;;  %v8124_v22 = vpop.permute.xlu0 %4501 }
 0x298   : > { %7303 = vmatprep.subr.mxu1 %v7507_v0  ;;  %7268 = vmatprep.subr.mxu0 %v7507_v0 }
 0x299   : > { %7304 = vmatpush3.msk.msra.mxu1 %vm379_vm1, %v4068_v14  ;;  %v8074_v16 = vpop.permute.xlu1 %3522  ;;  %7270 = vmatprep.mubr.msk.f32.mxu0 %vm7508_vm0, %v7507_v0 }
 0x29a   : > { %7269 = vmatpush3.msk.msra.mxu0 %vm379_vm1, %v8074_v16  ;;  %7305 = vmatprep.mubr.msk.f32.mxu1 %vm7508_vm0, %v7507_v0 }
 0x29b   : > { %7313 = vmatprep.subr.mxu1 %v7507_v0  ;;  %7271 = vmatmul.mubr.msk.f32.vlgmr.msra.gmra.mrb[40].mxu0 %vm375_vm2, %v8071_v15  ;;  %v5078_v24 = vpop.permute.xlu0 %5077 }
 0x29c   : > { %7306 = vmatmul.mubr.msk.f32.vlgmr.msra.gmra.mrb[46].mxu1 %vm375_vm2, %v8058_v12  ;;  %7278 = vmatprep.subr.mxu0 %v7507_v0 }
 0x29d   : > { %7314 = vmatpush3.msk.msra.mxu1 %vm379_vm1, %v8032_v9  ;;  %v3683_v18 = vpop.permute.xlu1 %3682  ;;  %7280 = vmatprep.mubr.msk.f32.mxu0 %vm7508_vm0, %v7507_v0 }
 0x29e   : > { %7279 = vmatpush3.msk.msra.mxu0 %vm379_vm1, %v3683_v18  ;;  %7315 = vmatprep.mubr.msk.f32.mxu1 %vm7508_vm0, %v7507_v0 }
 0x29f   : > { %7323 = vmatprep.subr.mxu1 %v7507_v0  ;;  %7281 = vmatmul.mubr.msk.f32.vlgmr.msra.gmra.mrb[42].mxu0 %vm375_vm2, %v8091_v17  ;;  %v5796_v27 = vpop.permute.xlu0 %5795 }
 0x2a0   : > { %7316 = vmatmul.mubr.msk.f32.vlgmr.msra.gmra.mrb[48].mxu1 %vm375_vm2, %v8071_v15  ;;  %7288 = vmatprep.subr.mxu0 %v7507_v0 }
 0x2a1   : > { %7324 = vmatpush3.msk.msra.mxu1 %vm379_vm1, %v8046_v11  ;;  %v8113_v20 = vpop.permute.xlu1 %3842  ;;  %7290 = vmatprep.mubr.msk.f32.mxu0 %vm7508_vm0, %v7507_v0 }
 0x2a2   : > { %7289 = vmatpush3.msk.msra.mxu0 %vm379_vm1, %v8113_v20  ;;  %7325 = vmatprep.mubr.msk.f32.mxu1 %vm7508_vm0, %v7507_v0 }
 0x2a3   : > { %7333 = vmatprep.subr.mxu1 %v7507_v0  ;;  %7291 = vmatmul.mubr.msk.f32.vlgmr.msra.gmra.mrb[44].mxu0 %vm375_vm2, %v8109_v19 }
 0x2a4   : > { %7298 = vmatprep.subr.mxu0 %v7507_v0  ;;  %7326 = vmatmul.mubr.msk.f32.vlgmr.msra.gmra.mrb[50].mxu1 %vm375_vm2, %v8091_v17 }
 0x2a5   : > { %7334 = vmatpush3.msk.msra.mxu1 %vm379_vm1, %v8124_v22  ;;  %7299 = vmatpush3.msk.msra.mxu0 %vm379_vm1, %v8004_v5  ;;  %v4285_v23 = vpop.permute.xlu1 %4284 }
 0x2a6   : > { %7300 = vmatprep.mubr.msk.f32.mxu0 %vm7508_vm0, %v7507_v0  ;;  %7308 = vmatprep.subr.mxu0 %v7507_v0 }
 0x2a7   : > { %7335 = vmatprep.mubr.msk.f32.mxu1 %vm7508_vm0, %v7507_v0  ;;  %7343 = vmatprep.subr.mxu1 %v7507_v0 }
 0x2a8   : > { %7301 = vmatmul.mubr.msk.f32.vlgmr.msra.gmra.mrb[46].mxu0 %vm375_vm2, %v7978_v63  ;;  %7336 = vmatmul.mubr.msk.f32.vlgmr.msra.gmra.mrb[52].mxu1 %vm375_vm2, %v8109_v19 }
 0x2a9   : > { %7309 = vmatpush3.msk.msra.mxu0 %vm379_vm1, %v8074_v16  ;;  %7344 = vmatpush3.msk.msra.mxu1 %vm379_vm1, %v8018_v7  ;;  %v5003_v25 = vpop.permute.xlu1 %5002 }
 0x2aa   : > { %7310 = vmatprep.mubr.msk.f32.mxu0 %vm7508_vm0, %v7507_v0  ;;  %7318 = vmatprep.subr.mxu0 %v7507_v0 }
 0x2ab   : > { %7345 = vmatprep.mubr.msk.f32.mxu1 %vm7508_vm0, %v7507_v0  ;;  %7353 = vmatprep.subr.mxu1 %v7507_v0 }
 0x2ac   : > { %7311 = vmatmul.mubr.msk.f32.vlgmr.msra.gmra.mrb[48].mxu0 %vm375_vm2, %v8014_v6  ;;  %7346 = vmatmul.mubr.msk.f32.vlgmr.msra.gmra.mrb[54].mxu1 %vm375_vm2, %v7978_v63 }
 0x2ad   : > { %7319 = vmatpush3.msk.msra.mxu0 %vm379_vm1, %v4285_v23  ;;  %7354 = vmatpush3.msk.msra.mxu1 %vm379_vm1, %v3683_v18  ;;  %v5153_v26 = vpop.permute.xlu1 %5152 }
 0x2ae   : > { %7320 = vmatprep.mubr.msk.f32.mxu0 %vm7508_vm0, %v7507_v0  ;;  %7328 = vmatprep.subr.mxu0 %v7507_v0 }
 0x2af   : > { %7355 = vmatprep.mubr.msk.f32.mxu1 %vm7508_vm0, %v7507_v0  ;;  %7363 = vmatprep.subr.mxu1 %v7507_v0 }
 0x2b0   : > { %7321 = vmatmul.mubr.msk.f32.vlgmr.msra.gmra.mrb[50].mxu0 %vm375_vm2, %v8030_v8  ;;  %7356 = vmatmul.mubr.msk.f32.vlgmr.msra.gmra.mrb[56].mxu1 %vm375_vm2, %v8014_v6 }
 0x2b1   : > { %7329 = vmatpush3.msk.msra.mxu0 %vm379_vm1, %v8113_v20  ;;  %7364 = vmatpush3.msk.msra.mxu1 %vm379_vm1, %v8113_v20 }
 0x2b2   : > { %7330 = vmatprep.mubr.msk.f32.mxu0 %vm7508_vm0, %v7507_v0  ;;  %7338 = vmatprep.subr.mxu0 %v7507_v0 }
 0x2b3   : > { %7365 = vmatprep.mubr.msk.f32.mxu1 %vm7508_vm0, %v7507_v0  ;;  %7373 = vmatprep.subr.mxu1 %v7507_v0 }
 0x2b4   : > { %7331 = vmatmul.mubr.msk.f32.vlgmr.msra.gmra.mrb[52].mxu0 %vm375_vm2, %v8044_v10  ;;  %7366 = vmatmul.mubr.msk.f32.vlgmr.msra.gmra.mrb[58].mxu1 %vm375_vm2, %v8030_v8 }
 0x2b5   : > { %7339 = vmatpush3.msk.msra.mxu0 %vm379_vm1, %v8074_v16  ;;  %7374 = vmatpush3.msk.msra.mxu1 %vm379_vm1, %v5078_v24 }
 0x2b6   : > { %7340 = vmatprep.mubr.msk.f32.mxu0 %vm7508_vm0, %v7507_v0  ;;  %7348 = vmatprep.subr.mxu0 %v7507_v0 }
 0x2b7   : > { %7375 = vmatprep.mubr.msk.f32.mxu1 %vm7508_vm0, %v7507_v0  ;;  %7383 = vmatprep.subr.mxu1 %v7507_v0 }
 0x2b8   : > { %7341 = vmatmul.mubr.msk.f32.vlgmr.msra.gmra.mrb[54].mxu0 %vm375_vm2, %v8002_v4  ;;  %7376 = vmatmul.mubr.msk.f32.vlgmr.msra.gmra.mrb[60].mxu1 %vm375_vm2, %v8044_v10 }
 0x2b9   : > { %7349 = vmatpush3.msk.msra.mxu0 %vm379_vm1, %v8032_v9  ;;  %7384 = vmatpush3.msk.msra.mxu1 %vm379_vm1, %v8032_v9 }
 0x2ba   : > { %7350 = vmatprep.mubr.msk.f32.mxu0 %vm7508_vm0, %v7507_v0  ;;  %7358 = vmatprep.subr.mxu0 %v7507_v0 }
 0x2bb   : > { %7385 = vmatprep.mubr.msk.f32.mxu1 %vm7508_vm0, %v7507_v0  ;;  %7393 = vmatprep.subr.mxu1 %v7507_v0 }
 0x2bc   : > { %7351 = vmatmul.mubr.msk.f32.vlgmr.msra.gmra.mrb[56].mxu0 %vm375_vm2, %v8058_v12  ;;  %7386 = vmatmul.mubr.msk.f32.vlgmr.msra.gmra.mrb[62].mxu1 %vm375_vm2, %v8002_v4 }
 0x2bd   : > { %7359 = vmatpush3.msk.msra.mxu0 %vm379_vm1, %v8046_v11  ;;  %7394 = vmatpush3.msk.msra.mxu1 %vm379_vm1, %v4285_v23 }
 0x2be   : > { %7360 = vmatprep.mubr.msk.f32.mxu0 %vm7508_vm0, %v7507_v0  ;;  %7368 = vmatprep.subr.mxu0 %v7507_v0  ;;  %v8288_v62 = vpop.permute.xlu1 %3922 }
 0x2bf   : > { %7395 = vmatprep.mubr.msk.f32.mxu1 %vm7508_vm0, %v7507_v0  ;;  %7403 = vmatprep.subr.mxu1 %v7507_v0 }
 0x2c0   : > { %7361 = vmatmul.mubr.msk.f32.vlgmr.msra.gmra.mrb[58].mxu0 %vm375_vm2, %v8071_v15  ;;  %7396 = vmatmul.mubr.msk.f32.vlgmr.msra.gmra.mrb[64].mxu1 %vm375_vm2, %v8058_v12 }
 0x2c1   : > { %7369 = vmatpush3.msk.msra.mxu0 %vm379_vm1, %v5003_v25  ;;  %7404 = vmatpush3.msk.msra.mxu1 %vm379_vm1, %v8113_v20 }
 0x2c2   : > { %7370 = vmatprep.mubr.msk.f32.mxu0 %vm7508_vm0, %v7507_v0  ;;  %7378 = vmatprep.subr.mxu0 %v7507_v0 }
 0x2c3   : > { %7405 = vmatprep.mubr.msk.f32.mxu1 %vm7508_vm0, %v7507_v0  ;;  %7413 = vmatprep.subr.mxu1 %v7507_v0 }
 0x2c4   : > { %7371 = vmatmul.mubr.msk.f32.vlgmr.msra.gmra.mrb[60].mxu0 %vm375_vm2, %v8091_v17  ;;  %7406 = vmatmul.mubr.msk.f32.vlgmr.msra.gmra.mrb[66].mxu1 %vm375_vm2, %v8071_v15 }
 0x2c5   : > { %7379 = vmatpush3.msk.msra.mxu0 %vm379_vm1, %v5153_v26  ;;  %7414 = vmatpush3.msk.msra.mxu1 %vm379_vm1, %v5078_v24 }
 0x2c6   : > { %7380 = vmatprep.mubr.msk.f32.mxu0 %vm7508_vm0, %v7507_v0  ;;  %7388 = vmatprep.subr.mxu0 %v7507_v0 }
 0x2c7   : > { %7415 = vmatprep.mubr.msk.f32.mxu1 %vm7508_vm0, %v7507_v0  ;;  %7423 = vmatprep.subr.mxu1 %v7507_v0 }
 0x2c8   : > { %7381 = vmatmul.mubr.msk.f32.vlgmr.msra.gmra.mrb[62].mxu0 %vm375_vm2, %v8109_v19  ;;  %7416 = vmatmul.mubr.msk.f32.vlgmr.msra.gmra.mrb[68].mxu1 %vm375_vm2, %v8091_v17 }
 0x2c9   : > { %7389 = vmatpush3.msk.msra.mxu0 %vm379_vm1, %v8074_v16  ;;  %7424 = vmatpush3.msk.msra.mxu1 %vm379_vm1, %v5796_v27 }
 0x2ca   : > { %7390 = vmatprep.mubr.msk.f32.mxu0 %vm7508_vm0, %v7507_v0  ;;  %7398 = vmatprep.subr.mxu0 %v7507_v0 }
 0x2cb   : > { %7425 = vmatprep.mubr.msk.f32.mxu1 %vm7508_vm0, %v7507_v0 }
 0x2cc   : > { %7391 = vmatmul.mubr.msk.f32.vlgmr.msra.gmra.mrb[64].mxu0 %vm375_vm2, %v7978_v63  ;;  %7426 = vmatmul.mubr.msk.f32.vlgmr.msra.gmra.mrb[70].mxu1 %vm375_vm2, %v8109_v19 }
 0x2cd   : > { %7399 = vmatpush3.msk.msra.mxu0 %vm379_vm1, %v8046_v11  ;;  %7400 = vmatprep.mubr.msk.f32.mxu0 %vm7508_vm0, %v7507_v0 }
 0x2ce   : > { %7408 = vmatprep.subr.mxu0 %v7507_v0  ;;  %7435 = vmatprep.mubr.msk.f32.mxu1 %vm375_vm2, %v8282_v30 }
 0x2d0   : > { %7401 = vmatmul.mubr.msk.f32.vlgmr.msra.gmra.mrb[66].mxu0 %vm375_vm2, %v8014_v6 }
 0x2d1   : > { %7409 = vmatpush3.msk.msra.mxu0 %vm379_vm1, %v8124_v22  ;;  %7410 = vmatprep.mubr.msk.f32.mxu0 %vm7508_vm0, %v7507_v0 }
 0x2d2   : > { %7418 = vmatprep.subr.mxu0 %v7507_v0 }
 0x2d4   : > { %7411 = vmatmul.mubr.msk.f32.vlgmr.msra.gmra.mrb[68].mxu0 %vm375_vm2, %v8030_v8  ;;  %v8297_v8 = vld [vmem:[%s8385_s4 + $0x8] sm:$0xf] }
 0x2d5   : > { %7419 = vmatpush3.msk.msra.mxu0 %vm379_vm1, %v5153_v26  ;;  %7420 = vmatprep.mubr.msk.f32.mxu0 %vm7508_vm0, %v7507_v0 }
 0x2d8   : > { %7421 = vmatmul.mubr.msk.f32.vlgmr.msra.gmra.mrb[70].mxu0 %vm375_vm2, %v8044_v10 }
 0x2d9   : > { %7430 = vmatprep.mubr.msk.f32.mxu0 %vm375_vm2, %v8282_v30 }
 0x2f7   : > { %v3354_v28 = vpop.f32.mrb[36].mxu1 }
 0x2f8   : > { %v7257_v29 = vpop.f32.mrb[37].mxu1 }
 0x358   : > { %v3278_v31 = vpop.f32.mrb[36].mxu0 }
 0x359   : > { %v7252_v32 = vpop.f32.mrb[37].mxu0  ;;  %v3355_v33 = vadd.f32 %v3354_v28, %v3278_v31 }
 0x35c   : > { %v3514_v34 = vpop.f32.mrb[38].mxu1 }
 0x35d   : > { %v7267_v35 = vpop.f32.mrb[39].mxu1 }
 0x360   : > { %v3675_v36 = vpop.f32.mrb[40].mxu1 }
 0x361   : > { %v7277_v37 = vpop.f32.mrb[41].mxu1 }
 0x364   : > { %v3835_v38 = vpop.f32.mrb[42].mxu1 }
 0x365   : > { %v7287_v39 = vpop.f32.mrb[43].mxu1 }
 0x36a   : > { %v3433_v40 = vpop.f32.mrb[38].mxu0  ;;  %v3993_v41 = vpop.f32.mrb[44].mxu1 }
 0x36b   : > { %v3437_v42 = vadd.f32 %v3433_v40, %v3355_v33  ;;  %v7262_v43 = vpop.f32.mrb[39].mxu0  ;;  %v7297_v44 = vpop.f32.mrb[45].mxu1 }
 0x36d   : > { %v3518_v45 = vadd.f32 %v3514_v34, %v3437_v42 }
 0x36e   : > { %v3595_v46 = vpop.f32.mrb[40].mxu0 }
 0x36f   : > { %v3599_v47 = vadd.f32 %v3595_v46, %v3518_v45  ;;  %v7272_v49 = vpop.f32.mrb[41].mxu0  ;;  %v4137_v50 = vpop.f32.mrb[46].mxu1 }
 0x370   : > { %v7307_v51 = vpop.f32.mrb[47].mxu1 }
 0x371   : > { %v3679_v52 = vadd.f32 %v3675_v36, %v3599_v47 }
 0x372   : > { %v3755_v54 = vpop.f32.mrb[42].mxu0 }
 0x373   : > { %v3759_v55 = vadd.f32 %v3755_v54, %v3679_v52  ;;  %v7282_v56 = vpop.f32.mrb[43].mxu0  ;;  %v4279_v57 = vpop.f32.mrb[48].mxu1 }
 0x374   : > { %v7317_v58 = vpop.f32.mrb[49].mxu1 }
 0x375   : > { %v3839_v21 = vadd.f32 %v3835_v38, %v3759_v55 }
 0x376   : > { %v3915_v48 = vpop.f32.mrb[44].mxu0 }
 0x377   : > { %v3919_v59 = vadd.f32 %v3915_v48, %v3839_v21  ;;  %v7292_v53 = vpop.f32.mrb[45].mxu0  ;;  %v4425_v60 = vpop.f32.mrb[50].mxu1 }
 0x378   : > { %v7327_v63 = vpop.f32.mrb[51].mxu1 }
 0x379   : > { %v3925_v1 = vadd.f32 %v8288_v62, %v3919_v59 }
 0x37b   : > { %v8292_v2 = vmul.f32 %v7953_v61, %v3925_v1  ;;  %v4063_v3 = vpop.f32.mrb[46].mxu0  ;;  %v4571_v4 = vpop.f32.mrb[52].mxu1 }
 0x37c   : > { %v4064_v5 = vadd.f32 %v4063_v3, %v3993_v41  ;;  %v7302_v6 = vpop.f32.mrb[47].mxu0  ;;  %v7337_v7 = vpop.f32.mrb[53].mxu1 }
 0x37d   : > { %7428 = vmatprep.subr.msk.mxu0 %vm379_vm1, %v8292_v2 }
 0x37e   : > { %v4141_v9 = vadd.f32 %v4137_v50, %v4064_v5  ;;  %7429 = vmatpush3.msk.msra.mxu0 %vm379_vm1, %v8292_v2 }
 0x37f   : > { %v4208_v10 = vpop.f32.mrb[48].mxu0  ;;  %v4714_v11 = vpop.f32.mrb[54].mxu1  ;;  %7431 = vmatmul.mubr.msk.f32.vlgmr.msra.gmra.mrb[72].mxu0 %vm375_vm2, %v8297_v8 }
 0x380   : > { %v4212_v12 = vadd.f32 %v4208_v10, %v4141_v9  ;;  %v7312_v13 = vpop.f32.mrb[49].mxu0  ;;  %v7347_v14 = vpop.f32.mrb[55].mxu1  ;;  %7440 = vmatprep.mubr.msk.f32.mxu0 %vm375_vm2, %v8282_v30 }
 0x382   : > { %v4283_v15 = vadd.f32 %v4279_v57, %v4212_v12 }
 0x383   : > { %v4354_v16 = vpop.f32.mrb[50].mxu0  ;;  %v4855_v17 = vpop.f32.mrb[56].mxu1 }
 0x384   : > { %v4358_v18 = vadd.f32 %v4354_v16, %v4283_v15  ;;  %v7322_v19 = vpop.f32.mrb[51].mxu0  ;;  %v7357_v20 = vpop.f32.mrb[57].mxu1 }
 0x386   : > { %v4429_v22 = vadd.f32 %v4425_v60, %v4358_v18 }
 0x387   : > { %v4496_v23 = vpop.f32.mrb[52].mxu0  ;;  %v4997_v24 = vpop.f32.mrb[58].mxu1 }
 0x388   : > { %v4500_v25 = vadd.f32 %v4496_v23, %v4429_v22  ;;  %v7332_v26 = vpop.f32.mrb[53].mxu0  ;;  %v7367_v27 = vpop.f32.mrb[59].mxu1 }
 0x38a   : > { %v4575_v28 = vadd.f32 %v4571_v4, %v4500_v25 }
 0x38b   : > { %v4644_v29 = vpop.f32.mrb[54].mxu0  ;;  %v5147_v31 = vpop.f32.mrb[60].mxu1 }
 0x38c   : > { %v4576_v32 = vadd.f32 %v4575_v28, %v8288_v62  ;;  %v4715_v33 = vadd.f32 %v4714_v11, %v4644_v29  ;;  %v7342_v34 = vpop.f32.mrb[55].mxu0  ;;  %v7377_v35 = vpop.f32.mrb[61].mxu1 }
 0x38e   : > { %v8309_v36 = vmul.f32 %v7953_v61, %v4576_v32 }
 0x38f   : > { %v4784_v37 = vpop.f32.mrb[56].mxu0  ;;  %v5295_v38 = vpop.f32.mrb[62].mxu1 }
 0x390   : > { %v4788_v39 = vadd.f32 %v4784_v37, %v4715_v33  ;;  %v7352_v40 = vpop.f32.mrb[57].mxu0  ;;  %7433 = vmatprep.subr.msk.mxu1 %vm379_vm1, %v8309_v36  ;;  %v7387_v41 = vpop.f32.mrb[63].mxu1 }
 0x391   : > { %7434 = vmatpush3.msk.msra.mxu1 %vm379_vm1, %v8309_v36 }
 0x392   : > { %v4859_v42 = vadd.f32 %v4855_v17, %v4788_v39  ;;  %7436 = vmatmul.mubr.msk.f32.vlgmr.msra.gmra.mrb[72].mxu1 %vm375_vm2, %v8297_v8 }
 0x393   : > { %v4926_v43 = vpop.f32.mrb[58].mxu0  ;;  %v5435_v44 = vpop.f32.mrb[64].mxu1  ;;  %7445 = vmatprep.mubr.msk.f32.mxu1 %vm375_vm2, %v8282_v30 }
 0x394   : > { %v4930_v45 = vadd.f32 %v4926_v43, %v4859_v42  ;;  %v7362_v46 = vpop.f32.mrb[59].mxu0  ;;  %v7397_v47 = vpop.f32.mrb[65].mxu1 }
 0x396   : > { %v5001_v49 = vadd.f32 %v4997_v24, %v4930_v45 }
 0x397   : > { %v5072_v50 = vpop.f32.mrb[60].mxu0  ;;  %v5577_v51 = vpop.f32.mrb[66].mxu1 }
 0x398   : > { %v5076_v52 = vadd.f32 %v5072_v50, %v5001_v49  ;;  %v7372_v54 = vpop.f32.mrb[61].mxu0  ;;  %v7407_v55 = vpop.f32.mrb[67].mxu1  ;;  %v6289_v50 = vld [vmem:[%s347_s19] sm:$0xf] }
 0x39a   : > { %v5151_v56 = vadd.f32 %v5147_v31, %v5076_v52  ;;  %v6885_v52 = vld [vmem:[%s347_s19 + $0x4] sm:$0xf] }
 0x39b   : > { %v5222_v57 = vpop.f32.mrb[62].mxu0  ;;  %v5719_v58 = vpop.f32.mrb[68].mxu1 }
 0x39c   : > { %v5226_v21 = vadd.f32 %v5222_v57, %v5151_v56  ;;  %v7382_v48 = vpop.f32.mrb[63].mxu0  ;;  %v7417_v59 = vpop.f32.mrb[69].mxu1 }
 0x39d   : > { %v6889_v48 = vld [vmem:[%s347_s19 + $0x8] sm:$0xf] }
 0x39e   : > { %v5227_v53 = vadd.f32 %v5226_v21, %v8288_v62 }
 0x39f   : > { %v5365_v60 = vpop.f32.mrb[64].mxu0  ;;  %v5865_v63 = vpop.f32.mrb[70].mxu1 }
 0x3a0   : > { %v8321_v30 = vmul.f32 %v7953_v61, %v5227_v53  ;;  %v5366_v1 = vadd.f32 %v5365_v60, %v5295_v38  ;;  %v7392_v3 = vpop.f32.mrb[65].mxu0  ;;  %v7427_v4 = vpop.f32.mrb[71].mxu1  ;;  %v6893_v53 = vld [vmem:[%s347_s19 + $0xc] sm:$0xf] }
 0x3a2   : > { %v5439_v5 = vadd.f32 %v5435_v44, %v5366_v1  ;;  %7438 = vmatprep.subr.msk.mxu0 %vm379_vm1, %v8321_v30 }
 0x3a3   : > { %v5506_v6 = vpop.f32.mrb[66].mxu0  ;;  %7439 = vmatpush3.msk.msra.mxu0 %vm379_vm1, %v8321_v30 }
 0x3a4   : > { %v5510_v7 = vadd.f32 %v5506_v6, %v5439_v5  ;;  %v7402_v9 = vpop.f32.mrb[67].mxu0  ;;  %7441 = vmatmul.mubr.msk.f32.vlgmr.msra.gmra.mrb[74].mxu0 %vm375_vm2, %v8297_v8  ;;  %7448 = vmatprep.subr.mxu0 %v7507_v0 }
 0x3a5   : > { %7450 = vmatprep.mubr.msk.f32.mxu0 %vm7508_vm0, %v7507_v0 }
 0x3a6   : > { %v5581_v10 = vadd.f32 %v5577_v51, %v5510_v7 }
 0x3a7   : > { %v5648_v11 = vpop.f32.mrb[68].mxu0 }
 0x3a8   : > { %v5652_v12 = vadd.f32 %v5648_v11, %v5581_v10  ;;  %v7412_v13 = vpop.f32.mrb[69].mxu0 }
 0x3aa   : > { %v5723_v14 = vadd.f32 %v5719_v58, %v5652_v12 }
 0x3ab   : > { %v5790_v15 = vpop.f32.mrb[70].mxu0 }
 0x3ac   : > { %v5794_v16 = vadd.f32 %v5790_v15, %v5723_v14  ;;  %v7422_v17 = vpop.f32.mrb[71].mxu0 }
 0x3ae   : > { %v5869_v18 = vadd.f32 %v5865_v63, %v5794_v16 }
 0x3b0   : > { %v5870_v19 = vadd.f32 %v5869_v18, %v8288_v62 }
 0x3b2   : > { %v8334_v20 = vmul.f32 %v7953_v61, %v5870_v19 }
 0x3b4   : > { %7443 = vmatprep.subr.msk.mxu1 %vm379_vm1, %v8334_v20 }
 0x3b5   : > { %7444 = vmatpush3.msk.msra.mxu1 %vm379_vm1, %v8334_v20 }
 0x3b6   : > { %7446 = vmatmul.mubr.msk.f32.vlgmr.msra.gmra.mrb[74].mxu1 %vm375_vm2, %v8297_v8  ;;  %7453 = vmatprep.subr.mxu1 %v7507_v0 }
 0x3b7   : > { %7455 = vmatprep.mubr.msk.f32.mxu1 %vm7508_vm0, %v7507_v0 }
 0x452   : > { %v7432_v22 = vpop.f32.mrb[72].mxu0 }
 0x453   : > { %v5949_v23 = vpop.f32.mrb[73].mxu0  ;;  %7454 = vmatpush3.msk.msra.mxu1 %vm379_vm1, %v7432_v22 }
 0x454   : > { %7463 = vmatprep.subr.mxu1 %v7507_v0 }
 0x465   : > { %v7437_v61 = vpop.f32.mrb[72].mxu1 }
 0x466   : > { %v6027_v62 = vpop.f32.mrb[73].mxu1 }
 0x467   : > { %v6192_v24 = vmax.f32 %v5949_v23, %v6027_v62  ;;  %v6195_v25 = vadd.f32 %v6027_v62, %v5949_v23 }
 0x477   : > { %v7442_v26 = vpop.f32.mrb[74].mxu0 }
 0x478   : > { %v6105_v27 = vpop.f32.mrb[75].mxu0 }
 0x479   : > { %v6196_v28 = vadd.f32 %v6195_v25, %v6105_v27 }
 0x489   : > { %v7447_v29 = vpop.f32.mrb[74].mxu1 }
 0x48a   : > { %v6183_v8 = vpop.f32.mrb[75].mxu1 }
 0x48b   : > { %v6193_v31 = vmax.f32 %v6105_v27, %v6183_v8  ;;  %v6197_v32 = vadd.f32 %v6196_v28, %v6183_v8 }
 0x48d   : > { %v6194_v33 = vmax.f32 %v6192_v24, %v6193_v31  ;;  %v6198_v34 = vmul.f32 0.25, %v6197_v32 }
 0x48f   : > { %v6199_v35 = vadd.f32 %v6198_v34, %v6194_v33 }
 0x491   : > { %v6201_v37 = vrot.slane %v6199_v35, 4 }
 0x493   : > { %7449 = vmatpush3.xpose.msk.msra.mxu0 %vm6202_vm9, %v6201_v37 }
 0x494   : > { %7458 = vmatprep.subr.mxu0 %v7507_v0 }
 0x496   : > { %7451 = vmatmul.mubr.msk.f32.vlgmr.msra.gmra.mrb[76].mxu0 %vm6202_vm9, %v6199_v35 }
 0x497   : > { %7459 = vmatpush3.msk.msra.mxu0 %vm379_vm1, %v7437_v61  ;;  %7460 = vmatprep.mubr.msk.f32.mxu0 %vm7508_vm0, %v7507_v0 }
 0x498   : > { %7468 = vmatprep.subr.mxu0 %v7507_v0 }
 0x569   : > { %v6273_v38 = vpop.f32.mrb[76].mxu0 }
 0x56a   : > { %v7452_v39 = vpop.f32.mrb[77].mxu0  ;;  %v6278_v40 = vsel %vm6277_vm10, %v6273_v38, -inf }
 0x56b   : > { %6279 = vmax.xlane.f32.xlu0 %v6278_v40 }
 0x5f8   : > { %v6280_v41 = vpop.xlane.xlu0 %6279 }
 0x5f9   : > { %v6281_v42 = vsub.f32 %v6273_v38, %v6280_v41 }
 0x5fb   : > { %v6282_v43 = vmul.f32 1.442695, %v6281_v42 }
 0x5fd   : > { %7495 = vpow2.f32 %v6282_v43 }
 0x607   : > { %v7496_v44 = vpop.eup %7495 }
 0x608   : > { %v6284_v45 = vsel %vm6277_vm10, %v7496_v44, 0.0 }
 0x609   : > { %6285 = vadd.xlane.f32.xlu1 %v6284_v45 }
 0x696   : > { %v6286_v46 = vpop.xlane.xlu1 %6285 }
 0x697   : > { %7497 = vrcp.f32 %v6286_v46 }
 0x6a1   : > { %v7498_v47 = vpop.eup %7497 }
 0x6a2   : > { %v6288_v49 = vmul.f32 %v7498_v47, %v7496_v44 }
 0x6a4   : > { %7456 = vmatmul.mubr.msk.f32.vlgmr.msra.gmra.mrb[76].mxu1 %vm375_vm2, %v6288_v49  ;;  %7461 = vmatmul.mubr.msk.f32.vlgmr.msra.gmra.mrb[78].mxu0 %vm375_vm2, %v6288_v49 }
 0x6a5   : > { %7464 = vmatpush3.msk.msra.mxu1 %vm379_vm1, %v7442_v26  ;;  %7469 = vmatpush3.msk.msra.mxu0 %vm379_vm1, %v7447_v29 }
 0x6a6   : > { %7465 = vmatprep.mubr.msk.f32.mxu1 %vm7508_vm0, %v7507_v0  ;;  %7470 = vmatprep.mubr.msk.f32.mxu0 %vm7508_vm0, %v7507_v0 }
 0x6a8   : > { %7466 = vmatmul.mubr.msk.f32.vlgmr.msra.gmra.mrb[78].mxu1 %vm375_vm2, %v6288_v49  ;;  %7471 = vmatmul.mubr.msk.f32.vlgmr.msra.gmra.mrb[80].mxu0 %vm375_vm2, %v6288_v49 }
 0x777   : > { %v6362_v51 = vpop.f32.mrb[76].mxu1  ;;  %v6440_v54 = vpop.f32.mrb[78].mxu0 }
 0x778   : > { %v6363_v55 = vadd.f32 %v6362_v51, %v8292_v2  ;;  %v6441_v56 = vadd.f32 %v6440_v54, %v8309_v36  ;;  %v7457_v57 = vpop.f32.mrb[77].mxu1  ;;  %v7462_v58 = vpop.f32.mrb[79].mxu0 }
 0x77a   : > { %v6366_v0 = vadd.f32 %v6363_v55, %v6289_v50  ;;  %v6444_v21 = vadd.f32 %v6885_v52, %v6441_v56 }
 0x77b   : > { %v6518_v59 = vpop.f32.mrb[78].mxu1  ;;  %v6596_v60 = vpop.f32.mrb[80].mxu0 }
 0x77c   : > { %6368 = vst.msk [vmem:[%s352_s23] sm:$0xf] %vm6367_vm11, %v6366_v0  ;;  %6888 = vst.msk [vmem:[%s352_s23 + $0x4] sm:$0xf] %vm6367_vm11, %v6444_v21  ;;  %v6519_v2 = vadd.f32 %v6518_v59, %v8321_v30  ;;  %v6597_v36 = vadd.f32 %v6596_v60, %v8334_v20  ;;  %v7467_v63 = vpop.f32.mrb[79].mxu1  ;;  %v7472_v1 = vpop.f32.mrb[81].mxu0 }
 0x77e   : > { %v6522_v3 = vadd.f32 %v6889_v48, %v6519_v2  ;;  %v6600_v4 = vadd.f32 %v6893_v53, %v6597_v36 }
 0x780   : > { %6892 = vst.msk [vmem:[%s352_s23 + $0x8] sm:$0xf] %vm6367_vm11, %v6522_v3  ;;  %6896 = vst.msk [vmem:[%s352_s23 + $0xc] sm:$0xf] %vm6367_vm11, %v6600_v4 }
 0x781 PF: > { %s19_s30 = sadd.s32 1, %s7505_s30  }
 0x782   : > { %p16_p4 = scmp.ge.s32.totalorder %s19_s30, 4  }
 0x784   :  { %18 = sbr.rel (!%p16_p4) target bundleno = 1 (0x1), region = 117 }

</bundles_post_ra>
